<compile_context>
chip_gen: v7x
topology: tpu7x:2x2x1
jax: 0.10.0
libtpu: 0.0.40
codegen_flags: <defaults>
</compile_context>

<pallas_src>
import math
from functools import partial

import jax
import jax.numpy as jnp
from jax.experimental import pallas as pl
from jax.experimental.pallas import tpu as pltpu


# ----------------------------------------------------------------------------
# Pallas kernel: depth-tap (KD) loop over folded-channel matmuls.
# One grid step produces TD output depth slices of one sample, lane-dense.
# ----------------------------------------------------------------------------
def _conv3d_folded_kernel(x_ref, w_ref, b_ref, o_ref, *, TD, KD, relu):
    # x_ref : (Dp, K9, HW)    bf16  depth-padded, (kh,kw,c)-folded volume of one sample
    # w_ref : (KD, Cout, K9)  bf16  per-depth-tap weight slabs
    # b_ref : (Cout, 1)       f32
    # o_ref : (TD, Cout, HW)  bf16/f32
    d0 = pl.multiple_of(pl.program_id(1) * TD, TD)
    Cout = o_ref.shape[1]
    HW = o_ref.shape[2]
    bias = b_ref[...]                                  # (Cout, 1), lane-broadcasts

    for t in range(TD):                                # static unroll (TD <= 8)
        acc = jnp.zeros((Cout, HW), jnp.float32)       # 4 vregs for Cout=16, HW=256
        for kd in range(KD):
            # (Cout, K9) @ (K9, HW) on the MXU, K = KH*KW*C
            acc += jnp.dot(w_ref[kd], x_ref[d0 + t + kd],
                           preferred_element_type=jnp.float32)
        acc += bias                                    # fused bias (f32)
        if relu:
            acc = jnp.maximum(acc, 0.0)                # fused ReLU (f32 epilogue)
        o_ref[t] = acc.astype(o_ref.dtype)             # full-width (lane-dense) store


# ----------------------------------------------------------------------------
# VMEM accounting / limits
# ----------------------------------------------------------------------------
def _padded_vmem_bytes(shape, dtype):
    """Bytes of a VMEM buffer after Mosaic (sublane, lane) tile padding."""
    itemsize = jnp.dtype(dtype).itemsize
    sub = {4: 8, 2: 16, 1: 32}[itemsize]
    s = list(shape)
    if len(s) >= 1:
        s[-1] = -(-s[-1] // 128) * 128
    if len(s) >= 2:
        s[-2] = -(-s[-2] // sub) * sub
    n = 1
    for v in s:
        n *= v
    return n * itemsize


def _vmem_limit_bytes():
    """Generation-aware VMEM ceiling (v7x: 64 MiB physical, v5e/v6e: 128 MiB)."""
    cap = 64 * 1024 * 1024                          # conservative fallback (v7x-sized)
    try:
        cap = int(getattr(pltpu.get_tpu_info(), "vmem_capacity_bytes", cap))
    except Exception:
        pass
    return min(int(cap * 0.85), 110 * 1024 * 1024)


# ----------------------------------------------------------------------------
# Conv3d(k, padding=k//2) + bias (+ ReLU), module-internal (N, D, C, H, W) layout
# ----------------------------------------------------------------------------
def conv3d_bias_relu(x_ndchw, w, b, *, relu=True, out_dtype=jnp.float32):
    N, D, C, H, W = x_ndchw.shape
    Cout, Cin, KD, KH, KW = w.shape
    assert Cin == C
    pd, ph, pw = KD // 2, KH // 2, KW // 2
    Dp, HW, K9 = D + 2 * pd, H * W, KH * KW * C

    # ---- once-per-layer HBM fold: (kh, kw, c) taps -> contraction axis ------
    xp = jnp.pad(x_ndchw, ((0, 0), (pd, pd), (0, 0), (ph, ph), (pw, pw)))
    slabs = [xp[:, :, :, kh:kh + H, kw:kw + W]
             for kh in range(KH) for kw in range(KW)]
    x_fold = jnp.concatenate(slabs, axis=2).reshape(
        N, Dp, K9, HW).astype(jnp.bfloat16)

    # w_fold[kd, co, (kh*KW + kw)*C + c] == w[co, c, kd, kh, kw]
    w_fold = jnp.transpose(w, (2, 0, 3, 4, 1)).reshape(
        KD, Cout, K9).astype(jnp.bfloat16)
    bias = b.reshape(Cout, 1).astype(jnp.float32)

    # ---- depth tile: largest divisor of D (<= 8 for unroll size) that fits --
    vmem_cap = _vmem_limit_bytes()

    def vmem_need(td_):
        return (2 * _padded_vmem_bytes((Dp, K9, HW), jnp.bfloat16)      # input (x2 buf)
                + 2 * _padded_vmem_bytes((KD, Cout, K9), jnp.bfloat16)  # weights
                + 2 * _padded_vmem_bytes((Cout, 1), jnp.float32)        # bias
                + 2 * _padded_vmem_bytes((td_, Cout, HW), out_dtype))   # output (x2 buf)

    td = 1
    for t in range(1, min(D, 8) + 1):
        if D % t == 0 and vmem_need(t) < vmem_cap:
            td = t
    assert vmem_need(td) < vmem_cap, (
        "folded volume too large for whole-sample VMEM residency")
    # TODO(synk): for volumes whose folded (Dp, 9C, H*W) slab exceeds VMEM, stream
    # depth slabs with a halo (manual double buffer via pltpu.make_async_copy).

    kernel = partial(_conv3d_folded_kernel, TD=td, KD=KD, relu=relu)
    out = pl.pallas_call(
        kernel,
        out_shape=jax.ShapeDtypeStruct((N, D, Cout, HW), out_dtype),
        grid_spec=pltpu.PrefetchScalarGridSpec(
            num_scalar_prefetch=0,
            grid=(N, D // td),
            in_specs=[
                # Whole folded volume of sample n; block index ignores d, so it
                # is DMA'd once per sample and reused across depth tiles.
                pl.BlockSpec((None, Dp, K9, HW), lambda n, d: (n, 0, 0, 0)),
                pl.BlockSpec((KD, Cout, K9), lambda n, d: (0, 0, 0)),
                pl.BlockSpec((Cout, 1), lambda n, d: (0, 0)),
            ],
            out_specs=pl.BlockSpec((None, td, Cout, HW),
                                   lambda n, d: (n, d, 0, 0)),
        ),
        compiler_params=pltpu.CompilerParams(
            dimension_semantics=("parallel", "parallel"),
            vmem_limit_bytes=vmem_cap),
    )(x_fold, w_fold, bias)

    return out.reshape(N, D, Cout, H, W)


# ----------------------------------------------------------------------------
# Double3DConv module
# ----------------------------------------------------------------------------
def init_double3dconv_params(key, in_channels, out_channels, k=3):
    """Deterministic synthetic weights (PyTorch-style uniform(-1/sqrt(fan_in), ...))."""
    k1, k2, k3, k4 = jax.random.split(key, 4)

    def conv_init(kw_, kb_, cin, cout):
        bound = 1.0 / math.sqrt(cin * k * k * k)
        w = jax.random.uniform(kw_, (cout, cin, k, k, k), jnp.float32, -bound, bound)
        b = jax.random.uniform(kb_, (cout,), jnp.float32, -bound, bound)
        return {"w": w, "b": b}

    return {"c1": conv_init(k1, k2, in_channels, out_channels),
            "c2": conv_init(k3, k4, out_channels, out_channels)}


def double_3d_conv(params, x_ncdhw):
    """Forward of Double3DConv: (Conv3d(3, pad=1) -> ReLU -> Dropout3d) x 2."""
    x = jnp.transpose(x_ncdhw, (0, 2, 1, 3, 4))        # NCDHW -> (N, D, C, H, W), once
    # Inter-layer activation emitted as bf16 (layer 2 re-casts to bf16 anyway).
    x = conv3d_bias_relu(x, params["c1"]["w"], params["c1"]["b"],
                         relu=True, out_dtype=jnp.bfloat16)
    # TODO(synk): Dropout3d(0.2) train-mode channel masking not implemented
    # (identity in the deterministic / eval forward).
    x = conv3d_bias_relu(x, params["c2"]["w"], params["c2"]["b"],
                         relu=True, out_dtype=jnp.float32)
    return jnp.transpose(x, (0, 2, 1, 3, 4))           # -> NCDHW, once


# ----------------------------------------------------------------------------
# Pure-JAX reference (matches kernel numerics: bf16 operands, f32 accumulation,
# bf16 inter-layer activation)
# ----------------------------------------------------------------------------
def _reference_conv3d(x_ndhwc, w, b, relu=True):
    kd, kh, kw = w.shape[2:]
    pads = ((kd // 2, kd // 2), (kh // 2, kh // 2), (kw // 2, kw // 2))
    xb = x_ndhwc.astype(jnp.bfloat16).astype(jnp.float32)
    wb = w.astype(jnp.bfloat16).astype(jnp.float32)
    y = jax.lax.conv_general_dilated(
        xb, jnp.transpose(wb, (2, 3, 4, 1, 0)),
        window_strides=(1, 1, 1), padding=pads,
        dimension_numbers=("NDHWC", "DHWIO", "NDHWC"),
        precision=jax.lax.Precision.HIGHEST)
    y = y + b.reshape(1, 1, 1, 1, -1).astype(jnp.float32)
    return jnp.maximum(y, 0.0) if relu else y


def reference_double_3d_conv(params, x_ncdhw):
    x = jnp.transpose(x_ncdhw, (0, 2, 3, 4, 1))
    x = _reference_conv3d(x, params["c1"]["w"], params["c1"]["b"], relu=True)
    x = x.astype(jnp.bfloat16)   # kernel stores inter-layer activation as bf16
    x = _reference_conv3d(x, params["c2"]["w"], params["c2"]["b"], relu=True)
    return jnp.transpose(x, (0, 4, 1, 2, 3))


# ----------------------------------------------------------------------------
if __name__ == "__main__":
    N, Cin, Cout = 2, 4, 16
    D = H = W = 16

    key = jax.random.PRNGKey(0)
    kx, kp = jax.random.split(key)
    x = jax.random.normal(kx, (N, Cin, D, H, W), jnp.float32)
    params = init_double3dconv_params(kp, Cin, Cout)

    fwd = jax.jit(double_3d_conv)
    out = jax.block_until_ready(fwd(params, x))

    assert out.shape == (N, Cout, D, H, W)
    assert bool(jnp.isfinite(out).all())

    ref = jax.block_until_ready(reference_double_3d_conv(params, x))
    max_err = float(jnp.max(jnp.abs(out - ref)))
    assert max_err < 3e-2, f"kernel vs reference mismatch: max abs err = {max_err}"

    print("KERNEL_OK")
</pallas_src>

<mosaic_0001>
module attributes {stable_mosaic.version = 11 : i64} {
  func.func @_conv3d_folded_kernel(%arg0: i32, %arg1: i32, %arg2: memref<1x18x36x256xbf16, #tpu.memory_space<vmem>>, %arg3: memref<3x16x36xbf16, #tpu.memory_space<vmem>>, %arg4: memref<16x1xf32, #tpu.memory_space<vmem>>, %arg5: memref<1x8x16x256xbf16, #tpu.memory_space<vmem>>) attributes {dimension_semantics = [#tpu.dimension_semantics<parallel>, #tpu.dimension_semantics<parallel>], iteration_bounds = array<i64: 2, 2>, scalar_prefetch = 0 : i64, scratch_operands = 0 : i64, tpu.core_type = #tpu.core_type<tc>, window_params = [{transform_indices = @transform_0, window_bounds = array<i64: 1, 18, 36, 256>}, {pipeline_mode = #tpu.pipeline_mode<synchronous>, transform_indices = @transform_1, window_bounds = array<i64: 3, 16, 36>}, {pipeline_mode = #tpu.pipeline_mode<synchronous>, transform_indices = @transform_2, window_bounds = array<i64: 16, 1>}, {transform_indices = @transform_3, window_bounds = array<i64: 1, 8, 16, 256>}]} {
    %c8_i32 = arith.constant 8 : i32
    %0 = arith.muli %arg1, %c8_i32 : i32
    %1 = tpu.assume_multiple %0, 8 : i32
    %c0 = arith.constant 0 : index
    %c0_0 = arith.constant 0 : index
    %2 = vector.load %arg4[%c0, %c0_0] : memref<16x1xf32, #tpu.memory_space<vmem>>, vector<16x1xf32>
    %cst = arith.constant 0.000000e+00 : f32
    %3 = vector.broadcast %cst : f32 to vector<16x256xf32>
    %c0_1 = arith.constant 0 : index
    %c0_2 = arith.constant 0 : index
    %c0_3 = arith.constant 0 : index
    %4 = vector.load %arg3[%c0_1, %c0_2, %c0_3] : memref<3x16x36xbf16, #tpu.memory_space<vmem>>, vector<1x16x36xbf16>
    %5 = vector.shape_cast %4 : vector<1x16x36xbf16> to vector<16x36xbf16>
    %c0_i32 = arith.constant 0 : i32
    %6 = arith.addi %1, %c0_i32 : i32
    %c0_i32_4 = arith.constant 0 : i32
    %7 = arith.addi %6, %c0_i32_4 : i32
    %c0_5 = arith.constant 0 : index
    %8 = arith.index_cast %7 : i32 to index
    %c0_6 = arith.constant 0 : index
    %c0_7 = arith.constant 0 : index
    %9 = vector.load %arg2[%c0_5, %8, %c0_6, %c0_7] : memref<1x18x36x256xbf16, #tpu.memory_space<vmem>>, vector<1x1x36x256xbf16>
    %10 = vector.shape_cast %9 : vector<1x1x36x256xbf16> to vector<36x256xbf16>
    %cst_8 = arith.constant dense<0.000000e+00> : vector<16x256xf32>
    %11 = tpu.matmul %5, %10, %cst_8 {dimension_numbers = #tpu.dot_dimension_numbers<[1], [0], [0], [1], [0, 0, 1, 1], [], []>} : vector<16x36xbf16>, vector<36x256xbf16>, vector<16x256xf32> -> vector<16x256xf32>
    %12 = arith.addf %3, %11 : vector<16x256xf32>
    %c1 = arith.constant 1 : index
    %c0_9 = arith.constant 0 : index
    %c0_10 = arith.constant 0 : index
    %13 = vector.load %arg3[%c1, %c0_9, %c0_10] : memref<3x16x36xbf16, #tpu.memory_space<vmem>>, vector<1x16x36xbf16>
    %14 = vector.shape_cast %13 : vector<1x16x36xbf16> to vector<16x36xbf16>
    %c0_i32_11 = arith.constant 0 : i32
    %15 = arith.addi %1, %c0_i32_11 : i32
    %c1_i32 = arith.constant 1 : i32
    %16 = arith.addi %15, %c1_i32 : i32
    %c0_12 = arith.constant 0 : index
    %17 = arith.index_cast %16 : i32 to index
    %c0_13 = arith.constant 0 : index
    %c0_14 = arith.constant 0 : index
    %18 = vector.load %arg2[%c0_12, %17, %c0_13, %c0_14] : memref<1x18x36x256xbf16, #tpu.memory_space<vmem>>, vector<1x1x36x256xbf16>
    %19 = vector.shape_cast %18 : vector<1x1x36x256xbf16> to vector<36x256xbf16>
    %cst_15 = arith.constant dense<0.000000e+00> : vector<16x256xf32>
    %20 = tpu.matmul %14, %19, %cst_15 {dimension_numbers = #tpu.dot_dimension_numbers<[1], [0], [0], [1], [0, 0, 1, 1], [], []>} : vector<16x36xbf16>, vector<36x256xbf16>, vector<16x256xf32> -> vector<16x256xf32>
    %21 = arith.addf %12, %20 : vector<16x256xf32>
    %c2 = arith.constant 2 : index
    %c0_16 = arith.constant 0 : index
    %c0_17 = arith.constant 0 : index
    %22 = vector.load %arg3[%c2, %c0_16, %c0_17] : memref<3x16x36xbf16, #tpu.memory_space<vmem>>, vector<1x16x36xbf16>
    %23 = vector.shape_cast %22 : vector<1x16x36xbf16> to vector<16x36xbf16>
    %c0_i32_18 = arith.constant 0 : i32
    %24 = arith.addi %1, %c0_i32_18 : i32
    %c2_i32 = arith.constant 2 : i32
    %25 = arith.addi %24, %c2_i32 : i32
    %c0_19 = arith.constant 0 : index
    %26 = arith.index_cast %25 : i32 to index
    %c0_20 = arith.constant 0 : index
    %c0_21 = arith.constant 0 : index
    %27 = vector.load %arg2[%c0_19, %26, %c0_20, %c0_21] : memref<1x18x36x256xbf16, #tpu.memory_space<vmem>>, vector<1x1x36x256xbf16>
    %28 = vector.shape_cast %27 : vector<1x1x36x256xbf16> to vector<36x256xbf16>
    %cst_22 = arith.constant dense<0.000000e+00> : vector<16x256xf32>
    %29 = tpu.matmul %23, %28, %cst_22 {dimension_numbers = #tpu.dot_dimension_numbers<[1], [0], [0], [1], [0, 0, 1, 1], [], []>} : vector<16x36xbf16>, vector<36x256xbf16>, vector<16x256xf32> -> vector<16x256xf32>
    %30 = arith.addf %21, %29 : vector<16x256xf32>
    %31 = vector.broadcast %2 : vector<16x1xf32> to vector<16x256xf32>
    %32 = arith.addf %30, %31 : vector<16x256xf32>
    %cst_23 = arith.constant 0.000000e+00 : f32
    %33 = vector.broadcast %cst_23 : f32 to vector<16x256xf32>
    %34 = arith.maximumf %32, %33 : vector<16x256xf32>
    %35 = arith.truncf %34 : vector<16x256xf32> to vector<16x256xbf16>
    %c0_24 = arith.constant 0 : index
    %c0_25 = arith.constant 0 : index
    %c0_26 = arith.constant 0 : index
    %c0_27 = arith.constant 0 : index
    %36 = vector.load %arg5[%c0_24, %c0_25, %c0_26, %c0_27] : memref<1x8x16x256xbf16, #tpu.memory_space<vmem>>, vector<1x1x16x256xbf16>
    %37 = vector.shape_cast %36 : vector<1x1x16x256xbf16> to vector<16x256xbf16>
    %38 = vector.shape_cast %35 : vector<16x256xbf16> to vector<1x1x16x256xbf16>
    tpu.vector_store %arg5[%c0_24, %c0_25, %c0_26, %c0_27], %38 {strides = array<i32>} : memref<1x8x16x256xbf16, #tpu.memory_space<vmem>>, vector<1x1x16x256xbf16>,
    %cst_28 = arith.constant 0.000000e+00 : f32
    %39 = vector.broadcast %cst_28 : f32 to vector<16x256xf32>
    %c0_29 = arith.constant 0 : index
    %c0_30 = arith.constant 0 : index
    %c0_31 = arith.constant 0 : index
    %40 = vector.load %arg3[%c0_29, %c0_30, %c0_31] : memref<3x16x36xbf16, #tpu.memory_space<vmem>>, vector<1x16x36xbf16>
    %41 = vector.shape_cast %40 : vector<1x16x36xbf16> to vector<16x36xbf16>
    %c1_i32_32 = arith.constant 1 : i32
    %42 = arith.addi %1, %c1_i32_32 : i32
    %c0_i32_33 = arith.constant 0 : i32
    %43 = arith.addi %42, %c0_i32_33 : i32
    %c0_34 = arith.constant 0 : index
    %44 = arith.index_cast %43 : i32 to index
    %c0_35 = arith.constant 0 : index
    %c0_36 = arith.constant 0 : index
    %45 = vector.load %arg2[%c0_34, %44, %c0_35, %c0_36] : memref<1x18x36x256xbf16, #tpu.memory_space<vmem>>, vector<1x1x36x256xbf16>
    %46 = vector.shape_cast %45 : vector<1x1x36x256xbf16> to vector<36x256xbf16>
    %cst_37 = arith.constant dense<0.000000e+00> : vector<16x256xf32>
    %47 = tpu.matmul %41, %46, %cst_37 {dimension_numbers = #tpu.dot_dimension_numbers<[1], [0], [0], [1], [0, 0, 1, 1], [], []>} : vector<16x36xbf16>, vector<36x256xbf16>, vector<16x256xf32> -> vector<16x256xf32>
    %48 = arith.addf %39, %47 : vector<16x256xf32>
    %c1_38 = arith.constant 1 : index
    %c0_39 = arith.constant 0 : index
    %c0_40 = arith.constant 0 : index
    %49 = vector.load %arg3[%c1_38, %c0_39, %c0_40] : memref<3x16x36xbf16, #tpu.memory_space<vmem>>, vector<1x16x36xbf16>
    %50 = vector.shape_cast %49 : vector<1x16x36xbf16> to vector<16x36xbf16>
    %c1_i32_41 = arith.constant 1 : i32
    %51 = arith.addi %1, %c1_i32_41 : i32
    %c1_i32_42 = arith.constant 1 : i32
    %52 = arith.addi %51, %c1_i32_42 : i32
    %c0_43 = arith.constant 0 : index
    %53 = arith.index_cast %52 : i32 to index
    %c0_44 = arith.constant 0 : index
    %c0_45 = arith.constant 0 : index
    %54 = vector.load %arg2[%c0_43, %53, %c0_44, %c0_45] : memref<1x18x36x256xbf16, #tpu.memory_space<vmem>>, vector<1x1x36x256xbf16>
    %55 = vector.shape_cast %54 : vector<1x1x36x256xbf16> to vector<36x256xbf16>
    %cst_46 = arith.constant dense<0.000000e+00> : vector<16x256xf32>
    %56 = tpu.matmul %50, %55, %cst_46 {dimension_numbers = #tpu.dot_dimension_numbers<[1], [0], [0], [1], [0, 0, 1, 1], [], []>} : vector<16x36xbf16>, vector<36x256xbf16>, vector<16x256xf32> -> vector<16x256xf32>
    %57 = arith.addf %48, %56 : vector<16x256xf32>
    %c2_47 = arith.constant 2 : index
    %c0_48 = arith.constant 0 : index
    %c0_49 = arith.constant 0 : index
    %58 = vector.load %arg3[%c2_47, %c0_48, %c0_49] : memref<3x16x36xbf16, #tpu.memory_space<vmem>>, vector<1x16x36xbf16>
    %59 = vector.shape_cast %58 : vector<1x16x36xbf16> to vector<16x36xbf16>
    %c1_i32_50 = arith.constant 1 : i32
    %60 = arith.addi %1, %c1_i32_50 : i32
    %c2_i32_51 = arith.constant 2 : i32
    %61 = arith.addi %60, %c2_i32_51 : i32
    %c0_52 = arith.constant 0 : index
    %62 = arith.index_cast %61 : i32 to index
    %c0_53 = arith.constant 0 : index
    %c0_54 = arith.constant 0 : index
    %63 = vector.load %arg2[%c0_52, %62, %c0_53, %c0_54] : memref<1x18x36x256xbf16, #tpu.memory_space<vmem>>, vector<1x1x36x256xbf16>
    %64 = vector.shape_cast %63 : vector<1x1x36x256xbf16> to vector<36x256xbf16>
    %cst_55 = arith.constant dense<0.000000e+00> : vector<16x256xf32>
    %65 = tpu.matmul %59, %64, %cst_55 {dimension_numbers = #tpu.dot_dimension_numbers<[1], [0], [0], [1], [0, 0, 1, 1], [], []>} : vector<16x36xbf16>, vector<36x256xbf16>, vector<16x256xf32> -> vector<16x256xf32>
    %66 = arith.addf %57, %65 : vector<16x256xf32>
    %67 = vector.broadcast %2 : vector<16x1xf32> to vector<16x256xf32>
    %68 = arith.addf %66, %67 : vector<16x256xf32>
    %cst_56 = arith.constant 0.000000e+00 : f32
    %69 = vector.broadcast %cst_56 : f32 to vector<16x256xf32>
    %70 = arith.maximumf %68, %69 : vector<16x256xf32>
    %71 = arith.truncf %70 : vector<16x256xf32> to vector<16x256xbf16>
    %c0_57 = arith.constant 0 : index
    %c1_58 = arith.constant 1 : index
    %c0_59 = arith.constant 0 : index
    %c0_60 = arith.constant 0 : index
    %72 = vector.load %arg5[%c0_57, %c1_58, %c0_59, %c0_60] : memref<1x8x16x256xbf16, #tpu.memory_space<vmem>>, vector<1x1x16x256xbf16>
    %73 = vector.shape_cast %72 : vector<1x1x16x256xbf16> to vector<16x256xbf16>
    %74 = vector.shape_cast %71 : vector<16x256xbf16> to vector<1x1x16x256xbf16>
    tpu.vector_store %arg5[%c0_57, %c1_58, %c0_59, %c0_60], %74 {strides = array<i32>} : memref<1x8x16x256xbf16, #tpu.memory_space<vmem>>, vector<1x1x16x256xbf16>,
    %cst_61 = arith.constant 0.000000e+00 : f32
    %75 = vector.broadcast %cst_61 : f32 to vector<16x256xf32>
    %c0_62 = arith.constant 0 : index
    %c0_63 = arith.constant 0 : index
    %c0_64 = arith.constant 0 : index
    %76 = vector.load %arg3[%c0_62, %c0_63, %c0_64] : memref<3x16x36xbf16, #tpu.memory_space<vmem>>, vector<1x16x36xbf16>
    %77 = vector.shape_cast %76 : vector<1x16x36xbf16> to vector<16x36xbf16>
    %c2_i32_65 = arith.constant 2 : i32
    %78 = arith.addi %1, %c2_i32_65 : i32
    %c0_i32_66 = arith.constant 0 : i32
    %79 = arith.addi %78, %c0_i32_66 : i32
    %c0_67 = arith.constant 0 : index
    %80 = arith.index_cast %79 : i32 to index
    %c0_68 = arith.constant 0 : index
    %c0_69 = arith.constant 0 : index
    %81 = vector.load %arg2[%c0_67, %80, %c0_68, %c0_69] : memref<1x18x36x256xbf16, #tpu.memory_space<vmem>>, vector<1x1x36x256xbf16>
    %82 = vector.shape_cast %81 : vector<1x1x36x256xbf16> to vector<36x256xbf16>
    %cst_70 = arith.constant dense<0.000000e+00> : vector<16x256xf32>
    %83 = tpu.matmul %77, %82, %cst_70 {dimension_numbers = #tpu.dot_dimension_numbers<[1], [0], [0], [1], [0, 0, 1, 1], [], []>} : vector<16x36xbf16>, vector<36x256xbf16>, vector<16x256xf32> -> vector<16x256xf32>
    %84 = arith.addf %75, %83 : vector<16x256xf32>
    %c1_71 = arith.constant 1 : index
    %c0_72 = arith.constant 0 : index
    %c0_73 = arith.constant 0 : index
    %85 = vector.load %arg3[%c1_71, %c0_72, %c0_73] : memref<3x16x36xbf16, #tpu.memory_space<vmem>>, vector<1x16x36xbf16>
    %86 = vector.shape_cast %85 : vector<1x16x36xbf16> to vector<16x36xbf16>
    %c2_i32_74 = arith.constant 2 : i32
    %87 = arith.addi %1, %c2_i32_74 : i32
    %c1_i32_75 = arith.constant 1 : i32
    %88 = arith.addi %87, %c1_i32_75 : i32
    %c0_76 = arith.constant 0 : index
    %89 = arith.index_cast %88 : i32 to index
    %c0_77 = arith.constant 0 : index
    %c0_78 = arith.constant 0 : index
    %90 = vector.load %arg2[%c0_76, %89, %c0_77, %c0_78] : memref<1x18x36x256xbf16, #tpu.memory_space<vmem>>, vector<1x1x36x256xbf16>
    %91 = vector.shape_cast %90 : vector<1x1x36x256xbf16> to vector<36x256xbf16>
    %cst_79 = arith.constant dense<0.000000e+00> : vector<16x256xf32>
    %92 = tpu.matmul %86, %91, %cst_79 {dimension_numbers = #tpu.dot_dimension_numbers<[1], [0], [0], [1], [0, 0, 1, 1], [], []>} : vector<16x36xbf16>, vector<36x256xbf16>, vector<16x256xf32> -> vector<16x256xf32>
    %93 = arith.addf %84, %92 : vector<16x256xf32>
    %c2_80 = arith.constant 2 : index
    %c0_81 = arith.constant 0 : index
    %c0_82 = arith.constant 0 : index
    %94 = vector.load %arg3[%c2_80, %c0_81, %c0_82] : memref<3x16x36xbf16, #tpu.memory_space<vmem>>, vector<1x16x36xbf16>
    %95 = vector.shape_cast %94 : vector<1x16x36xbf16> to vector<16x36xbf16>
    %c2_i32_83 = arith.constant 2 : i32
    %96 = arith.addi %1, %c2_i32_83 : i32
    %c2_i32_84 = arith.constant 2 : i32
    %97 = arith.addi %96, %c2_i32_84 : i32
    %c0_85 = arith.constant 0 : index
    %98 = arith.index_cast %97 : i32 to index
    %c0_86 = arith.constant 0 : index
    %c0_87 = arith.constant 0 : index
    %99 = vector.load %arg2[%c0_85, %98, %c0_86, %c0_87] : memref<1x18x36x256xbf16, #tpu.memory_space<vmem>>, vector<1x1x36x256xbf16>
    %100 = vector.shape_cast %99 : vector<1x1x36x256xbf16> to vector<36x256xbf16>
    %cst_88 = arith.constant dense<0.000000e+00> : vector<16x256xf32>
    %101 = tpu.matmul %95, %100, %cst_88 {dimension_numbers = #tpu.dot_dimension_numbers<[1], [0], [0], [1], [0, 0, 1, 1], [], []>} : vector<16x36xbf16>, vector<36x256xbf16>, vector<16x256xf32> -> vector<16x256xf32>
    %102 = arith.addf %93, %101 : vector<16x256xf32>
    %103 = vector.broadcast %2 : vector<16x1xf32> to vector<16x256xf32>
    %104 = arith.addf %102, %103 : vector<16x256xf32>
    %cst_89 = arith.constant 0.000000e+00 : f32
    %105 = vector.broadcast %cst_89 : f32 to vector<16x256xf32>
    %106 = arith.maximumf %104, %105 : vector<16x256xf32>
    %107 = arith.truncf %106 : vector<16x256xf32> to vector<16x256xbf16>
    %c0_90 = arith.constant 0 : index
    %c2_91 = arith.constant 2 : index
    %c0_92 = arith.constant 0 : index
    %c0_93 = arith.constant 0 : index
    %108 = vector.load %arg5[%c0_90, %c2_91, %c0_92, %c0_93] : memref<1x8x16x256xbf16, #tpu.memory_space<vmem>>, vector<1x1x16x256xbf16>
    %109 = vector.shape_cast %108 : vector<1x1x16x256xbf16> to vector<16x256xbf16>
    %110 = vector.shape_cast %107 : vector<16x256xbf16> to vector<1x1x16x256xbf16>
    tpu.vector_store %arg5[%c0_90, %c2_91, %c0_92, %c0_93], %110 {strides = array<i32>} : memref<1x8x16x256xbf16, #tpu.memory_space<vmem>>, vector<1x1x16x256xbf16>,
    %cst_94 = arith.constant 0.000000e+00 : f32
    %111 = vector.broadcast %cst_94 : f32 to vector<16x256xf32>
    %c0_95 = arith.constant 0 : index
    %c0_96 = arith.constant 0 : index
    %c0_97 = arith.constant 0 : index
    %112 = vector.load %arg3[%c0_95, %c0_96, %c0_97] : memref<3x16x36xbf16, #tpu.memory_space<vmem>>, vector<1x16x36xbf16>
    %113 = vector.shape_cast %112 : vector<1x16x36xbf16> to vector<16x36xbf16>
    %c3_i32 = arith.constant 3 : i32
    %114 = arith.addi %1, %c3_i32 : i32
    %c0_i32_98 = arith.constant 0 : i32
    %115 = arith.addi %114, %c0_i32_98 : i32
    %c0_99 = arith.constant 0 : index
    %116 = arith.index_cast %115 : i32 to index
    %c0_100 = arith.constant 0 : index
    %c0_101 = arith.constant 0 : index
    %117 = vector.load %arg2[%c0_99, %116, %c0_100, %c0_101] : memref<1x18x36x256xbf16, #tpu.memory_space<vmem>>, vector<1x1x36x256xbf16>
    %118 = vector.shape_cast %117 : vector<1x1x36x256xbf16> to vector<36x256xbf16>
    %cst_102 = arith.constant dense<0.000000e+00> : vector<16x256xf32>
    %119 = tpu.matmul %113, %118, %cst_102 {dimension_numbers = #tpu.dot_dimension_numbers<[1], [0], [0], [1], [0, 0, 1, 1], [], []>} : vector<16x36xbf16>, vector<36x256xbf16>, vector<16x256xf32> -> vector<16x256xf32>
    %120 = arith.addf %111, %119 : vector<16x256xf32>
    %c1_103 = arith.constant 1 : index
    %c0_104 = arith.constant 0 : index
    %c0_105 = arith.constant 0 : index
    %121 = vector.load %arg3[%c1_103, %c0_104, %c0_105] : memref<3x16x36xbf16, #tpu.memory_space<vmem>>, vector<1x16x36xbf16>
    %122 = vector.shape_cast %121 : vector<1x16x36xbf16> to vector<16x36xbf16>
    %c3_i32_106 = arith.constant 3 : i32
    %123 = arith.addi %1, %c3_i32_106 : i32
    %c1_i32_107 = arith.constant 1 : i32
    %124 = arith.addi %123, %c1_i32_107 : i32
    %c0_108 = arith.constant 0 : index
    %125 = arith.index_cast %124 : i32 to index
    %c0_109 = arith.constant 0 : index
    %c0_110 = arith.constant 0 : index
    %126 = vector.load %arg2[%c0_108, %125, %c0_109, %c0_110] : memref<1x18x36x256xbf16, #tpu.memory_space<vmem>>, vector<1x1x36x256xbf16>
    %127 = vector.shape_cast %126 : vector<1x1x36x256xbf16> to vector<36x256xbf16>
    %cst_111 = arith.constant dense<0.000000e+00> : vector<16x256xf32>
    %128 = tpu.matmul %122, %127, %cst_111 {dimension_numbers = #tpu.dot_dimension_numbers<[1], [0], [0], [1], [0, 0, 1, 1], [], []>} : vector<16x36xbf16>, vector<36x256xbf16>, vector<16x256xf32> -> vector<16x256xf32>
    %129 = arith.addf %120, %128 : vector<16x256xf32>
    %c2_112 = arith.constant 2 : index
    %c0_113 = arith.constant 0 : index
    %c0_114 = arith.constant 0 : index
    %130 = vector.load %arg3[%c2_112, %c0_113, %c0_114] : memref<3x16x36xbf16, #tpu.memory_space<vmem>>, vector<1x16x36xbf16>
    %131 = vector.shape_cast %130 : vector<1x16x36xbf16> to vector<16x36xbf16>
    %c3_i32_115 = arith.constant 3 : i32
    %132 = arith.addi %1, %c3_i32_115 : i32
    %c2_i32_116 = arith.constant 2 : i32
    %133 = arith.addi %132, %c2_i32_116 : i32
    %c0_117 = arith.constant 0 : index
    %134 = arith.index_cast %133 : i32 to index
    %c0_118 = arith.constant 0 : index
    %c0_119 = arith.constant 0 : index
    %135 = vector.load %arg2[%c0_117, %134, %c0_118, %c0_119] : memref<1x18x36x256xbf16, #tpu.memory_space<vmem>>, vector<1x1x36x256xbf16>
    %136 = vector.shape_cast %135 : vector<1x1x36x256xbf16> to vector<36x256xbf16>
    %cst_120 = arith.constant dense<0.000000e+00> : vector<16x256xf32>
    %137 = tpu.matmul %131, %136, %cst_120 {dimension_numbers = #tpu.dot_dimension_numbers<[1], [0], [0], [1], [0, 0, 1, 1], [], []>} : vector<16x36xbf16>, vector<36x256xbf16>, vector<16x256xf32> -> vector<16x256xf32>
    %138 = arith.addf %129, %137 : vector<16x256xf32>
    %139 = vector.broadcast %2 : vector<16x1xf32> to vector<16x256xf32>
    %140 = arith.addf %138, %139 : vector<16x256xf32>
    %cst_121 = arith.constant 0.000000e+00 : f32
    %141 = vector.broadcast %cst_121 : f32 to vector<16x256xf32>
    %142 = arith.maximumf %140, %141 : vector<16x256xf32>
    %143 = arith.truncf %142 : vector<16x256xf32> to vector<16x256xbf16>
    %c0_122 = arith.constant 0 : index
    %c3 = arith.constant 3 : index
    %c0_123 = arith.constant 0 : index
    %c0_124 = arith.constant 0 : index
    %144 = vector.load %arg5[%c0_122, %c3, %c0_123, %c0_124] : memref<1x8x16x256xbf16, #tpu.memory_space<vmem>>, vector<1x1x16x256xbf16>
    %145 = vector.shape_cast %144 : vector<1x1x16x256xbf16> to vector<16x256xbf16>
    %146 = vector.shape_cast %143 : vector<16x256xbf16> to vector<1x1x16x256xbf16>
    tpu.vector_store %arg5[%c0_122, %c3, %c0_123, %c0_124], %146 {strides = array<i32>} : memref<1x8x16x256xbf16, #tpu.memory_space<vmem>>, vector<1x1x16x256xbf16>,
    %cst_125 = arith.constant 0.000000e+00 : f32
    %147 = vector.broadcast %cst_125 : f32 to vector<16x256xf32>
    %c0_126 = arith.constant 0 : index
    %c0_127 = arith.constant 0 : index
    %c0_128 = arith.constant 0 : index
    %148 = vector.load %arg3[%c0_126, %c0_127, %c0_128] : memref<3x16x36xbf16, #tpu.memory_space<vmem>>, vector<1x16x36xbf16>
    %149 = vector.shape_cast %148 : vector<1x16x36xbf16> to vector<16x36xbf16>
    %c4_i32 = arith.constant 4 : i32
    %150 = arith.addi %1, %c4_i32 : i32
    %c0_i32_129 = arith.constant 0 : i32
    %151 = arith.addi %150, %c0_i32_129 : i32
    %c0_130 = arith.constant 0 : index
    %152 = arith.index_cast %151 : i32 to index
    %c0_131 = arith.constant 0 : index
    %c0_132 = arith.constant 0 : index
    %153 = vector.load %arg2[%c0_130, %152, %c0_131, %c0_132] : memref<1x18x36x256xbf16, #tpu.memory_space<vmem>>, vector<1x1x36x256xbf16>
    %154 = vector.shape_cast %153 : vector<1x1x36x256xbf16> to vector<36x256xbf16>
    %cst_133 = arith.constant dense<0.000000e+00> : vector<16x256xf32>
    %155 = tpu.matmul %149, %154, %cst_133 {dimension_numbers = #tpu.dot_dimension_numbers<[1], [0], [0], [1], [0, 0, 1, 1], [], []>} : vector<16x36xbf16>, vector<36x256xbf16>, vector<16x256xf32> -> vector<16x256xf32>
    %156 = arith.addf %147, %155 : vector<16x256xf32>
    %c1_134 = arith.constant 1 : index
    %c0_135 = arith.constant 0 : index
    %c0_136 = arith.constant 0 : index
    %157 = vector.load %arg3[%c1_134, %c0_135, %c0_136] : memref<3x16x36xbf16, #tpu.memory_space<vmem>>, vector<1x16x36xbf16>
    %158 = vector.shape_cast %157 : vector<1x16x36xbf16> to vector<16x36xbf16>
    %c4_i32_137 = arith.constant 4 : i32
    %159 = arith.addi %1, %c4_i32_137 : i32
    %c1_i32_138 = arith.constant 1 : i32
    %160 = arith.addi %159, %c1_i32_138 : i32
    %c0_139 = arith.constant 0 : index
    %161 = arith.index_cast %160 : i32 to index
    %c0_140 = arith.constant 0 : index
    %c0_141 = arith.constant 0 : index
    %162 = vector.load %arg2[%c0_139, %161, %c0_140, %c0_141] : memref<1x18x36x256xbf16, #tpu.memory_space<vmem>>, vector<1x1x36x256xbf16>
    %163 = vector.shape_cast %162 : vector<1x1x36x256xbf16> to vector<36x256xbf16>
    %cst_142 = arith.constant dense<0.000000e+00> : vector<16x256xf32>
    %164 = tpu.matmul %158, %163, %cst_142 {dimension_numbers = #tpu.dot_dimension_numbers<[1], [0], [0], [1], [0, 0, 1, 1], [], []>} : vector<16x36xbf16>, vector<36x256xbf16>, vector<16x256xf32> -> vector<16x256xf32>
    %165 = arith.addf %156, %164 : vector<16x256xf32>
    %c2_143 = arith.constant 2 : index
    %c0_144 = arith.constant 0 : index
    %c0_145 = arith.constant 0 : index
    %166 = vector.load %arg3[%c2_143, %c0_144, %c0_145] : memref<3x16x36xbf16, #tpu.memory_space<vmem>>, vector<1x16x36xbf16>
    %167 = vector.shape_cast %166 : vector<1x16x36xbf16> to vector<16x36xbf16>
    %c4_i32_146 = arith.constant 4 : i32
    %168 = arith.addi %1, %c4_i32_146 : i32
    %c2_i32_147 = arith.constant 2 : i32
    %169 = arith.addi %168, %c2_i32_147 : i32
    %c0_148 = arith.constant 0 : index
    %170 = arith.index_cast %169 : i32 to index
    %c0_149 = arith.constant 0 : index
    %c0_150 = arith.constant 0 : index
    %171 = vector.load %arg2[%c0_148, %170, %c0_149, %c0_150] : memref<1x18x36x256xbf16, #tpu.memory_space<vmem>>, vector<1x1x36x256xbf16>
    %172 = vector.shape_cast %171 : vector<1x1x36x256xbf16> to vector<36x256xbf16>
    %cst_151 = arith.constant dense<0.000000e+00> : vector<16x256xf32>
    %173 = tpu.matmul %167, %172, %cst_151 {dimension_numbers = #tpu.dot_dimension_numbers<[1], [0], [0], [1], [0, 0, 1, 1], [], []>} : vector<16x36xbf16>, vector<36x256xbf16>, vector<16x256xf32> -> vector<16x256xf32>
    %174 = arith.addf %165, %173 : vector<16x256xf32>
    %175 = vector.broadcast %2 : vector<16x1xf32> to vector<16x256xf32>
    %176 = arith.addf %174, %175 : vector<16x256xf32>
    %cst_152 = arith.constant 0.000000e+00 : f32
    %177 = vector.broadcast %cst_152 : f32 to vector<16x256xf32>
    %178 = arith.maximumf %176, %177 : vector<16x256xf32>
    %179 = arith.truncf %178 : vector<16x256xf32> to vector<16x256xbf16>
    %c0_153 = arith.constant 0 : index
    %c4 = arith.constant 4 : index
    %c0_154 = arith.constant 0 : index
    %c0_155 = arith.constant 0 : index
    %180 = vector.load %arg5[%c0_153, %c4, %c0_154, %c0_155] : memref<1x8x16x256xbf16, #tpu.memory_space<vmem>>, vector<1x1x16x256xbf16>
    %181 = vector.shape_cast %180 : vector<1x1x16x256xbf16> to vector<16x256xbf16>
    %182 = vector.shape_cast %179 : vector<16x256xbf16> to vector<1x1x16x256xbf16>
    tpu.vector_store %arg5[%c0_153, %c4, %c0_154, %c0_155], %182 {strides = array<i32>} : memref<1x8x16x256xbf16, #tpu.memory_space<vmem>>, vector<1x1x16x256xbf16>,
    %cst_156 = arith.constant 0.000000e+00 : f32
    %183 = vector.broadcast %cst_156 : f32 to vector<16x256xf32>
    %c0_157 = arith.constant 0 : index
    %c0_158 = arith.constant 0 : index
    %c0_159 = arith.constant 0 : index
    %184 = vector.load %arg3[%c0_157, %c0_158, %c0_159] : memref<3x16x36xbf16, #tpu.memory_space<vmem>>, vector<1x16x36xbf16>
    %185 = vector.shape_cast %184 : vector<1x16x36xbf16> to vector<16x36xbf16>
    %c5_i32 = arith.constant 5 : i32
    %186 = arith.addi %1, %c5_i32 : i32
    %c0_i32_160 = arith.constant 0 : i32
    %187 = arith.addi %186, %c0_i32_160 : i32
    %c0_161 = arith.constant 0 : index
    %188 = arith.index_cast %187 : i32 to index
    %c0_162 = arith.constant 0 : index
    %c0_163 = arith.constant 0 : index
    %189 = vector.load %arg2[%c0_161, %188, %c0_162, %c0_163] : memref<1x18x36x256xbf16, #tpu.memory_space<vmem>>, vector<1x1x36x256xbf16>
    %190 = vector.shape_cast %189 : vector<1x1x36x256xbf16> to vector<36x256xbf16>
    %cst_164 = arith.constant dense<0.000000e+00> : vector<16x256xf32>
    %191 = tpu.matmul %185, %190, %cst_164 {dimension_numbers = #tpu.dot_dimension_numbers<[1], [0], [0], [1], [0, 0, 1, 1], [], []>} : vector<16x36xbf16>, vector<36x256xbf16>, vector<16x256xf32> -> vector<16x256xf32>
    %192 = arith.addf %183, %191 : vector<16x256xf32>
    %c1_165 = arith.constant 1 : index
    %c0_166 = arith.constant 0 : index
    %c0_167 = arith.constant 0 : index
    %193 = vector.load %arg3[%c1_165, %c0_166, %c0_167] : memref<3x16x36xbf16, #tpu.memory_space<vmem>>, vector<1x16x36xbf16>
    %194 = vector.shape_cast %193 : vector<1x16x36xbf16> to vector<16x36xbf16>
    %c5_i32_168 = arith.constant 5 : i32
    %195 = arith.addi %1, %c5_i32_168 : i32
    %c1_i32_169 = arith.constant 1 : i32
    %196 = arith.addi %195, %c1_i32_169 : i32
    %c0_170 = arith.constant 0 : index
    %197 = arith.index_cast %196 : i32 to index
    %c0_171 = arith.constant 0 : index
    %c0_172 = arith.constant 0 : index
    %198 = vector.load %arg2[%c0_170, %197, %c0_171, %c0_172] : memref<1x18x36x256xbf16, #tpu.memory_space<vmem>>, vector<1x1x36x256xbf16>
    %199 = vector.shape_cast %198 : vector<1x1x36x256xbf16> to vector<36x256xbf16>
    %cst_173 = arith.constant dense<0.000000e+00> : vector<16x256xf32>
    %200 = tpu.matmul %194, %199, %cst_173 {dimension_numbers = #tpu.dot_dimension_numbers<[1], [0], [0], [1], [0, 0, 1, 1], [], []>} : vector<16x36xbf16>, vector<36x256xbf16>, vector<16x256xf32> -> vector<16x256xf32>
    %201 = arith.addf %192, %200 : vector<16x256xf32>
    %c2_174 = arith.constant 2 : index
    %c0_175 = arith.constant 0 : index
    %c0_176 = arith.constant 0 : index
    %202 = vector.load %arg3[%c2_174, %c0_175, %c0_176] : memref<3x16x36xbf16, #tpu.memory_space<vmem>>, vector<1x16x36xbf16>
    %203 = vector.shape_cast %202 : vector<1x16x36xbf16> to vector<16x36xbf16>
    %c5_i32_177 = arith.constant 5 : i32
    %204 = arith.addi %1, %c5_i32_177 : i32
    %c2_i32_178 = arith.constant 2 : i32
    %205 = arith.addi %204, %c2_i32_178 : i32
    %c0_179 = arith.constant 0 : index
    %206 = arith.index_cast %205 : i32 to index
    %c0_180 = arith.constant 0 : index
    %c0_181 = arith.constant 0 : index
    %207 = vector.load %arg2[%c0_179, %206, %c0_180, %c0_181] : memref<1x18x36x256xbf16, #tpu.memory_space<vmem>>, vector<1x1x36x256xbf16>
    %208 = vector.shape_cast %207 : vector<1x1x36x256xbf16> to vector<36x256xbf16>
    %cst_182 = arith.constant dense<0.000000e+00> : vector<16x256xf32>
    %209 = tpu.matmul %203, %208, %cst_182 {dimension_numbers = #tpu.dot_dimension_numbers<[1], [0], [0], [1], [0, 0, 1, 1], [], []>} : vector<16x36xbf16>, vector<36x256xbf16>, vector<16x256xf32> -> vector<16x256xf32>
    %210 = arith.addf %201, %209 : vector<16x256xf32>
    %211 = vector.broadcast %2 : vector<16x1xf32> to vector<16x256xf32>
    %212 = arith.addf %210, %211 : vector<16x256xf32>
    %cst_183 = arith.constant 0.000000e+00 : f32
    %213 = vector.broadcast %cst_183 : f32 to vector<16x256xf32>
    %214 = arith.maximumf %212, %213 : vector<16x256xf32>
    %215 = arith.truncf %214 : vector<16x256xf32> to vector<16x256xbf16>
    %c0_184 = arith.constant 0 : index
    %c5 = arith.constant 5 : index
    %c0_185 = arith.constant 0 : index
    %c0_186 = arith.constant 0 : index
    %216 = vector.load %arg5[%c0_184, %c5, %c0_185, %c0_186] : memref<1x8x16x256xbf16, #tpu.memory_space<vmem>>, vector<1x1x16x256xbf16>
    %217 = vector.shape_cast %216 : vector<1x1x16x256xbf16> to vector<16x256xbf16>
    %218 = vector.shape_cast %215 : vector<16x256xbf16> to vector<1x1x16x256xbf16>
    tpu.vector_store %arg5[%c0_184, %c5, %c0_185, %c0_186], %218 {strides = array<i32>} : memref<1x8x16x256xbf16, #tpu.memory_space<vmem>>, vector<1x1x16x256xbf16>,
    %cst_187 = arith.constant 0.000000e+00 : f32
    %219 = vector.broadcast %cst_187 : f32 to vector<16x256xf32>
    %c0_188 = arith.constant 0 : index
    %c0_189 = arith.constant 0 : index
    %c0_190 = arith.constant 0 : index
    %220 = vector.load %arg3[%c0_188, %c0_189, %c0_190] : memref<3x16x36xbf16, #tpu.memory_space<vmem>>, vector<1x16x36xbf16>
    %221 = vector.shape_cast %220 : vector<1x16x36xbf16> to vector<16x36xbf16>
    %c6_i32 = arith.constant 6 : i32
    %222 = arith.addi %1, %c6_i32 : i32
    %c0_i32_191 = arith.constant 0 : i32
    %223 = arith.addi %222, %c0_i32_191 : i32
    %c0_192 = arith.constant 0 : index
    %224 = arith.index_cast %223 : i32 to index
    %c0_193 = arith.constant 0 : index
    %c0_194 = arith.constant 0 : index
    %225 = vector.load %arg2[%c0_192, %224, %c0_193, %c0_194] : memref<1x18x36x256xbf16, #tpu.memory_space<vmem>>, vector<1x1x36x256xbf16>
    %226 = vector.shape_cast %225 : vector<1x1x36x256xbf16> to vector<36x256xbf16>
    %cst_195 = arith.constant dense<0.000000e+00> : vector<16x256xf32>
    %227 = tpu.matmul %221, %226, %cst_195 {dimension_numbers = #tpu.dot_dimension_numbers<[1], [0], [0], [1], [0, 0, 1, 1], [], []>} : vector<16x36xbf16>, vector<36x256xbf16>, vector<16x256xf32> -> vector<16x256xf32>
    %228 = arith.addf %219, %227 : vector<16x256xf32>
    %c1_196 = arith.constant 1 : index
    %c0_197 = arith.constant 0 : index
    %c0_198 = arith.constant 0 : index
    %229 = vector.load %arg3[%c1_196, %c0_197, %c0_198] : memref<3x16x36xbf16, #tpu.memory_space<vmem>>, vector<1x16x36xbf16>
    %230 = vector.shape_cast %229 : vector<1x16x36xbf16> to vector<16x36xbf16>
    %c6_i32_199 = arith.constant 6 : i32
    %231 = arith.addi %1, %c6_i32_199 : i32
    %c1_i32_200 = arith.constant 1 : i32
    %232 = arith.addi %231, %c1_i32_200 : i32
    %c0_201 = arith.constant 0 : index
    %233 = arith.index_cast %232 : i32 to index
    %c0_202 = arith.constant 0 : index
    %c0_203 = arith.constant 0 : index
    %234 = vector.load %arg2[%c0_201, %233, %c0_202, %c0_203] : memref<1x18x36x256xbf16, #tpu.memory_space<vmem>>, vector<1x1x36x256xbf16>
    %235 = vector.shape_cast %234 : vector<1x1x36x256xbf16> to vector<36x256xbf16>
    %cst_204 = arith.constant dense<0.000000e+00> : vector<16x256xf32>
    %236 = tpu.matmul %230, %235, %cst_204 {dimension_numbers = #tpu.dot_dimension_numbers<[1], [0], [0], [1], [0, 0, 1, 1], [], []>} : vector<16x36xbf16>, vector<36x256xbf16>, vector<16x256xf32> -> vector<16x256xf32>
    %237 = arith.addf %228, %236 : vector<16x256xf32>
    %c2_205 = arith.constant 2 : index
    %c0_206 = arith.constant 0 : index
    %c0_207 = arith.constant 0 : index
    %238 = vector.load %arg3[%c2_205, %c0_206, %c0_207] : memref<3x16x36xbf16, #tpu.memory_space<vmem>>, vector<1x16x36xbf16>
    %239 = vector.shape_cast %238 : vector<1x16x36xbf16> to vector<16x36xbf16>
    %c6_i32_208 = arith.constant 6 : i32
    %240 = arith.addi %1, %c6_i32_208 : i32
    %c2_i32_209 = arith.constant 2 : i32
    %241 = arith.addi %240, %c2_i32_209 : i32
    %c0_210 = arith.constant 0 : index
    %242 = arith.index_cast %241 : i32 to index
    %c0_211 = arith.constant 0 : index
    %c0_212 = arith.constant 0 : index
    %243 = vector.load %arg2[%c0_210, %242, %c0_211, %c0_212] : memref<1x18x36x256xbf16, #tpu.memory_space<vmem>>, vector<1x1x36x256xbf16>
    %244 = vector.shape_cast %243 : vector<1x1x36x256xbf16> to vector<36x256xbf16>
    %cst_213 = arith.constant dense<0.000000e+00> : vector<16x256xf32>
    %245 = tpu.matmul %239, %244, %cst_213 {dimension_numbers = #tpu.dot_dimension_numbers<[1], [0], [0], [1], [0, 0, 1, 1], [], []>} : vector<16x36xbf16>, vector<36x256xbf16>, vector<16x256xf32> -> vector<16x256xf32>
    %246 = arith.addf %237, %245 : vector<16x256xf32>
    %247 = vector.broadcast %2 : vector<16x1xf32> to vector<16x256xf32>
    %248 = arith.addf %246, %247 : vector<16x256xf32>
    %cst_214 = arith.constant 0.000000e+00 : f32
    %249 = vector.broadcast %cst_214 : f32 to vector<16x256xf32>
    %250 = arith.maximumf %248, %249 : vector<16x256xf32>
    %251 = arith.truncf %250 : vector<16x256xf32> to vector<16x256xbf16>
    %c0_215 = arith.constant 0 : index
    %c6 = arith.constant 6 : index
    %c0_216 = arith.constant 0 : index
    %c0_217 = arith.constant 0 : index
    %252 = vector.load %arg5[%c0_215, %c6, %c0_216, %c0_217] : memref<1x8x16x256xbf16, #tpu.memory_space<vmem>>, vector<1x1x16x256xbf16>
    %253 = vector.shape_cast %252 : vector<1x1x16x256xbf16> to vector<16x256xbf16>
    %254 = vector.shape_cast %251 : vector<16x256xbf16> to vector<1x1x16x256xbf16>
    tpu.vector_store %arg5[%c0_215, %c6, %c0_216, %c0_217], %254 {strides = array<i32>} : memref<1x8x16x256xbf16, #tpu.memory_space<vmem>>, vector<1x1x16x256xbf16>,
    %cst_218 = arith.constant 0.000000e+00 : f32
    %255 = vector.broadcast %cst_218 : f32 to vector<16x256xf32>
    %c0_219 = arith.constant 0 : index
    %c0_220 = arith.constant 0 : index
    %c0_221 = arith.constant 0 : index
    %256 = vector.load %arg3[%c0_219, %c0_220, %c0_221] : memref<3x16x36xbf16, #tpu.memory_space<vmem>>, vector<1x16x36xbf16>
    %257 = vector.shape_cast %256 : vector<1x16x36xbf16> to vector<16x36xbf16>
    %c7_i32 = arith.constant 7 : i32
    %258 = arith.addi %1, %c7_i32 : i32
    %c0_i32_222 = arith.constant 0 : i32
    %259 = arith.addi %258, %c0_i32_222 : i32
    %c0_223 = arith.constant 0 : index
    %260 = arith.index_cast %259 : i32 to index
    %c0_224 = arith.constant 0 : index
    %c0_225 = arith.constant 0 : index
    %261 = vector.load %arg2[%c0_223, %260, %c0_224, %c0_225] : memref<1x18x36x256xbf16, #tpu.memory_space<vmem>>, vector<1x1x36x256xbf16>
    %262 = vector.shape_cast %261 : vector<1x1x36x256xbf16> to vector<36x256xbf16>
    %cst_226 = arith.constant dense<0.000000e+00> : vector<16x256xf32>
    %263 = tpu.matmul %257, %262, %cst_226 {dimension_numbers = #tpu.dot_dimension_numbers<[1], [0], [0], [1], [0, 0, 1, 1], [], []>} : vector<16x36xbf16>, vector<36x256xbf16>, vector<16x256xf32> -> vector<16x256xf32>
    %264 = arith.addf %255, %263 : vector<16x256xf32>
    %c1_227 = arith.constant 1 : index
    %c0_228 = arith.constant 0 : index
    %c0_229 = arith.constant 0 : index
    %265 = vector.load %arg3[%c1_227, %c0_228, %c0_229] : memref<3x16x36xbf16, #tpu.memory_space<vmem>>, vector<1x16x36xbf16>
    %266 = vector.shape_cast %265 : vector<1x16x36xbf16> to vector<16x36xbf16>
    %c7_i32_230 = arith.constant 7 : i32
    %267 = arith.addi %1, %c7_i32_230 : i32
    %c1_i32_231 = arith.constant 1 : i32
    %268 = arith.addi %267, %c1_i32_231 : i32
    %c0_232 = arith.constant 0 : index
    %269 = arith.index_cast %268 : i32 to index
    %c0_233 = arith.constant 0 : index
    %c0_234 = arith.constant 0 : index
    %270 = vector.load %arg2[%c0_232, %269, %c0_233, %c0_234] : memref<1x18x36x256xbf16, #tpu.memory_space<vmem>>, vector<1x1x36x256xbf16>
    %271 = vector.shape_cast %270 : vector<1x1x36x256xbf16> to vector<36x256xbf16>
    %cst_235 = arith.constant dense<0.000000e+00> : vector<16x256xf32>
    %272 = tpu.matmul %266, %271, %cst_235 {dimension_numbers = #tpu.dot_dimension_numbers<[1], [0], [0], [1], [0, 0, 1, 1], [], []>} : vector<16x36xbf16>, vector<36x256xbf16>, vector<16x256xf32> -> vector<16x256xf32>
    %273 = arith.addf %264, %272 : vector<16x256xf32>
    %c2_236 = arith.constant 2 : index
    %c0_237 = arith.constant 0 : index
    %c0_238 = arith.constant 0 : index
    %274 = vector.load %arg3[%c2_236, %c0_237, %c0_238] : memref<3x16x36xbf16, #tpu.memory_space<vmem>>, vector<1x16x36xbf16>
    %275 = vector.shape_cast %274 : vector<1x16x36xbf16> to vector<16x36xbf16>
    %c7_i32_239 = arith.constant 7 : i32
    %276 = arith.addi %1, %c7_i32_239 : i32
    %c2_i32_240 = arith.constant 2 : i32
    %277 = arith.addi %276, %c2_i32_240 : i32
    %c0_241 = arith.constant 0 : index
    %278 = arith.index_cast %277 : i32 to index
    %c0_242 = arith.constant 0 : index
    %c0_243 = arith.constant 0 : index
    %279 = vector.load %arg2[%c0_241, %278, %c0_242, %c0_243] : memref<1x18x36x256xbf16, #tpu.memory_space<vmem>>, vector<1x1x36x256xbf16>
    %280 = vector.shape_cast %279 : vector<1x1x36x256xbf16> to vector<36x256xbf16>
    %cst_244 = arith.constant dense<0.000000e+00> : vector<16x256xf32>
    %281 = tpu.matmul %275, %280, %cst_244 {dimension_numbers = #tpu.dot_dimension_numbers<[1], [0], [0], [1], [0, 0, 1, 1], [], []>} : vector<16x36xbf16>, vector<36x256xbf16>, vector<16x256xf32> -> vector<16x256xf32>
    %282 = arith.addf %273, %281 : vector<16x256xf32>
    %283 = vector.broadcast %2 : vector<16x1xf32> to vector<16x256xf32>
    %284 = arith.addf %282, %283 : vector<16x256xf32>
    %cst_245 = arith.constant 0.000000e+00 : f32
    %285 = vector.broadcast %cst_245 : f32 to vector<16x256xf32>
    %286 = arith.maximumf %284, %285 : vector<16x256xf32>
    %287 = arith.truncf %286 : vector<16x256xf32> to vector<16x256xbf16>
    %c0_246 = arith.constant 0 : index
    %c7 = arith.constant 7 : index
    %c0_247 = arith.constant 0 : index
    %c0_248 = arith.constant 0 : index
    %288 = vector.load %arg5[%c0_246, %c7, %c0_247, %c0_248] : memref<1x8x16x256xbf16, #tpu.memory_space<vmem>>, vector<1x1x16x256xbf16>
    %289 = vector.shape_cast %288 : vector<1x1x16x256xbf16> to vector<16x256xbf16>
    %290 = vector.shape_cast %287 : vector<16x256xbf16> to vector<1x1x16x256xbf16>
    tpu.vector_store %arg5[%c0_246, %c7, %c0_247, %c0_248], %290 {strides = array<i32>} : memref<1x8x16x256xbf16, #tpu.memory_space<vmem>>, vector<1x1x16x256xbf16>,
    return
  }
  func.func @transform_0(%arg0: i32, %arg1: i32) -> (i32, i32, i32, i32) {
    %c0_i32 = arith.constant 0 : i32
    %c0_i32_0 = arith.constant 0 : i32
    %c0_i32_1 = arith.constant 0 : i32
    %c0_i32_2 = arith.constant 0 : i32
    return %arg0, %c0_i32, %c0_i32_0, %c0_i32_1 : i32, i32, i32, i32
  }
  func.func @transform_1(%arg0: i32, %arg1: i32) -> (i32, i32, i32) {
    %c0_i32 = arith.constant 0 : i32
    %c0_i32_0 = arith.constant 0 : i32
    %c0_i32_1 = arith.constant 0 : i32
    %c0_i32_2 = arith.constant 0 : i32
    return %c0_i32, %c0_i32_0, %c0_i32_1 : i32, i32, i32
  }
  func.func @transform_2(%arg0: i32, %arg1: i32) -> (i32, i32) {
    %c0_i32 = arith.constant 0 : i32
    %c0_i32_0 = arith.constant 0 : i32
    %c0_i32_1 = arith.constant 0 : i32
    return %c0_i32, %c0_i32_0 : i32, i32
  }
  func.func @transform_3(%arg0: i32, %arg1: i32) -> (i32, i32, i32, i32) {
    %c0_i32 = arith.constant 0 : i32
    %c0_i32_0 = arith.constant 0 : i32
    %c0_i32_1 = arith.constant 0 : i32
    return %arg0, %arg1, %c0_i32, %c0_i32_0 : i32, i32, i32, i32
  }
}

module attributes {stable_mosaic.version = 11 : i64} {
  func.func @_conv3d_folded_kernel(%arg0: i32, %arg1: i32, %arg2: memref<1x18x144x256xbf16, #tpu.memory_space<vmem>>, %arg3: memref<3x16x144xbf16, #tpu.memory_space<vmem>>, %arg4: memref<16x1xf32, #tpu.memory_space<vmem>>, %arg5: memref<1x8x16x256xf32, #tpu.memory_space<vmem>>) attributes {dimension_semantics = [#tpu.dimension_semantics<parallel>, #tpu.dimension_semantics<parallel>], iteration_bounds = array<i64: 2, 2>, scalar_prefetch = 0 : i64, scratch_operands = 0 : i64, tpu.core_type = #tpu.core_type<tc>, window_params = [{transform_indices = @transform_0, window_bounds = array<i64: 1, 18, 144, 256>}, {pipeline_mode = #tpu.pipeline_mode<synchronous>, transform_indices = @transform_1, window_bounds = array<i64: 3, 16, 144>}, {pipeline_mode = #tpu.pipeline_mode<synchronous>, transform_indices = @transform_2, window_bounds = array<i64: 16, 1>}, {transform_indices = @transform_3, window_bounds = array<i64: 1, 8, 16, 256>}]} {
    %c8_i32 = arith.constant 8 : i32
    %0 = arith.muli %arg1, %c8_i32 : i32
    %1 = tpu.assume_multiple %0, 8 : i32
    %c0 = arith.constant 0 : index
    %c0_0 = arith.constant 0 : index
    %2 = vector.load %arg4[%c0, %c0_0] : memref<16x1xf32, #tpu.memory_space<vmem>>, vector<16x1xf32>
    %cst = arith.constant 0.000000e+00 : f32
    %3 = vector.broadcast %cst : f32 to vector<16x256xf32>
    %c0_1 = arith.constant 0 : index
    %c0_2 = arith.constant 0 : index
    %c0_3 = arith.constant 0 : index
    %4 = vector.load %arg3[%c0_1, %c0_2, %c0_3] : memref<3x16x144xbf16, #tpu.memory_space<vmem>>, vector<1x16x144xbf16>
    %5 = vector.shape_cast %4 : vector<1x16x144xbf16> to vector<16x144xbf16>
    %c0_i32 = arith.constant 0 : i32
    %6 = arith.addi %1, %c0_i32 : i32
    %c0_i32_4 = arith.constant 0 : i32
    %7 = arith.addi %6, %c0_i32_4 : i32
    %c0_5 = arith.constant 0 : index
    %8 = arith.index_cast %7 : i32 to index
    %c0_6 = arith.constant 0 : index
    %c0_7 = arith.constant 0 : index
    %9 = vector.load %arg2[%c0_5, %8, %c0_6, %c0_7] : memref<1x18x144x256xbf16, #tpu.memory_space<vmem>>, vector<1x1x144x256xbf16>
    %10 = vector.shape_cast %9 : vector<1x1x144x256xbf16> to vector<144x256xbf16>
    %cst_8 = arith.constant dense<0.000000e+00> : vector<16x256xf32>
    %11 = tpu.matmul %5, %10, %cst_8 {dimension_numbers = #tpu.dot_dimension_numbers<[1], [0], [0], [1], [0, 0, 1, 1], [], []>} : vector<16x144xbf16>, vector<144x256xbf16>, vector<16x256xf32> -> vector<16x256xf32>
    %12 = arith.addf %3, %11 : vector<16x256xf32>
    %c1 = arith.constant 1 : index
    %c0_9 = arith.constant 0 : index
    %c0_10 = arith.constant 0 : index
    %13 = vector.load %arg3[%c1, %c0_9, %c0_10] : memref<3x16x144xbf16, #tpu.memory_space<vmem>>, vector<1x16x144xbf16>
    %14 = vector.shape_cast %13 : vector<1x16x144xbf16> to vector<16x144xbf16>
    %c0_i32_11 = arith.constant 0 : i32
    %15 = arith.addi %1, %c0_i32_11 : i32
    %c1_i32 = arith.constant 1 : i32
    %16 = arith.addi %15, %c1_i32 : i32
    %c0_12 = arith.constant 0 : index
    %17 = arith.index_cast %16 : i32 to index
    %c0_13 = arith.constant 0 : index
    %c0_14 = arith.constant 0 : index
    %18 = vector.load %arg2[%c0_12, %17, %c0_13, %c0_14] : memref<1x18x144x256xbf16, #tpu.memory_space<vmem>>, vector<1x1x144x256xbf16>
    %19 = vector.shape_cast %18 : vector<1x1x144x256xbf16> to vector<144x256xbf16>
    %cst_15 = arith.constant dense<0.000000e+00> : vector<16x256xf32>
    %20 = tpu.matmul %14, %19, %cst_15 {dimension_numbers = #tpu.dot_dimension_numbers<[1], [0], [0], [1], [0, 0, 1, 1], [], []>} : vector<16x144xbf16>, vector<144x256xbf16>, vector<16x256xf32> -> vector<16x256xf32>
    %21 = arith.addf %12, %20 : vector<16x256xf32>
    %c2 = arith.constant 2 : index
    %c0_16 = arith.constant 0 : index
    %c0_17 = arith.constant 0 : index
    %22 = vector.load %arg3[%c2, %c0_16, %c0_17] : memref<3x16x144xbf16, #tpu.memory_space<vmem>>, vector<1x16x144xbf16>
    %23 = vector.shape_cast %22 : vector<1x16x144xbf16> to vector<16x144xbf16>
    %c0_i32_18 = arith.constant 0 : i32
    %24 = arith.addi %1, %c0_i32_18 : i32
    %c2_i32 = arith.constant 2 : i32
    %25 = arith.addi %24, %c2_i32 : i32
    %c0_19 = arith.constant 0 : index
    %26 = arith.index_cast %25 : i32 to index
    %c0_20 = arith.constant 0 : index
    %c0_21 = arith.constant 0 : index
    %27 = vector.load %arg2[%c0_19, %26, %c0_20, %c0_21] : memref<1x18x144x256xbf16, #tpu.memory_space<vmem>>, vector<1x1x144x256xbf16>
    %28 = vector.shape_cast %27 : vector<1x1x144x256xbf16> to vector<144x256xbf16>
    %cst_22 = arith.constant dense<0.000000e+00> : vector<16x256xf32>
    %29 = tpu.matmul %23, %28, %cst_22 {dimension_numbers = #tpu.dot_dimension_numbers<[1], [0], [0], [1], [0, 0, 1, 1], [], []>} : vector<16x144xbf16>, vector<144x256xbf16>, vector<16x256xf32> -> vector<16x256xf32>
    %30 = arith.addf %21, %29 : vector<16x256xf32>
    %31 = vector.broadcast %2 : vector<16x1xf32> to vector<16x256xf32>
    %32 = arith.addf %30, %31 : vector<16x256xf32>
    %cst_23 = arith.constant 0.000000e+00 : f32
    %33 = vector.broadcast %cst_23 : f32 to vector<16x256xf32>
    %34 = arith.maximumf %32, %33 : vector<16x256xf32>
    %c0_24 = arith.constant 0 : index
    %c0_25 = arith.constant 0 : index
    %c0_26 = arith.constant 0 : index
    %c0_27 = arith.constant 0 : index
    %35 = vector.load %arg5[%c0_24, %c0_25, %c0_26, %c0_27] : memref<1x8x16x256xf32, #tpu.memory_space<vmem>>, vector<1x1x16x256xf32>
    %36 = vector.shape_cast %35 : vector<1x1x16x256xf32> to vector<16x256xf32>
    %37 = vector.shape_cast %34 : vector<16x256xf32> to vector<1x1x16x256xf32>
    tpu.vector_store %arg5[%c0_24, %c0_25, %c0_26, %c0_27], %37 {strides = array<i32>} : memref<1x8x16x256xf32, #tpu.memory_space<vmem>>, vector<1x1x16x256xf32>,
    %cst_28 = arith.constant 0.000000e+00 : f32
    %38 = vector.broadcast %cst_28 : f32 to vector<16x256xf32>
    %c0_29 = arith.constant 0 : index
    %c0_30 = arith.constant 0 : index
    %c0_31 = arith.constant 0 : index
    %39 = vector.load %arg3[%c0_29, %c0_30, %c0_31] : memref<3x16x144xbf16, #tpu.memory_space<vmem>>, vector<1x16x144xbf16>
    %40 = vector.shape_cast %39 : vector<1x16x144xbf16> to vector<16x144xbf16>
    %c1_i32_32 = arith.constant 1 : i32
    %41 = arith.addi %1, %c1_i32_32 : i32
    %c0_i32_33 = arith.constant 0 : i32
    %42 = arith.addi %41, %c0_i32_33 : i32
    %c0_34 = arith.constant 0 : index
    %43 = arith.index_cast %42 : i32 to index
    %c0_35 = arith.constant 0 : index
    %c0_36 = arith.constant 0 : index
    %44 = vector.load %arg2[%c0_34, %43, %c0_35, %c0_36] : memref<1x18x144x256xbf16, #tpu.memory_space<vmem>>, vector<1x1x144x256xbf16>
    %45 = vector.shape_cast %44 : vector<1x1x144x256xbf16> to vector<144x256xbf16>
    %cst_37 = arith.constant dense<0.000000e+00> : vector<16x256xf32>
    %46 = tpu.matmul %40, %45, %cst_37 {dimension_numbers = #tpu.dot_dimension_numbers<[1], [0], [0], [1], [0, 0, 1, 1], [], []>} : vector<16x144xbf16>, vector<144x256xbf16>, vector<16x256xf32> -> vector<16x256xf32>
    %47 = arith.addf %38, %46 : vector<16x256xf32>
    %c1_38 = arith.constant 1 : index
    %c0_39 = arith.constant 0 : index
    %c0_40 = arith.constant 0 : index
    %48 = vector.load %arg3[%c1_38, %c0_39, %c0_40] : memref<3x16x144xbf16, #tpu.memory_space<vmem>>, vector<1x16x144xbf16>
    %49 = vector.shape_cast %48 : vector<1x16x144xbf16> to vector<16x144xbf16>
    %c1_i32_41 = arith.constant 1 : i32
    %50 = arith.addi %1, %c1_i32_41 : i32
    %c1_i32_42 = arith.constant 1 : i32
    %51 = arith.addi %50, %c1_i32_42 : i32
    %c0_43 = arith.constant 0 : index
    %52 = arith.index_cast %51 : i32 to index
    %c0_44 = arith.constant 0 : index
    %c0_45 = arith.constant 0 : index
    %53 = vector.load %arg2[%c0_43, %52, %c0_44, %c0_45] : memref<1x18x144x256xbf16, #tpu.memory_space<vmem>>, vector<1x1x144x256xbf16>
    %54 = vector.shape_cast %53 : vector<1x1x144x256xbf16> to vector<144x256xbf16>
    %cst_46 = arith.constant dense<0.000000e+00> : vector<16x256xf32>
    %55 = tpu.matmul %49, %54, %cst_46 {dimension_numbers = #tpu.dot_dimension_numbers<[1], [0], [0], [1], [0, 0, 1, 1], [], []>} : vector<16x144xbf16>, vector<144x256xbf16>, vector<16x256xf32> -> vector<16x256xf32>
    %56 = arith.addf %47, %55 : vector<16x256xf32>
    %c2_47 = arith.constant 2 : index
    %c0_48 = arith.constant 0 : index
    %c0_49 = arith.constant 0 : index
    %57 = vector.load %arg3[%c2_47, %c0_48, %c0_49] : memref<3x16x144xbf16, #tpu.memory_space<vmem>>, vector<1x16x144xbf16>
    %58 = vector.shape_cast %57 : vector<1x16x144xbf16> to vector<16x144xbf16>
    %c1_i32_50 = arith.constant 1 : i32
    %59 = arith.addi %1, %c1_i32_50 : i32
    %c2_i32_51 = arith.constant 2 : i32
    %60 = arith.addi %59, %c2_i32_51 : i32
    %c0_52 = arith.constant 0 : index
    %61 = arith.index_cast %60 : i32 to index
    %c0_53 = arith.constant 0 : index
    %c0_54 = arith.constant 0 : index
    %62 = vector.load %arg2[%c0_52, %61, %c0_53, %c0_54] : memref<1x18x144x256xbf16, #tpu.memory_space<vmem>>, vector<1x1x144x256xbf16>
    %63 = vector.shape_cast %62 : vector<1x1x144x256xbf16> to vector<144x256xbf16>
    %cst_55 = arith.constant dense<0.000000e+00> : vector<16x256xf32>
    %64 = tpu.matmul %58, %63, %cst_55 {dimension_numbers = #tpu.dot_dimension_numbers<[1], [0], [0], [1], [0, 0, 1, 1], [], []>} : vector<16x144xbf16>, vector<144x256xbf16>, vector<16x256xf32> -> vector<16x256xf32>
    %65 = arith.addf %56, %64 : vector<16x256xf32>
    %66 = vector.broadcast %2 : vector<16x1xf32> to vector<16x256xf32>
    %67 = arith.addf %65, %66 : vector<16x256xf32>
    %cst_56 = arith.constant 0.000000e+00 : f32
    %68 = vector.broadcast %cst_56 : f32 to vector<16x256xf32>
    %69 = arith.maximumf %67, %68 : vector<16x256xf32>
    %c0_57 = arith.constant 0 : index
    %c1_58 = arith.constant 1 : index
    %c0_59 = arith.constant 0 : index
    %c0_60 = arith.constant 0 : index
    %70 = vector.load %arg5[%c0_57, %c1_58, %c0_59, %c0_60] : memref<1x8x16x256xf32, #tpu.memory_space<vmem>>, vector<1x1x16x256xf32>
    %71 = vector.shape_cast %70 : vector<1x1x16x256xf32> to vector<16x256xf32>
    %72 = vector.shape_cast %69 : vector<16x256xf32> to vector<1x1x16x256xf32>
    tpu.vector_store %arg5[%c0_57, %c1_58, %c0_59, %c0_60], %72 {strides = array<i32>} : memref<1x8x16x256xf32, #tpu.memory_space<vmem>>, vector<1x1x16x256xf32>,
    %cst_61 = arith.constant 0.000000e+00 : f32
    %73 = vector.broadcast %cst_61 : f32 to vector<16x256xf32>
    %c0_62 = arith.constant 0 : index
    %c0_63 = arith.constant 0 : index
    %c0_64 = arith.constant 0 : index
    %74 = vector.load %arg3[%c0_62, %c0_63, %c0_64] : memref<3x16x144xbf16, #tpu.memory_space<vmem>>, vector<1x16x144xbf16>
    %75 = vector.shape_cast %74 : vector<1x16x144xbf16> to vector<16x144xbf16>
    %c2_i32_65 = arith.constant 2 : i32
    %76 = arith.addi %1, %c2_i32_65 : i32
    %c0_i32_66 = arith.constant 0 : i32
    %77 = arith.addi %76, %c0_i32_66 : i32
    %c0_67 = arith.constant 0 : index
    %78 = arith.index_cast %77 : i32 to index
    %c0_68 = arith.constant 0 : index
    %c0_69 = arith.constant 0 : index
    %79 = vector.load %arg2[%c0_67, %78, %c0_68, %c0_69] : memref<1x18x144x256xbf16, #tpu.memory_space<vmem>>, vector<1x1x144x256xbf16>
    %80 = vector.shape_cast %79 : vector<1x1x144x256xbf16> to vector<144x256xbf16>
    %cst_70 = arith.constant dense<0.000000e+00> : vector<16x256xf32>
    %81 = tpu.matmul %75, %80, %cst_70 {dimension_numbers = #tpu.dot_dimension_numbers<[1], [0], [0], [1], [0, 0, 1, 1], [], []>} : vector<16x144xbf16>, vector<144x256xbf16>, vector<16x256xf32> -> vector<16x256xf32>
    %82 = arith.addf %73, %81 : vector<16x256xf32>
    %c1_71 = arith.constant 1 : index
    %c0_72 = arith.constant 0 : index
    %c0_73 = arith.constant 0 : index
    %83 = vector.load %arg3[%c1_71, %c0_72, %c0_73] : memref<3x16x144xbf16, #tpu.memory_space<vmem>>, vector<1x16x144xbf16>
    %84 = vector.shape_cast %83 : vector<1x16x144xbf16> to vector<16x144xbf16>
    %c2_i32_74 = arith.constant 2 : i32
    %85 = arith.addi %1, %c2_i32_74 : i32
    %c1_i32_75 = arith.constant 1 : i32
    %86 = arith.addi %85, %c1_i32_75 : i32
    %c0_76 = arith.constant 0 : index
    %87 = arith.index_cast %86 : i32 to index
    %c0_77 = arith.constant 0 : index
    %c0_78 = arith.constant 0 : index
    %88 = vector.load %arg2[%c0_76, %87, %c0_77, %c0_78] : memref<1x18x144x256xbf16, #tpu.memory_space<vmem>>, vector<1x1x144x256xbf16>
    %89 = vector.shape_cast %88 : vector<1x1x144x256xbf16> to vector<144x256xbf16>
    %cst_79 = arith.constant dense<0.000000e+00> : vector<16x256xf32>
    %90 = tpu.matmul %84, %89, %cst_79 {dimension_numbers = #tpu.dot_dimension_numbers<[1], [0], [0], [1], [0, 0, 1, 1], [], []>} : vector<16x144xbf16>, vector<144x256xbf16>, vector<16x256xf32> -> vector<16x256xf32>
    %91 = arith.addf %82, %90 : vector<16x256xf32>
    %c2_80 = arith.constant 2 : index
    %c0_81 = arith.constant 0 : index
    %c0_82 = arith.constant 0 : index
    %92 = vector.load %arg3[%c2_80, %c0_81, %c0_82] : memref<3x16x144xbf16, #tpu.memory_space<vmem>>, vector<1x16x144xbf16>
    %93 = vector.shape_cast %92 : vector<1x16x144xbf16> to vector<16x144xbf16>
    %c2_i32_83 = arith.constant 2 : i32
    %94 = arith.addi %1, %c2_i32_83 : i32
    %c2_i32_84 = arith.constant 2 : i32
    %95 = arith.addi %94, %c2_i32_84 : i32
    %c0_85 = arith.constant 0 : index
    %96 = arith.index_cast %95 : i32 to index
    %c0_86 = arith.constant 0 : index
    %c0_87 = arith.constant 0 : index
    %97 = vector.load %arg2[%c0_85, %96, %c0_86, %c0_87] : memref<1x18x144x256xbf16, #tpu.memory_space<vmem>>, vector<1x1x144x256xbf16>
    %98 = vector.shape_cast %97 : vector<1x1x144x256xbf16> to vector<144x256xbf16>
    %cst_88 = arith.constant dense<0.000000e+00> : vector<16x256xf32>
    %99 = tpu.matmul %93, %98, %cst_88 {dimension_numbers = #tpu.dot_dimension_numbers<[1], [0], [0], [1], [0, 0, 1, 1], [], []>} : vector<16x144xbf16>, vector<144x256xbf16>, vector<16x256xf32> -> vector<16x256xf32>
    %100 = arith.addf %91, %99 : vector<16x256xf32>
    %101 = vector.broadcast %2 : vector<16x1xf32> to vector<16x256xf32>
    %102 = arith.addf %100, %101 : vector<16x256xf32>
    %cst_89 = arith.constant 0.000000e+00 : f32
    %103 = vector.broadcast %cst_89 : f32 to vector<16x256xf32>
    %104 = arith.maximumf %102, %103 : vector<16x256xf32>
    %c0_90 = arith.constant 0 : index
    %c2_91 = arith.constant 2 : index
    %c0_92 = arith.constant 0 : index
    %c0_93 = arith.constant 0 : index
    %105 = vector.load %arg5[%c0_90, %c2_91, %c0_92, %c0_93] : memref<1x8x16x256xf32, #tpu.memory_space<vmem>>, vector<1x1x16x256xf32>
    %106 = vector.shape_cast %105 : vector<1x1x16x256xf32> to vector<16x256xf32>
    %107 = vector.shape_cast %104 : vector<16x256xf32> to vector<1x1x16x256xf32>
    tpu.vector_store %arg5[%c0_90, %c2_91, %c0_92, %c0_93], %107 {strides = array<i32>} : memref<1x8x16x256xf32, #tpu.memory_space<vmem>>, vector<1x1x16x256xf32>,
    %cst_94 = arith.constant 0.000000e+00 : f32
    %108 = vector.broadcast %cst_94 : f32 to vector<16x256xf32>
    %c0_95 = arith.constant 0 : index
    %c0_96 = arith.constant 0 : index
    %c0_97 = arith.constant 0 : index
    %109 = vector.load %arg3[%c0_95, %c0_96, %c0_97] : memref<3x16x144xbf16, #tpu.memory_space<vmem>>, vector<1x16x144xbf16>
    %110 = vector.shape_cast %109 : vector<1x16x144xbf16> to vector<16x144xbf16>
    %c3_i32 = arith.constant 3 : i32
    %111 = arith.addi %1, %c3_i32 : i32
    %c0_i32_98 = arith.constant 0 : i32
    %112 = arith.addi %111, %c0_i32_98 : i32
    %c0_99 = arith.constant 0 : index
    %113 = arith.index_cast %112 : i32 to index
    %c0_100 = arith.constant 0 : index
    %c0_101 = arith.constant 0 : index
    %114 = vector.load %arg2[%c0_99, %113, %c0_100, %c0_101] : memref<1x18x144x256xbf16, #tpu.memory_space<vmem>>, vector<1x1x144x256xbf16>
    %115 = vector.shape_cast %114 : vector<1x1x144x256xbf16> to vector<144x256xbf16>
    %cst_102 = arith.constant dense<0.000000e+00> : vector<16x256xf32>
    %116 = tpu.matmul %110, %115, %cst_102 {dimension_numbers = #tpu.dot_dimension_numbers<[1], [0], [0], [1], [0, 0, 1, 1], [], []>} : vector<16x144xbf16>, vector<144x256xbf16>, vector<16x256xf32> -> vector<16x256xf32>
    %117 = arith.addf %108, %116 : vector<16x256xf32>
    %c1_103 = arith.constant 1 : index
    %c0_104 = arith.constant 0 : index
    %c0_105 = arith.constant 0 : index
    %118 = vector.load %arg3[%c1_103, %c0_104, %c0_105] : memref<3x16x144xbf16, #tpu.memory_space<vmem>>, vector<1x16x144xbf16>
    %119 = vector.shape_cast %118 : vector<1x16x144xbf16> to vector<16x144xbf16>
    %c3_i32_106 = arith.constant 3 : i32
    %120 = arith.addi %1, %c3_i32_106 : i32
    %c1_i32_107 = arith.constant 1 : i32
    %121 = arith.addi %120, %c1_i32_107 : i32
    %c0_108 = arith.constant 0 : index
    %122 = arith.index_cast %121 : i32 to index
    %c0_109 = arith.constant 0 : index
    %c0_110 = arith.constant 0 : index
    %123 = vector.load %arg2[%c0_108, %122, %c0_109, %c0_110] : memref<1x18x144x256xbf16, #tpu.memory_space<vmem>>, vector<1x1x144x256xbf16>
    %124 = vector.shape_cast %123 : vector<1x1x144x256xbf16> to vector<144x256xbf16>
    %cst_111 = arith.constant dense<0.000000e+00> : vector<16x256xf32>
    %125 = tpu.matmul %119, %124, %cst_111 {dimension_numbers = #tpu.dot_dimension_numbers<[1], [0], [0], [1], [0, 0, 1, 1], [], []>} : vector<16x144xbf16>, vector<144x256xbf16>, vector<16x256xf32> -> vector<16x256xf32>
    %126 = arith.addf %117, %125 : vector<16x256xf32>
    %c2_112 = arith.constant 2 : index
    %c0_113 = arith.constant 0 : index
    %c0_114 = arith.constant 0 : index
    %127 = vector.load %arg3[%c2_112, %c0_113, %c0_114] : memref<3x16x144xbf16, #tpu.memory_space<vmem>>, vector<1x16x144xbf16>
    %128 = vector.shape_cast %127 : vector<1x16x144xbf16> to vector<16x144xbf16>
    %c3_i32_115 = arith.constant 3 : i32
    %129 = arith.addi %1, %c3_i32_115 : i32
    %c2_i32_116 = arith.constant 2 : i32
    %130 = arith.addi %129, %c2_i32_116 : i32
    %c0_117 = arith.constant 0 : index
    %131 = arith.index_cast %130 : i32 to index
    %c0_118 = arith.constant 0 : index
    %c0_119 = arith.constant 0 : index
    %132 = vector.load %arg2[%c0_117, %131, %c0_118, %c0_119] : memref<1x18x144x256xbf16, #tpu.memory_space<vmem>>, vector<1x1x144x256xbf16>
    %133 = vector.shape_cast %132 : vector<1x1x144x256xbf16> to vector<144x256xbf16>
    %cst_120 = arith.constant dense<0.000000e+00> : vector<16x256xf32>
    %134 = tpu.matmul %128, %133, %cst_120 {dimension_numbers = #tpu.dot_dimension_numbers<[1], [0], [0], [1], [0, 0, 1, 1], [], []>} : vector<16x144xbf16>, vector<144x256xbf16>, vector<16x256xf32> -> vector<16x256xf32>
    %135 = arith.addf %126, %134 : vector<16x256xf32>
    %136 = vector.broadcast %2 : vector<16x1xf32> to vector<16x256xf32>
    %137 = arith.addf %135, %136 : vector<16x256xf32>
    %cst_121 = arith.constant 0.000000e+00 : f32
    %138 = vector.broadcast %cst_121 : f32 to vector<16x256xf32>
    %139 = arith.maximumf %137, %138 : vector<16x256xf32>
    %c0_122 = arith.constant 0 : index
    %c3 = arith.constant 3 : index
    %c0_123 = arith.constant 0 : index
    %c0_124 = arith.constant 0 : index
    %140 = vector.load %arg5[%c0_122, %c3, %c0_123, %c0_124] : memref<1x8x16x256xf32, #tpu.memory_space<vmem>>, vector<1x1x16x256xf32>
    %141 = vector.shape_cast %140 : vector<1x1x16x256xf32> to vector<16x256xf32>
    %142 = vector.shape_cast %139 : vector<16x256xf32> to vector<1x1x16x256xf32>
    tpu.vector_store %arg5[%c0_122, %c3, %c0_123, %c0_124], %142 {strides = array<i32>} : memref<1x8x16x256xf32, #tpu.memory_space<vmem>>, vector<1x1x16x256xf32>,
    %cst_125 = arith.constant 0.000000e+00 : f32
    %143 = vector.broadcast %cst_125 : f32 to vector<16x256xf32>
    %c0_126 = arith.constant 0 : index
    %c0_127 = arith.constant 0 : index
    %c0_128 = arith.constant 0 : index
    %144 = vector.load %arg3[%c0_126, %c0_127, %c0_128] : memref<3x16x144xbf16, #tpu.memory_space<vmem>>, vector<1x16x144xbf16>
    %145 = vector.shape_cast %144 : vector<1x16x144xbf16> to vector<16x144xbf16>
    %c4_i32 = arith.constant 4 : i32
    %146 = arith.addi %1, %c4_i32 : i32
    %c0_i32_129 = arith.constant 0 : i32
    %147 = arith.addi %146, %c0_i32_129 : i32
    %c0_130 = arith.constant 0 : index
    %148 = arith.index_cast %147 : i32 to index
    %c0_131 = arith.constant 0 : index
    %c0_132 = arith.constant 0 : index
    %149 = vector.load %arg2[%c0_130, %148, %c0_131, %c0_132] : memref<1x18x144x256xbf16, #tpu.memory_space<vmem>>, vector<1x1x144x256xbf16>
    %150 = vector.shape_cast %149 : vector<1x1x144x256xbf16> to vector<144x256xbf16>
    %cst_133 = arith.constant dense<0.000000e+00> : vector<16x256xf32>
    %151 = tpu.matmul %145, %150, %cst_133 {dimension_numbers = #tpu.dot_dimension_numbers<[1], [0], [0], [1], [0, 0, 1, 1], [], []>} : vector<16x144xbf16>, vector<144x256xbf16>, vector<16x256xf32> -> vector<16x256xf32>
    %152 = arith.addf %143, %151 : vector<16x256xf32>
    %c1_134 = arith.constant 1 : index
    %c0_135 = arith.constant 0 : index
    %c0_136 = arith.constant 0 : index
    %153 = vector.load %arg3[%c1_134, %c0_135, %c0_136] : memref<3x16x144xbf16, #tpu.memory_space<vmem>>, vector<1x16x144xbf16>
    %154 = vector.shape_cast %153 : vector<1x16x144xbf16> to vector<16x144xbf16>
    %c4_i32_137 = arith.constant 4 : i32
    %155 = arith.addi %1, %c4_i32_137 : i32
    %c1_i32_138 = arith.constant 1 : i32
    %156 = arith.addi %155, %c1_i32_138 : i32
    %c0_139 = arith.constant 0 : index
    %157 = arith.index_cast %156 : i32 to index
    %c0_140 = arith.constant 0 : index
    %c0_141 = arith.constant 0 : index
    %158 = vector.load %arg2[%c0_139, %157, %c0_140, %c0_141] : memref<1x18x144x256xbf16, #tpu.memory_space<vmem>>, vector<1x1x144x256xbf16>
    %159 = vector.shape_cast %158 : vector<1x1x144x256xbf16> to vector<144x256xbf16>
    %cst_142 = arith.constant dense<0.000000e+00> : vector<16x256xf32>
    %160 = tpu.matmul %154, %159, %cst_142 {dimension_numbers = #tpu.dot_dimension_numbers<[1], [0], [0], [1], [0, 0, 1, 1], [], []>} : vector<16x144xbf16>, vector<144x256xbf16>, vector<16x256xf32> -> vector<16x256xf32>
    %161 = arith.addf %152, %160 : vector<16x256xf32>
    %c2_143 = arith.constant 2 : index
    %c0_144 = arith.constant 0 : index
    %c0_145 = arith.constant 0 : index
    %162 = vector.load %arg3[%c2_143, %c0_144, %c0_145] : memref<3x16x144xbf16, #tpu.memory_space<vmem>>, vector<1x16x144xbf16>
    %163 = vector.shape_cast %162 : vector<1x16x144xbf16> to vector<16x144xbf16>
    %c4_i32_146 = arith.constant 4 : i32
    %164 = arith.addi %1, %c4_i32_146 : i32
    %c2_i32_147 = arith.constant 2 : i32
    %165 = arith.addi %164, %c2_i32_147 : i32
    %c0_148 = arith.constant 0 : index
    %166 = arith.index_cast %165 : i32 to index
    %c0_149 = arith.constant 0 : index
    %c0_150 = arith.constant 0 : index
    %167 = vector.load %arg2[%c0_148, %166, %c0_149, %c0_150] : memref<1x18x144x256xbf16, #tpu.memory_space<vmem>>, vector<1x1x144x256xbf16>
    %168 = vector.shape_cast %167 : vector<1x1x144x256xbf16> to vector<144x256xbf16>
    %cst_151 = arith.constant dense<0.000000e+00> : vector<16x256xf32>
    %169 = tpu.matmul %163, %168, %cst_151 {dimension_numbers = #tpu.dot_dimension_numbers<[1], [0], [0], [1], [0, 0, 1, 1], [], []>} : vector<16x144xbf16>, vector<144x256xbf16>, vector<16x256xf32> -> vector<16x256xf32>
    %170 = arith.addf %161, %169 : vector<16x256xf32>
    %171 = vector.broadcast %2 : vector<16x1xf32> to vector<16x256xf32>
    %172 = arith.addf %170, %171 : vector<16x256xf32>
    %cst_152 = arith.constant 0.000000e+00 : f32
    %173 = vector.broadcast %cst_152 : f32 to vector<16x256xf32>
    %174 = arith.maximumf %172, %173 : vector<16x256xf32>
    %c0_153 = arith.constant 0 : index
    %c4 = arith.constant 4 : index
    %c0_154 = arith.constant 0 : index
    %c0_155 = arith.constant 0 : index
    %175 = vector.load %arg5[%c0_153, %c4, %c0_154, %c0_155] : memref<1x8x16x256xf32, #tpu.memory_space<vmem>>, vector<1x1x16x256xf32>
    %176 = vector.shape_cast %175 : vector<1x1x16x256xf32> to vector<16x256xf32>
    %177 = vector.shape_cast %174 : vector<16x256xf32> to vector<1x1x16x256xf32>
    tpu.vector_store %arg5[%c0_153, %c4, %c0_154, %c0_155], %177 {strides = array<i32>} : memref<1x8x16x256xf32, #tpu.memory_space<vmem>>, vector<1x1x16x256xf32>,
    %cst_156 = arith.constant 0.000000e+00 : f32
    %178 = vector.broadcast %cst_156 : f32 to vector<16x256xf32>
    %c0_157 = arith.constant 0 : index
    %c0_158 = arith.constant 0 : index
    %c0_159 = arith.constant 0 : index
    %179 = vector.load %arg3[%c0_157, %c0_158, %c0_159] : memref<3x16x144xbf16, #tpu.memory_space<vmem>>, vector<1x16x144xbf16>
    %180 = vector.shape_cast %179 : vector<1x16x144xbf16> to vector<16x144xbf16>
    %c5_i32 = arith.constant 5 : i32
    %181 = arith.addi %1, %c5_i32 : i32
    %c0_i32_160 = arith.constant 0 : i32
    %182 = arith.addi %181, %c0_i32_160 : i32
    %c0_161 = arith.constant 0 : index
    %183 = arith.index_cast %182 : i32 to index
    %c0_162 = arith.constant 0 : index
    %c0_163 = arith.constant 0 : index
    %184 = vector.load %arg2[%c0_161, %183, %c0_162, %c0_163] : memref<1x18x144x256xbf16, #tpu.memory_space<vmem>>, vector<1x1x144x256xbf16>
    %185 = vector.shape_cast %184 : vector<1x1x144x256xbf16> to vector<144x256xbf16>
    %cst_164 = arith.constant dense<0.000000e+00> : vector<16x256xf32>
    %186 = tpu.matmul %180, %185, %cst_164 {dimension_numbers = #tpu.dot_dimension_numbers<[1], [0], [0], [1], [0, 0, 1, 1], [], []>} : vector<16x144xbf16>, vector<144x256xbf16>, vector<16x256xf32> -> vector<16x256xf32>
    %187 = arith.addf %178, %186 : vector<16x256xf32>
    %c1_165 = arith.constant 1 : index
    %c0_166 = arith.constant 0 : index
    %c0_167 = arith.constant 0 : index
    %188 = vector.load %arg3[%c1_165, %c0_166, %c0_167] : memref<3x16x144xbf16, #tpu.memory_space<vmem>>, vector<1x16x144xbf16>
    %189 = vector.shape_cast %188 : vector<1x16x144xbf16> to vector<16x144xbf16>
    %c5_i32_168 = arith.constant 5 : i32
    %190 = arith.addi %1, %c5_i32_168 : i32
    %c1_i32_169 = arith.constant 1 : i32
    %191 = arith.addi %190, %c1_i32_169 : i32
    %c0_170 = arith.constant 0 : index
    %192 = arith.index_cast %191 : i32 to index
    %c0_171 = arith.constant 0 : index
    %c0_172 = arith.constant 0 : index
    %193 = vector.load %arg2[%c0_170, %192, %c0_171, %c0_172] : memref<1x18x144x256xbf16, #tpu.memory_space<vmem>>, vector<1x1x144x256xbf16>
    %194 = vector.shape_cast %193 : vector<1x1x144x256xbf16> to vector<144x256xbf16>
    %cst_173 = arith.constant dense<0.000000e+00> : vector<16x256xf32>
    %195 = tpu.matmul %189, %194, %cst_173 {dimension_numbers = #tpu.dot_dimension_numbers<[1], [0], [0], [1], [0, 0, 1, 1], [], []>} : vector<16x144xbf16>, vector<144x256xbf16>, vector<16x256xf32> -> vector<16x256xf32>
    %196 = arith.addf %187, %195 : vector<16x256xf32>
    %c2_174 = arith.constant 2 : index
    %c0_175 = arith.constant 0 : index
    %c0_176 = arith.constant 0 : index
    %197 = vector.load %arg3[%c2_174, %c0_175, %c0_176] : memref<3x16x144xbf16, #tpu.memory_space<vmem>>, vector<1x16x144xbf16>
    %198 = vector.shape_cast %197 : vector<1x16x144xbf16> to vector<16x144xbf16>
    %c5_i32_177 = arith.constant 5 : i32
    %199 = arith.addi %1, %c5_i32_177 : i32
    %c2_i32_178 = arith.constant 2 : i32
    %200 = arith.addi %199, %c2_i32_178 : i32
    %c0_179 = arith.constant 0 : index
    %201 = arith.index_cast %200 : i32 to index
    %c0_180 = arith.constant 0 : index
    %c0_181 = arith.constant 0 : index
    %202 = vector.load %arg2[%c0_179, %201, %c0_180, %c0_181] : memref<1x18x144x256xbf16, #tpu.memory_space<vmem>>, vector<1x1x144x256xbf16>
    %203 = vector.shape_cast %202 : vector<1x1x144x256xbf16> to vector<144x256xbf16>
    %cst_182 = arith.constant dense<0.000000e+00> : vector<16x256xf32>
    %204 = tpu.matmul %198, %203, %cst_182 {dimension_numbers = #tpu.dot_dimension_numbers<[1], [0], [0], [1], [0, 0, 1, 1], [], []>} : vector<16x144xbf16>, vector<144x256xbf16>, vector<16x256xf32> -> vector<16x256xf32>
    %205 = arith.addf %196, %204 : vector<16x256xf32>
    %206 = vector.broadcast %2 : vector<16x1xf32> to vector<16x256xf32>
    %207 = arith.addf %205, %206 : vector<16x256xf32>
    %cst_183 = arith.constant 0.000000e+00 : f32
    %208 = vector.broadcast %cst_183 : f32 to vector<16x256xf32>
    %209 = arith.maximumf %207, %208 : vector<16x256xf32>
    %c0_184 = arith.constant 0 : index
    %c5 = arith.constant 5 : index
    %c0_185 = arith.constant 0 : index
    %c0_186 = arith.constant 0 : index
    %210 = vector.load %arg5[%c0_184, %c5, %c0_185, %c0_186] : memref<1x8x16x256xf32, #tpu.memory_space<vmem>>, vector<1x1x16x256xf32>
    %211 = vector.shape_cast %210 : vector<1x1x16x256xf32> to vector<16x256xf32>
    %212 = vector.shape_cast %209 : vector<16x256xf32> to vector<1x1x16x256xf32>
    tpu.vector_store %arg5[%c0_184, %c5, %c0_185, %c0_186], %212 {strides = array<i32>} : memref<1x8x16x256xf32, #tpu.memory_space<vmem>>, vector<1x1x16x256xf32>,
    %cst_187 = arith.constant 0.000000e+00 : f32
    %213 = vector.broadcast %cst_187 : f32 to vector<16x256xf32>
    %c0_188 = arith.constant 0 : index
    %c0_189 = arith.constant 0 : index
    %c0_190 = arith.constant 0 : index
    %214 = vector.load %arg3[%c0_188, %c0_189, %c0_190] : memref<3x16x144xbf16, #tpu.memory_space<vmem>>, vector<1x16x144xbf16>
    %215 = vector.shape_cast %214 : vector<1x16x144xbf16> to vector<16x144xbf16>
    %c6_i32 = arith.constant 6 : i32
    %216 = arith.addi %1, %c6_i32 : i32
    %c0_i32_191 = arith.constant 0 : i32
    %217 = arith.addi %216, %c0_i32_191 : i32
    %c0_192 = arith.constant 0 : index
    %218 = arith.index_cast %217 : i32 to index
    %c0_193 = arith.constant 0 : index
    %c0_194 = arith.constant 0 : index
    %219 = vector.load %arg2[%c0_192, %218, %c0_193, %c0_194] : memref<1x18x144x256xbf16, #tpu.memory_space<vmem>>, vector<1x1x144x256xbf16>
    %220 = vector.shape_cast %219 : vector<1x1x144x256xbf16> to vector<144x256xbf16>
    %cst_195 = arith.constant dense<0.000000e+00> : vector<16x256xf32>
    %221 = tpu.matmul %215, %220, %cst_195 {dimension_numbers = #tpu.dot_dimension_numbers<[1], [0], [0], [1], [0, 0, 1, 1], [], []>} : vector<16x144xbf16>, vector<144x256xbf16>, vector<16x256xf32> -> vector<16x256xf32>
    %222 = arith.addf %213, %221 : vector<16x256xf32>
    %c1_196 = arith.constant 1 : index
    %c0_197 = arith.constant 0 : index
    %c0_198 = arith.constant 0 : index
    %223 = vector.load %arg3[%c1_196, %c0_197, %c0_198] : memref<3x16x144xbf16, #tpu.memory_space<vmem>>, vector<1x16x144xbf16>
    %224 = vector.shape_cast %223 : vector<1x16x144xbf16> to vector<16x144xbf16>
    %c6_i32_199 = arith.constant 6 : i32
    %225 = arith.addi %1, %c6_i32_199 : i32
    %c1_i32_200 = arith.constant 1 : i32
    %226 = arith.addi %225, %c1_i32_200 : i32
    %c0_201 = arith.constant 0 : index
    %227 = arith.index_cast %226 : i32 to index
    %c0_202 = arith.constant 0 : index
    %c0_203 = arith.constant 0 : index
    %228 = vector.load %arg2[%c0_201, %227, %c0_202, %c0_203] : memref<1x18x144x256xbf16, #tpu.memory_space<vmem>>, vector<1x1x144x256xbf16>
    %229 = vector.shape_cast %228 : vector<1x1x144x256xbf16> to vector<144x256xbf16>
    %cst_204 = arith.constant dense<0.000000e+00> : vector<16x256xf32>
    %230 = tpu.matmul %224, %229, %cst_204 {dimension_numbers = #tpu.dot_dimension_numbers<[1], [0], [0], [1], [0, 0, 1, 1], [], []>} : vector<16x144xbf16>, vector<144x256xbf16>, vector<16x256xf32> -> vector<16x256xf32>
    %231 = arith.addf %222, %230 : vector<16x256xf32>
    %c2_205 = arith.constant 2 : index
    %c0_206 = arith.constant 0 : index
    %c0_207 = arith.constant 0 : index
    %232 = vector.load %arg3[%c2_205, %c0_206, %c0_207] : memref<3x16x144xbf16, #tpu.memory_space<vmem>>, vector<1x16x144xbf16>
    %233 = vector.shape_cast %232 : vector<1x16x144xbf16> to vector<16x144xbf16>
    %c6_i32_208 = arith.constant 6 : i32
    %234 = arith.addi %1, %c6_i32_208 : i32
    %c2_i32_209 = arith.constant 2 : i32
    %235 = arith.addi %234, %c2_i32_209 : i32
    %c0_210 = arith.constant 0 : index
    %236 = arith.index_cast %235 : i32 to index
    %c0_211 = arith.constant 0 : index
    %c0_212 = arith.constant 0 : index
    %237 = vector.load %arg2[%c0_210, %236, %c0_211, %c0_212] : memref<1x18x144x256xbf16, #tpu.memory_space<vmem>>, vector<1x1x144x256xbf16>
    %238 = vector.shape_cast %237 : vector<1x1x144x256xbf16> to vector<144x256xbf16>
    %cst_213 = arith.constant dense<0.000000e+00> : vector<16x256xf32>
    %239 = tpu.matmul %233, %238, %cst_213 {dimension_numbers = #tpu.dot_dimension_numbers<[1], [0], [0], [1], [0, 0, 1, 1], [], []>} : vector<16x144xbf16>, vector<144x256xbf16>, vector<16x256xf32> -> vector<16x256xf32>
    %240 = arith.addf %231, %239 : vector<16x256xf32>
    %241 = vector.broadcast %2 : vector<16x1xf32> to vector<16x256xf32>
    %242 = arith.addf %240, %241 : vector<16x256xf32>
    %cst_214 = arith.constant 0.000000e+00 : f32
    %243 = vector.broadcast %cst_214 : f32 to vector<16x256xf32>
    %244 = arith.maximumf %242, %243 : vector<16x256xf32>
    %c0_215 = arith.constant 0 : index
    %c6 = arith.constant 6 : index
    %c0_216 = arith.constant 0 : index
    %c0_217 = arith.constant 0 : index
    %245 = vector.load %arg5[%c0_215, %c6, %c0_216, %c0_217] : memref<1x8x16x256xf32, #tpu.memory_space<vmem>>, vector<1x1x16x256xf32>
    %246 = vector.shape_cast %245 : vector<1x1x16x256xf32> to vector<16x256xf32>
    %247 = vector.shape_cast %244 : vector<16x256xf32> to vector<1x1x16x256xf32>
    tpu.vector_store %arg5[%c0_215, %c6, %c0_216, %c0_217], %247 {strides = array<i32>} : memref<1x8x16x256xf32, #tpu.memory_space<vmem>>, vector<1x1x16x256xf32>,
    %cst_218 = arith.constant 0.000000e+00 : f32
    %248 = vector.broadcast %cst_218 : f32 to vector<16x256xf32>
    %c0_219 = arith.constant 0 : index
    %c0_220 = arith.constant 0 : index
    %c0_221 = arith.constant 0 : index
    %249 = vector.load %arg3[%c0_219, %c0_220, %c0_221] : memref<3x16x144xbf16, #tpu.memory_space<vmem>>, vector<1x16x144xbf16>
    %250 = vector.shape_cast %249 : vector<1x16x144xbf16> to vector<16x144xbf16>
    %c7_i32 = arith.constant 7 : i32
    %251 = arith.addi %1, %c7_i32 : i32
    %c0_i32_222 = arith.constant 0 : i32
    %252 = arith.addi %251, %c0_i32_222 : i32
    %c0_223 = arith.constant 0 : index
    %253 = arith.index_cast %252 : i32 to index
    %c0_224 = arith.constant 0 : index
    %c0_225 = arith.constant 0 : index
    %254 = vector.load %arg2[%c0_223, %253, %c0_224, %c0_225] : memref<1x18x144x256xbf16, #tpu.memory_space<vmem>>, vector<1x1x144x256xbf16>
    %255 = vector.shape_cast %254 : vector<1x1x144x256xbf16> to vector<144x256xbf16>
    %cst_226 = arith.constant dense<0.000000e+00> : vector<16x256xf32>
    %256 = tpu.matmul %250, %255, %cst_226 {dimension_numbers = #tpu.dot_dimension_numbers<[1], [0], [0], [1], [0, 0, 1, 1], [], []>} : vector<16x144xbf16>, vector<144x256xbf16>, vector<16x256xf32> -> vector<16x256xf32>
    %257 = arith.addf %248, %256 : vector<16x256xf32>
    %c1_227 = arith.constant 1 : index
    %c0_228 = arith.constant 0 : index
    %c0_229 = arith.constant 0 : index
    %258 = vector.load %arg3[%c1_227, %c0_228, %c0_229] : memref<3x16x144xbf16, #tpu.memory_space<vmem>>, vector<1x16x144xbf16>
    %259 = vector.shape_cast %258 : vector<1x16x144xbf16> to vector<16x144xbf16>
    %c7_i32_230 = arith.constant 7 : i32
    %260 = arith.addi %1, %c7_i32_230 : i32
    %c1_i32_231 = arith.constant 1 : i32
    %261 = arith.addi %260, %c1_i32_231 : i32
    %c0_232 = arith.constant 0 : index
    %262 = arith.index_cast %261 : i32 to index
    %c0_233 = arith.constant 0 : index
    %c0_234 = arith.constant 0 : index
    %263 = vector.load %arg2[%c0_232, %262, %c0_233, %c0_234] : memref<1x18x144x256xbf16, #tpu.memory_space<vmem>>, vector<1x1x144x256xbf16>
    %264 = vector.shape_cast %263 : vector<1x1x144x256xbf16> to vector<144x256xbf16>
    %cst_235 = arith.constant dense<0.000000e+00> : vector<16x256xf32>
    %265 = tpu.matmul %259, %264, %cst_235 {dimension_numbers = #tpu.dot_dimension_numbers<[1], [0], [0], [1], [0, 0, 1, 1], [], []>} : vector<16x144xbf16>, vector<144x256xbf16>, vector<16x256xf32> -> vector<16x256xf32>
    %266 = arith.addf %257, %265 : vector<16x256xf32>
    %c2_236 = arith.constant 2 : index
    %c0_237 = arith.constant 0 : index
    %c0_238 = arith.constant 0 : index
    %267 = vector.load %arg3[%c2_236, %c0_237, %c0_238] : memref<3x16x144xbf16, #tpu.memory_space<vmem>>, vector<1x16x144xbf16>
    %268 = vector.shape_cast %267 : vector<1x16x144xbf16> to vector<16x144xbf16>
    %c7_i32_239 = arith.constant 7 : i32
    %269 = arith.addi %1, %c7_i32_239 : i32
    %c2_i32_240 = arith.constant 2 : i32
    %270 = arith.addi %269, %c2_i32_240 : i32
    %c0_241 = arith.constant 0 : index
    %271 = arith.index_cast %270 : i32 to index
    %c0_242 = arith.constant 0 : index
    %c0_243 = arith.constant 0 : index
    %272 = vector.load %arg2[%c0_241, %271, %c0_242, %c0_243] : memref<1x18x144x256xbf16, #tpu.memory_space<vmem>>, vector<1x1x144x256xbf16>
    %273 = vector.shape_cast %272 : vector<1x1x144x256xbf16> to vector<144x256xbf16>
    %cst_244 = arith.constant dense<0.000000e+00> : vector<16x256xf32>
    %274 = tpu.matmul %268, %273, %cst_244 {dimension_numbers = #tpu.dot_dimension_numbers<[1], [0], [0], [1], [0, 0, 1, 1], [], []>} : vector<16x144xbf16>, vector<144x256xbf16>, vector<16x256xf32> -> vector<16x256xf32>
    %275 = arith.addf %266, %274 : vector<16x256xf32>
    %276 = vector.broadcast %2 : vector<16x1xf32> to vector<16x256xf32>
    %277 = arith.addf %275, %276 : vector<16x256xf32>
    %cst_245 = arith.constant 0.000000e+00 : f32
    %278 = vector.broadcast %cst_245 : f32 to vector<16x256xf32>
    %279 = arith.maximumf %277, %278 : vector<16x256xf32>
    %c0_246 = arith.constant 0 : index
    %c7 = arith.constant 7 : index
    %c0_247 = arith.constant 0 : index
    %c0_248 = arith.constant 0 : index
    %280 = vector.load %arg5[%c0_246, %c7, %c0_247, %c0_248] : memref<1x8x16x256xf32, #tpu.memory_space<vmem>>, vector<1x1x16x256xf32>
    %281 = vector.shape_cast %280 : vector<1x1x16x256xf32> to vector<16x256xf32>
    %282 = vector.shape_cast %279 : vector<16x256xf32> to vector<1x1x16x256xf32>
    tpu.vector_store %arg5[%c0_246, %c7, %c0_247, %c0_248], %282 {strides = array<i32>} : memref<1x8x16x256xf32, #tpu.memory_space<vmem>>, vector<1x1x16x256xf32>,
    return
  }
  func.func @transform_0(%arg0: i32, %arg1: i32) -> (i32, i32, i32, i32) {
    %c0_i32 = arith.constant 0 : i32
    %c0_i32_0 = arith.constant 0 : i32
    %c0_i32_1 = arith.constant 0 : i32
    %c0_i32_2 = arith.constant 0 : i32
    return %arg0, %c0_i32, %c0_i32_0, %c0_i32_1 : i32, i32, i32, i32
  }
  func.func @transform_1(%arg0: i32, %arg1: i32) -> (i32, i32, i32) {
    %c0_i32 = arith.constant 0 : i32
    %c0_i32_0 = arith.constant 0 : i32
    %c0_i32_1 = arith.constant 0 : i32
    %c0_i32_2 = arith.constant 0 : i32
    return %c0_i32, %c0_i32_0, %c0_i32_1 : i32, i32, i32
  }
  func.func @transform_2(%arg0: i32, %arg1: i32) -> (i32, i32) {
    %c0_i32 = arith.constant 0 : i32
    %c0_i32_0 = arith.constant 0 : i32
    %c0_i32_1 = arith.constant 0 : i32
    return %c0_i32, %c0_i32_0 : i32, i32
  }
  func.func @transform_3(%arg0: i32, %arg1: i32) -> (i32, i32, i32, i32) {
    %c0_i32 = arith.constant 0 : i32
    %c0_i32_0 = arith.constant 0 : i32
    %c0_i32_1 = arith.constant 0 : i32
    return %arg0, %arg1, %c0_i32, %c0_i32_0 : i32, i32, i32, i32
  }
}

</mosaic_0001>

<bundles_post_ra>
// kernel: double_3d_conv.2
= control target key start
LH: loop header
LB: loop body
LE: loop exit
PB: predicated region body
PF: predicated region fallthrough
CT: control target
= control target key end

     0   :  { %s3475_s12 = smov 0   ;;  %s3477_s13 = smov 0   ;;  %s3961_s0 = inlined_call_operand.vmem [shape: bf16[2,18,36,256], index: 0, kind: input, shape index: {}]   ;;  %s3962_s1 = inlined_call_operand.vmem [shape: bf16[3,16,36], index: 1, kind: input, shape index: {}]   ;;  %s3963_s2 = inlined_call_operand.vmem [shape: f32[16,1], index: 2, kind: input, shape index: {}]   ;;  %s3964_s3 = inlined_call_operand.vmem [shape: bf16[2,16,16,256], index: 3, kind: output, shape index: {}]  }
   0x1   :  { %s3479_s14 = smov 0   ;;  %s3481_s15 = smov 0  }
   0x2   :  { %s3483_s16 = smov 0  }
   0x3 LB: > { %s22_s17 = sadd.s32 1, %s3444_s14  ;;  %s25_s18 = sadd.s32 1, %s3448_s15  ;;  %s3452_s16 = sphi %s3483_s16, %s13_s16   ;;  %s3448_s15 = sphi %s3481_s15, %s3968_s15   ;;  %s3444_s14 = sphi %s3479_s14, %s3967_s14   ;;  %s3440_s13 = sphi %s3477_s13, %s3966_s13   ;;  %s3436_s12 = sphi %s3475_s12, %s3965_s12  }
   0x4   : > { %p23_p0 = scmp.ge.s32.totalorder %s22_s17, 2  ;;  %p2736_p1 = scmp.ge.s32.totalorder %s3452_s16, 1 }
   0x5   : > { %p151_p2 = scmp.lt.s32.totalorder %s3452_s16, 5 }
   0x6   : > { %s3970_s17 = smov (%p23_p0, %s22_s17), 0  ;;  %s3972_s18 = smov (!%p23_p0, %s25_s18), %s3448_s15 }
   0x7   : > { %p152_p3 = pnand %p2736_p1, %p151_p2  ;;  %p27_p4 = scmp.ge.s32.totalorder %s3972_s18, 2 }
   0x8   : > { %p180_p5 = scmp.lt.s32.totalorder (!%p152_p3), %s3440_s13, 1  ;;  %v3454_v0 = vmov (!%p152_p3), 0   ;;  %s3158_s19 = smul.u32 (!%p152_p3), 320, %s3436_s12  ;;  %vm256_vm0 = vcmask (!%p152_p3), 1041408   ;;  %v3298_v18 = vld [vmem:[%s3962_s1 + $0x8] sm:$0xff] (!%p152_p3)   ;;  %vm252_vm1 = vcmask (!%p152_p3), 293888  }
   0x9   : > { %s3974_s18 = smov (%p27_p4, %s3972_s18), 0  ;;  %155 = sbr.rel (%p152_p3) target bundleno = 389 (0x185), region = 32 }
   0xa   : > { %295 = vmatprep.mubr.bf16.mxu0 (!%p152_p3), %v3454_v0  ;;  %603 = vmatprep.mubr.bf16.mxu1 (!%p152_p3), %v3454_v0  ;;  %v3302_v19 = vld [vmem:[%s3962_s1 + $0x8] sm:$0xff] (!%p152_p3)   ;;  %v3310_v32 = vld [vmem:[%s3962_s1] sm:$0xff] (!%p152_p3)   ;;  %v3322_v46 = vld [vmem:[%s3962_s1 + $0x10] sm:$0xff] (!%p152_p3)   ;;  %s2738_s11 = sshll.u32 (!%p152_p3), %s3436_s12, 3 }
   0xb   : > { %3281 = vset.pattern.permute.xlu0 (!%p152_p3), %v3454_v0  ;;  %v3311_v33 = vld [vmem:[%s3962_s1] sm:$0xff] (!%p152_p3)   ;;  %v3323_v47 = vld [vmem:[%s3962_s1 + $0x10] sm:$0xff] (!%p152_p3)   ;;  %v199_v58 = vld [vmem:[%s3963_s2 + $0x8] sm:$0xff] (!%p152_p3)  ;;  %p188_p6 = scmp.lt.s32.totalorder (!%p152_p3), %s2738_s11, 15 }
   0xc   : > { %v198_v57 = vld [vmem:[%s3963_s2] sm:$0xff] (!%p152_p3)  ;;  %v3334_v61 = vld [vmem:[%s3962_s1 + $0x8] sm:$0xff] (!%p152_p3)  }
   0xd   : > { %488 = vperm.xlu0 (!%p152_p3), %3281, %v198_v57   ;;  %v3335_v62 = vld [vmem:[%s3962_s1 + $0x8] sm:$0xff] (!%p152_p3)  }
  0x10   : > { %s3976_s13 = smov (!%p180_p5, %s3440_s13), 1  ;;  %s3978_s11 = smov (!%p188_p6, %s2738_s11), 15 }
  0x11   : > { %s3239_s20 = smul.u32 720, %s3976_s13  ;;  %493 = vperm.xlu0 %3281, %v199_v58  }
  0x13   : > { %s184_s23 = scalar_lea.vmem %s3961_s0, %s3239_s20  ;;  %s2740_s20 = sshll.u32 %s3976_s13, 6 }
  0x14   : > { %s3517_s24 = scalar_lea.vmem %s184_s23, %s3158_s19  ;;  %s2739_s19 = sshll.u32 %s3978_s11, 2 }
  0x15   : > { %v3282_v1 = vld [vmem:[%s3517_s24 + $0x2c] ss:$8 sps:$4 sm:$0xff]   ;;  %v3286_v3 = vld [vmem:[%s3517_s24 + $0x28] ss:$8 sps:$4 sm:$0xff]   ;;  %v3288_v5 = vld [vmem:[%s3517_s24 + $0x3c] ss:$8 sps:$4 sm:$0xff]   ;;  %s192_s21 = sadd.s32 %s2740_s20, %s2739_s19 }
  0x16   : > { %v3521_v2 = vld [vmem:[%s3517_s24 + $0x54] ss:$8 sps:$4 sm:$0xff]   ;;  %263 = vmatprep.subr.bf16.mxu0 %v3282_v1  ;;  %v3525_v4 = vld [vmem:[%s3517_s24 + $0x50] ss:$8 sps:$4 sm:$0xff]   ;;  %v3531_v6 = vld [vmem:[%s3517_s24 + $0x64] ss:$8 sps:$4 sm:$0xff]  }
  0x17   : > { %571 = vmatprep.subr.bf16.mxu1 %v3521_v2  ;;  %264 = vmatpush1.bf16.msra.mxu0 %v3286_v3  ;;  %v3292_v7 = vld [vmem:[%s3517_s24 + $0x38] ss:$8 sps:$4 sm:$0xff]   ;;  %v2753_v9 = vld [vmem:[%s3517_s24 + $0x48] sm:$0x33]  ;;  %v2803_v10 = vld [vmem:[%s3517_s24 + $0x70] sm:$0x33] }
  0x18   : > { %572 = vmatpush1.bf16.msra.mxu1 %v3525_v4  ;;  %265 = vmatprep.subr.bf16.mxu0 %v3288_v5  ;;  %v3535_v8 = vld [vmem:[%s3517_s24 + $0x60] ss:$8 sps:$4 sm:$0xff]   ;;  %v2760_v11 = vcombine.high %v2753_v9, %v2753_v9  ;;  %v2810_v12 = vcombine.high %v2803_v10, %v2803_v10  ;;  %v2759_v13 = vcombine.low %v2753_v9, %v2753_v9  ;;  %v3301_v17 = vld [vmem:[%s3517_s24 + $0x4] ss:$8 sps:$4 sm:$0xff]   ;;  %v3305_v21 = vld [vmem:[%s3517_s24 + $0x14] ss:$8 sps:$4 sm:$0xff]  }
  0x19   : > { %573 = vmatprep.subr.bf16.mxu1 %v3531_v6  ;;  %v2809_v14 = vcombine.low %v2803_v10, %v2803_v10  ;;  %v3299_v20 = vld [vmem:[%s3517_s24] ss:$8 sps:$4 sm:$0xff]   ;;  %v3303_v24 = vld [vmem:[%s3517_s24 + $0x10] ss:$8 sps:$4 sm:$0xff]   ;;  %v3566_v31 = vld [vmem:[%s3517_s24 + $0x7c] ss:$8 sps:$4 sm:$0xff]  }
  0x1a   : > { %v258_v15 = vsel %vm256_vm0, %v2759_v13, 0  ;;  %v209_v22 = vld [vmem:[%s3517_s24 + $0x20] sm:$0x33]  ;;  %v2796_v23 = vld [vmem:[%s3517_s24 + $0x48] sm:$0x33]  ;;  %s2741_s22 = sshll.u32 %s192_s21, 2 }
  0x1b   : > { %266 = vmatpush1.bf16.msra.mxu0 %v3292_v7  ;;  %v566_v16 = vsel %vm256_vm0, %v2809_v14, 0  ;;  %v2769_v25 = vcombine.high %v209_v22, %v209_v22  ;;  %v2819_v26 = vcombine.high %v2796_v23, %v2796_v23  ;;  %v2768_v27 = vcombine.low %v209_v22, %v209_v22  ;;  %v3575_v34 = vld [vmem:[%s3517_s24 + $0x78] ss:$8 sps:$4 sm:$0xff]   ;;  %v3578_v35 = vld [vmem:[%s3517_s24 + $0x8c] ss:$8 sps:$4 sm:$0xff]   ;;  %s3904_s23 = scalar_lea.vmem %s3964_s3, %s2741_s22 }
  0x1c   : > { %574 = vmatpush1.bf16.msra.mxu1 %v3535_v8  ;;  %2761 = vmatprep.subr.msk.bf16.mxu0 %vm256_vm0, %v2760_v11  ;;  %v2818_v28 = vcombine.low %v2796_v23, %v2796_v23  ;;  %v2780_v36 = vld [vmem:[%s3517_s24 + $0x70] sm:$0x33]  ;;  %v2830_v37 = vld [vmem:[%s3517_s24 + $0x98] sm:$0x33]  ;;  %v3598_v43 = vld [vmem:[%s3517_s24 + $0xa4] ss:$8 sps:$4 sm:$0xff]  }
  0x1d   : > { %2811 = vmatprep.subr.msk.bf16.mxu1 %vm256_vm0, %v2810_v12  ;;  %v340_v29 = vsel %vm256_vm0, %v2768_v27, 0  ;;  %v3589_v38 = vld [vmem:[%s3517_s24 + $0x88] ss:$8 sps:$4 sm:$0xff]   ;;  %v2787_v39 = vcombine.high %v2780_v36, %v2780_v36  ;;  %v2837_v40 = vcombine.high %v2830_v37, %v2830_v37  ;;  %v2786_v41 = vcombine.low %v2780_v36, %v2780_v36  ;;  %v3614_v49 = vld [vmem:[%s3517_s24 + $0xb4] ss:$8 sps:$4 sm:$0xff]   ;;  %v3340_v10 = vld [vmem:[%s3962_s1] sm:$0xff]  }
  0x1e   : > { %v648_v30 = vsel %vm256_vm0, %v2818_v28, 0  ;;  %v2836_v42 = vcombine.low %v2830_v37, %v2830_v37  ;;  %v3611_v48 = vld [vmem:[%s3517_s24 + $0xa0] ss:$8 sps:$4 sm:$0xff]   ;;  %v2855_v50 = vld [vmem:[%s3517_s24 + $0x98] sm:$0x33]  ;;  %v3352_v23 = vld [vmem:[%s3962_s1 + $0x10] sm:$0xff]  }
  0x1f   : > { %268 = vmatpush1.bf16.msra.mxu0 %v258_v15  ;;  %v434_v44 = vsel %vm256_vm0, %v2786_v41, 0  ;;  %v2907_v51 = vld [vmem:[%s3517_s24 + $0xc0] sm:$0x33]  ;;  %v3625_v52 = vld [vmem:[%s3517_s24 + $0xb0] ss:$8 sps:$4 sm:$0xff]   ;;  %v2862_v53 = vcombine.high %v2855_v50, %v2855_v50  ;;  %v2861_v55 = vcombine.low %v2855_v50, %v2855_v50  ;;  %v3364_v36 = vld [vmem:[%s3962_s1 + $0x8] sm:$0xff]  }
  0x20   : > { %576 = vmatpush1.bf16.msra.mxu1 %v566_v16  ;;  %345 = vmatprep.subr.bf16.mxu0 %v3301_v17  ;;  %v741_v45 = vsel %vm256_vm0, %v2836_v42, 0  ;;  %v2914_v54 = vcombine.high %v2907_v51, %v2907_v51  ;;  %v2913_v56 = vcombine.low %v2907_v51, %v2907_v51  ;;  %v2848_v63 = vld [vmem:[%s3517_s24 + $0x70] sm:$0x33]  ;;  %v3682_v12 = vld [vmem:[%s3517_s24 + $0xdc] ss:$8 sps:$4 sm:$0xff]   ;;  %v3365_v37 = vld [vmem:[%s3962_s1 + $0x8] sm:$0xff]  }
  0x21   : > { %653 = vmatprep.subr.bf16.mxu1 %v3282_v1  ;;  %v864_v59 = vsel %vm256_vm0, %v2861_v55, 0  ;;  %v2900_v1 = vld [vmem:[%s3517_s24 + $0x98] sm:$0x33]  ;;  %v3668_v9 = vld [vmem:[%s3517_s24 + $0xcc] ss:$8 sps:$4 sm:$0xff]  }
  0x22   : > { %2762 = vmatmul.mubr.msk.bf16.vlgmr.msra.gmra.mrb[0].mxu0 %vm252_vm1, %v3298_v18  ;;  %v1162_v60 = vsel %vm256_vm0, %v2913_v56, 0  ;;  %v3677_v11 = vld [vmem:[%s3517_s24 + $0xc8] ss:$8 sps:$4 sm:$0xff]   ;;  %v2882_v13 = vld [vmem:[%s3517_s24 + $0xc0] sm:$0x33] }
  0x23   : > { %2812 = vmatmul.mubr.msk.bf16.vlgmr.msra.gmra.mrb[0].mxu1 %vm252_vm1, %v3302_v19  ;;  %346 = vmatpush1.bf16.msra.mxu0 %v3299_v20  ;;  %v2934_v14 = vld [vmem:[%s3517_s24 + $0xe8] sm:$0x33]  ;;  %v3691_v15 = vld [vmem:[%s3517_s24 + $0xd8] ss:$8 sps:$4 sm:$0xff]   ;;  %v2889_v16 = vcombine.high %v2882_v13, %v2882_v13  ;;  %v2888_v18 = vcombine.low %v2882_v13, %v2882_v13  ;;  %v3704_v22 = vld [vmem:[%s3517_s24 + $0xf4] ss:$8 sps:$4 sm:$0xff]  }
  0x24   : > { %654 = vmatpush1.bf16.msra.mxu1 %v3286_v3  ;;  %347 = vmatprep.subr.bf16.mxu0 %v3305_v21  ;;  %v2871_v3 = vcombine.high %v2848_v63, %v2848_v63  ;;  %v2941_v17 = vcombine.high %v2934_v14, %v2934_v14  ;;  %v2940_v19 = vcombine.low %v2934_v14, %v2934_v14  ;;  %v2959_v27 = vld [vmem:[%s3517_s24 + $0xe8] sm:$0x33]  ;;  %v3011_v28 = vld [vmem:[%s3517_s24 + $0x110] sm:$0x33]  ;;  %v3108_v14 = vld [vmem:[%s3517_s24 + $0x138] sm:$0x33] }
  0x25   : > { %655 = vmatprep.subr.bf16.mxu1 %v3288_v5  ;;  %377 = vmatprep.mubr.bf16.mxu0 %v3454_v0  ;;  %v2923_v5 = vcombine.high %v2900_v1, %v2900_v1  ;;  %v1039_v20 = vsel %vm256_vm0, %v2888_v18, 0  ;;  %v3778_v50 = vld [vmem:[%s3517_s24 + $0x12c] ss:$8 sps:$4 sm:$0xff]   ;;  %v3130_v18 = vcombine.low %v3108_v14, %v3108_v14 }
  0x26   : > { %685 = vmatprep.mubr.bf16.mxu1 %v3454_v0  ;;  %v1337_v21 = vsel %vm256_vm0, %v2940_v19, 0  ;;  %v2986_v51 = vld [vmem:[%s3517_s24 + $0x110] sm:$0x33] }
  0x27   : > { %348 = vmatpush1.bf16.msra.mxu0 %v3303_v24  ;;  %v3353_v24 = vld [vmem:[%s3962_s1 + $0x10] sm:$0xff]   ;;  %v2992_v56 = vcombine.low %v2986_v51, %v2986_v51 }
  0x28   : > { %656 = vmatpush1.bf16.msra.mxu1 %v3292_v7  ;;  %2770 = vmatprep.subr.msk.bf16.mxu0 %vm256_vm0, %v2769_v25  ;;  %v2922_v7 = vcombine.low %v2900_v1, %v2900_v1  ;;  %v3713_v25 = vld [vmem:[%s3517_s24 + $0xf0] ss:$8 sps:$4 sm:$0xff]   ;;  %v3811_v1 = vld [vmem:[%s3517_s24 + $0x154] ss:$8 sps:$4 sm:$0xff]  }
  0x29   : > { %2820 = vmatprep.subr.msk.bf16.mxu1 %vm256_vm0, %v2819_v26  ;;  %v3718_v26 = vld [vmem:[%s3517_s24 + $0x104] ss:$8 sps:$4 sm:$0xff]   ;;  %v1635_v58 = vsel %vm256_vm0, %v2992_v56, 0  ;;  %v3056_v13 = vld [vmem:[%s3517_s24 + $0x110] sm:$0x33] }
  0x2b   : > { %350 = vmatpush1.bf16.msra.mxu0 %v340_v29  ;;  %v3727_v29 = vld [vmem:[%s3517_s24 + $0x100] ss:$8 sps:$4 sm:$0xff]  }
  0x2c   : > { %658 = vmatpush1.bf16.msra.mxu1 %v648_v30  ;;  %439 = vmatprep.subr.bf16.mxu0 %v3521_v2  ;;  %v2966_v30 = vcombine.high %v2959_v27, %v2959_v27 }
  0x2d   : > { %746 = vmatprep.subr.bf16.mxu1 %v3566_v31 }
  0x2e   : > { %2771 = vmatmul.mubr.msk.bf16.vlgmr.msra.gmra.mrb[0].mxu0 %vm252_vm1, %v3310_v32  ;;  %v2965_v32 = vcombine.low %v2959_v27, %v2959_v27  ;;  %v3142_v27 = vld [vmem:[%s3517_s24 + $0x188] sm:$0x33] }
  0x2f   : > { %2821 = vmatmul.mubr.msk.bf16.vlgmr.msra.gmra.mrb[0].mxu1 %vm252_vm1, %v3311_v33  ;;  %440 = vmatpush1.bf16.msra.mxu0 %v3525_v4  ;;  %v3017_v33 = vcombine.low %v3011_v28, %v3011_v28 }
  0x30   : > { %747 = vmatpush1.bf16.msra.mxu1 %v3575_v34  ;;  %441 = vmatprep.subr.bf16.mxu0 %v3531_v6 }
  0x31   : > { %748 = vmatprep.subr.bf16.mxu1 %v3578_v35  ;;  %471 = vmatprep.mubr.bf16.mxu0 %v3454_v0 }
  0x32   : > { %778 = vmatprep.mubr.bf16.mxu1 %v3454_v0 }
  0x33   : > { %442 = vmatpush1.bf16.msra.mxu0 %v3535_v8 }
  0x34   : > { %749 = vmatpush1.bf16.msra.mxu1 %v3589_v38  ;;  %2788 = vmatprep.subr.msk.bf16.mxu0 %vm256_vm0, %v2787_v39  ;;  %v3004_v39 = vld [vmem:[%s3517_s24 + $0xe8] sm:$0x33] }
  0x35   : > { %2838 = vmatprep.subr.msk.bf16.mxu1 %vm256_vm0, %v2837_v40  ;;  %v3027_v41 = vcombine.high %v3004_v39, %v3004_v39 }
  0x37   : > { %444 = vmatpush1.bf16.msra.mxu0 %v434_v44 }
  0x38   : > { %751 = vmatpush1.bf16.msra.mxu1 %v741_v45  ;;  %869 = vmatprep.subr.bf16.mxu0 %v3566_v31 }
  0x39   : > { %1167 = vmatprep.subr.bf16.mxu1 %v3598_v43 }
  0x3a   : > { %2789 = vmatmul.mubr.msk.bf16.vlgmr.msra.gmra.mrb[0].mxu0 %vm252_vm1, %v3322_v46  ;;  %v3764_v46 = vld [vmem:[%s3517_s24 + $0x11c] ss:$8 sps:$4 sm:$0xff]  }
  0x3b   : > { %2839 = vmatmul.mubr.msk.bf16.vlgmr.msra.gmra.mrb[0].mxu1 %vm252_vm1, %v3323_v47  ;;  %870 = vmatpush1.bf16.msra.mxu0 %v3575_v34  ;;  %v3370_v47 = vld [vmem:[%s3962_s1] sm:$0xff]  }
  0x3c   : > { %1168 = vmatpush1.bf16.msra.mxu1 %v3611_v48  ;;  %871 = vmatprep.subr.bf16.mxu0 %v3578_v35 }
  0x3d   : > { %1169 = vmatprep.subr.bf16.mxu1 %v3614_v49  ;;  %901 = vmatprep.mubr.bf16.mxu0 %v3454_v0 }
  0x3e   : > { %1199 = vmatprep.mubr.bf16.mxu1 %v3454_v0 }
  0x3f   : > { %872 = vmatpush1.bf16.msra.mxu0 %v3589_v38 }
  0x40   : > { %1170 = vmatpush1.bf16.msra.mxu1 %v3625_v52  ;;  %2863 = vmatprep.subr.msk.bf16.mxu0 %vm256_vm0, %v2862_v53  ;;  %v3787_v53 = vld [vmem:[%s3517_s24 + $0x128] ss:$8 sps:$4 sm:$0xff]  }
  0x41   : > { %2915 = vmatprep.subr.msk.bf16.mxu1 %vm256_vm0, %v2914_v54  ;;  %v2993_v54 = vcombine.high %v2986_v51, %v2986_v51 }
  0x43   : > { %874 = vmatpush1.bf16.msra.mxu0 %v864_v59 }
  0x44   : > { %1172 = vmatpush1.bf16.msra.mxu1 %v1162_v60  ;;  %951 = vmatprep.subr.bf16.mxu0 %v3521_v2  ;;  %v2870_v2 = vcombine.low %v2848_v63, %v2848_v63  ;;  %v3386_v60 = vld [vmem:[%s3517_s24 + $0x144] ss:$8 sps:$4 sm:$0xff]   ;;  %v3807_v63 = vld [vmem:[%s3517_s24 + $0x140] ss:$8 sps:$4 sm:$0xff]  }
  0x45   : > { %1249 = vmatprep.subr.bf16.mxu1 %v3566_v31  ;;  %v3018_v31 = vcombine.high %v3011_v28, %v3011_v28  ;;  %v3405_v28 = vld [vmem:[%s3517_s24 + $0x178] ss:$8 sps:$4 sm:$0xff]  }
  0x46   : > { %2864 = vmatmul.mubr.msk.bf16.vlgmr.msra.gmra.mrb[4].mxu0 %vm252_vm1, %v3334_v61  ;;  %v3382_v61 = vld [vmem:[%s3962_s1 + $0x10] sm:$0xff]  }
  0x47   : > { %2916 = vmatmul.mubr.msk.bf16.vlgmr.msra.gmra.mrb[4].mxu1 %vm252_vm1, %v3335_v62  ;;  %952 = vmatpush1.bf16.msra.mxu0 %v3525_v4  ;;  %v946_v4 = vsel %vm256_vm0, %v2870_v2, 0  ;;  %v3383_v62 = vld [vmem:[%s3962_s1 + $0x10] sm:$0xff]  }
  0x48   : > { %1250 = vmatpush1.bf16.msra.mxu1 %v3575_v34  ;;  %953 = vmatprep.subr.bf16.mxu0 %v3531_v6  ;;  %v1244_v6 = vsel %vm256_vm0, %v2922_v7, 0  ;;  %v1460_v34 = vsel %vm256_vm0, %v2965_v32, 0  ;;  %v3820_v2 = vld [vmem:[%s3517_s24 + $0x150] ss:$8 sps:$4 sm:$0xff]   ;;  %v3148_v32 = vcombine.low %v3142_v27, %v3142_v27 }
  0x49   : > { %1251 = vmatprep.subr.bf16.mxu1 %v3578_v35  ;;  %983 = vmatprep.mubr.bf16.mxu0 %v3454_v0  ;;  %v1758_v35 = vsel %vm256_vm0, %v3017_v33, 0 }
  0x4a   : > { %1281 = vmatprep.mubr.bf16.mxu1 %v3454_v0 }
  0x4b   : > { %954 = vmatpush1.bf16.msra.mxu0 %v3535_v8  ;;  %v3341_v8 = vld [vmem:[%s3962_s1] sm:$0xff]  }
  0x4c   : > { %1252 = vmatpush1.bf16.msra.mxu1 %v3589_v38  ;;  %2872 = vmatprep.subr.msk.bf16.mxu0 %vm256_vm0, %v2871_v3  ;;  %v2952_v38 = vld [vmem:[%s3517_s24 + $0xc0] sm:$0x33]  ;;  %v3063_v3 = vld [vmem:[%s3517_s24 + $0x138] sm:$0x33] }
  0x4d   : > { %2924 = vmatprep.subr.msk.bf16.mxu1 %vm256_vm0, %v2923_v5  ;;  %v2975_v40 = vcombine.high %v2952_v38, %v2952_v38  ;;  %v2974_v42 = vcombine.low %v2952_v38, %v2952_v38  ;;  %v3115_v5 = vld [vmem:[%s3517_s24 + $0x160] sm:$0x33]  ;;  %v3070_v7 = vcombine.high %v3063_v3, %v3063_v3 }
  0x4f   : > { %956 = vmatpush1.bf16.msra.mxu0 %v946_v4  ;;  %v1542_v44 = vsel %vm256_vm0, %v2974_v42, 0  ;;  %v3122_v4 = vcombine.high %v3115_v5, %v3115_v5 }
  0x50   : > { %1254 = vmatpush1.bf16.msra.mxu1 %v1244_v6  ;;  %1044 = vmatprep.subr.bf16.mxu0 %v3598_v43  ;;  %v3069_v6 = vcombine.low %v3063_v3, %v3063_v3 }
  0x51   : > { %1342 = vmatprep.subr.bf16.mxu1 %v3668_v9 }
  0x52   : > { %2873 = vmatmul.mubr.msk.bf16.vlgmr.msra.gmra.mrb[4].mxu0 %vm252_vm1, %v3340_v10  ;;  %v2056_v10 = vsel %vm256_vm0, %v3069_v6, 0 }
  0x53   : > { %2925 = vmatmul.mubr.msk.bf16.vlgmr.msra.gmra.mrb[4].mxu1 %vm252_vm1, %v3341_v8  ;;  %1045 = vmatpush1.bf16.msra.mxu0 %v3611_v48 }
  0x54   : > { %1343 = vmatpush1.bf16.msra.mxu1 %v3677_v11  ;;  %1046 = vmatprep.subr.bf16.mxu0 %v3614_v49 }
  0x55   : > { %1344 = vmatprep.subr.bf16.mxu1 %v3682_v12  ;;  %1076 = vmatprep.mubr.bf16.mxu0 %v3454_v0 }
  0x56   : > { %1374 = vmatprep.mubr.bf16.mxu1 %v3454_v0 }
  0x57   : > { %1047 = vmatpush1.bf16.msra.mxu0 %v3625_v52 }
  0x58   : > { %1345 = vmatpush1.bf16.msra.mxu1 %v3691_v15  ;;  %2890 = vmatprep.subr.msk.bf16.mxu0 %vm256_vm0, %v2889_v16  ;;  %v3131_v16 = vcombine.high %v3108_v14, %v3108_v14 }
  0x59   : > { %2942 = vmatprep.subr.msk.bf16.mxu1 %vm256_vm0, %v2941_v17  ;;  %v3078_v17 = vcombine.low %v3056_v13, %v3056_v13 }
  0x5b   : > { %1049 = vmatpush1.bf16.msra.mxu0 %v1039_v20  ;;  %v2138_v19 = vsel %vm256_vm0, %v3078_v17, 0  ;;  %v2436_v20 = vsel %vm256_vm0, %v3130_v18, 0 }
  0x5c   : > { %1347 = vmatpush1.bf16.msra.mxu1 %v1337_v21  ;;  %1465 = vmatprep.subr.bf16.mxu0 %v3668_v9  ;;  %v3404_v21 = vld [vmem:[%s3517_s24 + $0x16c] ss:$8 sps:$4 sm:$0xff]  }
  0x5d   : > { %1763 = vmatprep.subr.bf16.mxu1 %v3704_v22 }
  0x5e   : > { %2891 = vmatmul.mubr.msk.bf16.vlgmr.msra.gmra.mrb[4].mxu0 %vm252_vm1, %v3352_v23  ;;  %v3401_v23 = vld [vmem:[%s3962_s1] sm:$0xff]  }
  0x5f   : > { %2943 = vmatmul.mubr.msk.bf16.vlgmr.msra.gmra.mrb[4].mxu1 %vm252_vm1, %v3353_v24  ;;  %1466 = vmatpush1.bf16.msra.mxu0 %v3677_v11  ;;  %v3402_v24 = vld [vmem:[%s3517_s24 + $0x168] ss:$8 sps:$4 sm:$0xff]  }
  0x60   : > { %1764 = vmatpush1.bf16.msra.mxu1 %v3713_v25  ;;  %1467 = vmatprep.subr.bf16.mxu0 %v3682_v12 }
  0x61   : > { %1765 = vmatprep.subr.bf16.mxu1 %v3718_v26  ;;  %1497 = vmatprep.mubr.bf16.mxu0 %v3454_v0 }
  0x62   : > { %1795 = vmatprep.mubr.bf16.mxu1 %v3454_v0 }
  0x63   : > { %1468 = vmatpush1.bf16.msra.mxu0 %v3691_v15 }
  0x64   : > { %1766 = vmatpush1.bf16.msra.mxu1 %v3727_v29  ;;  %2967 = vmatprep.subr.msk.bf16.mxu0 %vm256_vm0, %v2966_v30  ;;  %v3149_v30 = vcombine.high %v3142_v27, %v3142_v27 }
  0x65   : > { %3019 = vmatprep.subr.msk.bf16.mxu1 %vm256_vm0, %v3018_v31 }
  0x67   : > { %1470 = vmatpush1.bf16.msra.mxu0 %v1460_v34  ;;  %v2529_v34 = vsel %vm256_vm0, %v3148_v32, 0 }
  0x68   : > { %1768 = vmatpush1.bf16.msra.mxu1 %v1758_v35  ;;  %1547 = vmatprep.subr.bf16.mxu0 %v3598_v43  ;;  %v3026_v43 = vcombine.low %v3004_v39, %v3004_v39  ;;  %v3412_v35 = vld [vmem:[%s3962_s1 + $0x10] sm:$0xff]  }
  0x69   : > { %1845 = vmatprep.subr.bf16.mxu1 %v3668_v9  ;;  %v3121_v9 = vcombine.low %v3115_v5, %v3115_v5 }
  0x6a   : > { %2968 = vmatmul.mubr.msk.bf16.vlgmr.msra.gmra.mrb[8].mxu0 %vm252_vm1, %v3364_v36  ;;  %v1840_v45 = vsel %vm256_vm0, %v3026_v43, 0 }
  0x6b   : > { %3020 = vmatmul.mubr.msk.bf16.vlgmr.msra.gmra.mrb[8].mxu1 %vm252_vm1, %v3365_v37  ;;  %1548 = vmatpush1.bf16.msra.mxu0 %v3611_v48  ;;  %v3371_v48 = vld [vmem:[%s3962_s1] sm:$0xff]   ;;  %v2354_v8 = vsel %vm256_vm0, %v3121_v9, 0 }
  0x6c   : > { %1846 = vmatpush1.bf16.msra.mxu1 %v3677_v11  ;;  %1549 = vmatprep.subr.bf16.mxu0 %v3614_v49  ;;  %v3773_v49 = vld [vmem:[%s3517_s24 + $0x118] ss:$8 sps:$4 sm:$0xff]   ;;  %v3394_v11 = vld [vmem:[%s3962_s1 + $0x8] sm:$0xff]  }
  0x6d   : > { %1847 = vmatprep.subr.bf16.mxu1 %v3682_v12  ;;  %1579 = vmatprep.mubr.bf16.mxu0 %v3454_v0  ;;  %v3395_v12 = vld [vmem:[%s3962_s1 + $0x8] sm:$0xff]  }
  0x6e   : > { %1877 = vmatprep.mubr.bf16.mxu1 %v3454_v0 }
  0x6f   : > { %1550 = vmatpush1.bf16.msra.mxu0 %v3625_v52  ;;  %v3038_v52 = vld [vmem:[%s3517_s24 + $0x138] sm:$0x33] }
  0x70   : > { %1848 = vmatpush1.bf16.msra.mxu1 %v3691_v15  ;;  %2976 = vmatprep.subr.msk.bf16.mxu0 %vm256_vm0, %v2975_v40  ;;  %v3045_v55 = vcombine.high %v3038_v52, %v3038_v52  ;;  %v3044_v57 = vcombine.low %v3038_v52, %v3038_v52  ;;  %v3079_v15 = vcombine.high %v3056_v13, %v3056_v13 }
  0x71   : > { %3028 = vmatprep.subr.msk.bf16.mxu1 %vm256_vm0, %v3027_v41 }
  0x72   : > { %v1933_v59 = vsel %vm256_vm0, %v3044_v57, 0 }
  0x73   : > { %1552 = vmatpush1.bf16.msra.mxu0 %v1542_v44 }
  0x74   : > { %1850 = vmatpush1.bf16.msra.mxu1 %v1840_v45  ;;  %1640 = vmatprep.subr.bf16.mxu0 %v3704_v22 }
  0x75   : > { %1938 = vmatprep.subr.bf16.mxu1 %v3764_v46 }
  0x76   : > { %2977 = vmatmul.mubr.msk.bf16.vlgmr.msra.gmra.mrb[8].mxu0 %vm252_vm1, %v3370_v47 }
  0x77   : > { %3029 = vmatmul.mubr.msk.bf16.vlgmr.msra.gmra.mrb[8].mxu1 %vm252_vm1, %v3371_v48  ;;  %1641 = vmatpush1.bf16.msra.mxu0 %v3713_v25 }
  0x78   : > { %1939 = vmatpush1.bf16.msra.mxu1 %v3773_v49  ;;  %1642 = vmatprep.subr.bf16.mxu0 %v3718_v26 }
  0x79   : > { %1940 = vmatprep.subr.bf16.mxu1 %v3778_v50  ;;  %1672 = vmatprep.mubr.bf16.mxu0 %v3454_v0 }
  0x7a   : > { %1970 = vmatprep.mubr.bf16.mxu1 %v3454_v0 }
  0x7b   : > { %1643 = vmatpush1.bf16.msra.mxu0 %v3727_v29 }
  0x7c   : > { %1941 = vmatpush1.bf16.msra.mxu1 %v3787_v53  ;;  %2994 = vmatprep.subr.msk.bf16.mxu0 %vm256_vm0, %v2993_v54 }
  0x7d   : > { %3046 = vmatprep.subr.msk.bf16.mxu1 %vm256_vm0, %v3045_v55 }
  0x7f   : > { %1645 = vmatpush1.bf16.msra.mxu0 %v1635_v58 }
  0x80   : > { %1943 = vmatpush1.bf16.msra.mxu1 %v1933_v59  ;;  %2061 = vmatprep.subr.bf16.mxu0 %v3764_v46 }
  0x81   : > { %2359 = vmatprep.subr.bf16.mxu1 %v3386_v60 }
  0x82   : > { %2995 = vmatmul.mubr.msk.bf16.vlgmr.msra.gmra.mrb[8].mxu0 %vm252_vm1, %v3382_v61 }
  0x83   : > { %3047 = vmatmul.mubr.msk.bf16.vlgmr.msra.gmra.mrb[8].mxu1 %vm252_vm1, %v3383_v62  ;;  %2062 = vmatpush1.bf16.msra.mxu0 %v3773_v49 }
  0x84   : > { %2360 = vmatpush1.bf16.msra.mxu1 %v3807_v63  ;;  %2063 = vmatprep.subr.bf16.mxu0 %v3778_v50 }
  0x85   : > { %2361 = vmatprep.subr.bf16.mxu1 %v3811_v1  ;;  %2093 = vmatprep.mubr.bf16.mxu0 %v3454_v0 }
  0x86   : > { %2391 = vmatprep.mubr.bf16.mxu1 %v3454_v0 }
  0x87   : > { %2064 = vmatpush1.bf16.msra.mxu0 %v3787_v53 }
  0x88   : > { %2362 = vmatpush1.bf16.msra.mxu1 %v3820_v2  ;;  %3071 = vmatprep.subr.msk.bf16.mxu0 %vm256_vm0, %v3070_v7 }
  0x89   : > { %3123 = vmatprep.subr.msk.bf16.mxu1 %vm256_vm0, %v3122_v4 }
  0x8b   : > { %2066 = vmatpush1.bf16.msra.mxu0 %v2056_v10 }
  0x8c   : > { %2364 = vmatpush1.bf16.msra.mxu1 %v2354_v8  ;;  %2143 = vmatprep.subr.bf16.mxu0 %v3704_v22  ;;  %v3400_v22 = vld [vmem:[%s3962_s1] sm:$0xff]   ;;  %v3888_v36 = vpop.permute.xlu0 %488 }
  0x8d   : > { %2441 = vmatprep.subr.bf16.mxu1 %v3764_v46 }
  0x8e   : > { %3072 = vmatmul.mubr.msk.bf16.vlgmr.msra.gmra.mrb[12].mxu0 %vm252_vm1, %v3394_v11 }
  0x8f   : > { %3124 = vmatmul.mubr.msk.bf16.vlgmr.msra.gmra.mrb[12].mxu1 %vm252_vm1, %v3395_v12  ;;  %2144 = vmatpush1.bf16.msra.mxu0 %v3713_v25  ;;  %v3407_v25 = vld [vmem:[%s3517_s24 + $0x17c] ss:$8 sps:$4 sm:$0xff]  }
  0x90   : > { %2442 = vmatpush1.bf16.msra.mxu1 %v3773_v49  ;;  %2145 = vmatprep.subr.bf16.mxu0 %v3718_v26  ;;  %v3090_v26 = vld [vmem:[%s3517_s24 + $0x160] sm:$0x33]  ;;  %v3891_v37 = vpop.permute.xlu0 %493 }
  0x91   : > { %2443 = vmatprep.subr.bf16.mxu1 %v3778_v50  ;;  %2175 = vmatprep.mubr.bf16.mxu0 %v3454_v0  ;;  %v3096_v31 = vcombine.low %v3090_v26, %v3090_v26 }
  0x92   : > { %2473 = vmatprep.mubr.bf16.mxu1 %v3454_v0 }
  0x93   : > { %2146 = vmatpush1.bf16.msra.mxu0 %v3727_v29  ;;  %v3097_v29 = vcombine.high %v3090_v26, %v3090_v26  ;;  %v2231_v33 = vsel %vm256_vm0, %v3096_v31, 0 }
  0x94   : > { %2444 = vmatpush1.bf16.msra.mxu1 %v3787_v53  ;;  %3080 = vmatprep.subr.msk.bf16.mxu0 %vm256_vm0, %v3079_v15 }
  0x95   : > { %3132 = vmatprep.subr.msk.bf16.mxu1 %vm256_vm0, %v3131_v16 }
  0x97   : > { %2148 = vmatpush1.bf16.msra.mxu0 %v2138_v19 }
  0x98   : > { %2446 = vmatpush1.bf16.msra.mxu1 %v2436_v20  ;;  %2236 = vmatprep.subr.bf16.mxu0 %v3386_v60 }
  0x99   : > { %2534 = vmatprep.subr.bf16.mxu1 %v3404_v21 }
  0x9a   : > { %3081 = vmatmul.mubr.msk.bf16.vlgmr.msra.gmra.mrb[12].mxu0 %vm252_vm1, %v3400_v22 }
  0x9b   : > { %3133 = vmatmul.mubr.msk.bf16.vlgmr.msra.gmra.mrb[12].mxu1 %vm252_vm1, %v3401_v23  ;;  %2237 = vmatpush1.bf16.msra.mxu0 %v3807_v63 }
  0x9c   : > { %2535 = vmatpush1.bf16.msra.mxu1 %v3402_v24  ;;  %2238 = vmatprep.subr.bf16.mxu0 %v3811_v1 }
  0x9d   : > { %2536 = vmatprep.subr.bf16.mxu1 %v3407_v25  ;;  %2268 = vmatprep.mubr.bf16.mxu0 %v3454_v0 }
  0x9e   : > { %2566 = vmatprep.mubr.bf16.mxu1 %v3454_v0  ;;  %v3413_v0 = vld [vmem:[%s3962_s1 + $0x10] sm:$0xff]  }
  0x9f   : > { %2239 = vmatpush1.bf16.msra.mxu0 %v3820_v2 }
  0xa0   : > { %2537 = vmatpush1.bf16.msra.mxu1 %v3405_v28  ;;  %3098 = vmatprep.subr.msk.bf16.mxu0 %vm256_vm0, %v3097_v29 }
  0xa1   : > { %3150 = vmatprep.subr.msk.bf16.mxu1 %vm256_vm0, %v3149_v30 }
  0xa3   : > { %2241 = vmatpush1.bf16.msra.mxu0 %v2231_v33 }
  0xa4   : > { %2539 = vmatpush1.bf16.msra.mxu1 %v2529_v34 }
  0xa6   : > { %3099 = vmatmul.mubr.msk.bf16.vlgmr.msra.gmra.mrb[12].mxu0 %vm252_vm1, %v3412_v35 }
  0xa7   : > { %3151 = vmatmul.mubr.msk.bf16.vlgmr.msra.gmra.mrb[12].mxu1 %vm252_vm1, %v3413_v0 }
 0x10d   : > { %v473_v38 = vpop.f32.mrb[0].mxu0 }
 0x10e   : > { %v780_v39 = vpop.f32.mrb[0].mxu1  ;;  %v496_v40 = vadd.f32 %v3888_v36, %v473_v38  ;;  %v475_v42 = vpop.f32.mrb[1].mxu0 }
 0x10f   : > { %v793_v41 = vadd.f32 %v780_v39, %v3888_v36  ;;  %v782_v43 = vpop.f32.mrb[1].mxu1  ;;  %v497_v44 = vadd.f32 %v3888_v36, %v475_v42  ;;  %v477_v46 = vpop.f32.mrb[2].mxu0 }
 0x110   : > { %v794_v45 = vadd.f32 %v782_v43, %v3888_v36  ;;  %v784_v47 = vpop.f32.mrb[2].mxu1  ;;  %v500_v48 = vmax.f32 %v496_v40, 0.0  ;;  %v498_v50 = vadd.f32 %v3891_v37, %v477_v46  ;;  %v479_v52 = vpop.f32.mrb[3].mxu0 }
 0x111   : > { %v797_v49 = vmax.f32 %v793_v41, 0.0  ;;  %v795_v51 = vadd.f32 %v784_v47, %v3891_v37  ;;  %v786_v53 = vpop.f32.mrb[3].mxu1  ;;  %v501_v54 = vmax.f32 %v497_v44, 0.0  ;;  %v499_v56 = vadd.f32 %v3891_v37, %v479_v52 }
 0x112   : > { %v798_v55 = vmax.f32 %v794_v45, 0.0  ;;  %v796_v57 = vadd.f32 %v786_v53, %v3891_v37  ;;  %v502_v58 = vmax.f32 %v498_v50, 0.0 }
 0x113   : > { %v799_v59 = vmax.f32 %v795_v51, 0.0  ;;  %v3159_v60 = vpack.c.bf16 %v501_v54, %v500_v48  ;;  %v503_v62 = vmax.f32 %v499_v56, 0.0 }
 0x114   : > { %v3161_v61 = vpack.c.bf16 %v798_v55, %v797_v49  ;;  %v800_v63 = vmax.f32 %v796_v57, 0.0 }
 0x115   : > { %516 = vst [vmem:[%s3904_s23] sm:$0xff] %v3159_v60  ;;  %v3160_v1 = vpack.c.bf16 %v503_v62, %v502_v58 }
 0x116   : > { %2842 = vst [vmem:[%s3904_s23 + $0x10] sm:$0xff] %v3161_v61  ;;  %v3162_v3 = vpack.c.bf16 %v800_v63, %v799_v59 }
 0x117   : > { %517 = vst [vmem:[%s3904_s23 + $0x8] sm:$0xff] %v3160_v1 }
 0x118   : > { %2843 = vst [vmem:[%s3904_s23 + $0x18] sm:$0xff] %v3162_v3 }
 0x131   : > { %v1078_v5 = vpop.f32.mrb[4].mxu0 }
 0x132   : > { %v1376_v2 = vpop.f32.mrb[4].mxu1  ;;  %v1091_v7 = vadd.f32 %v1078_v5, %v3888_v36  ;;  %v1080_v6 = vpop.f32.mrb[5].mxu0 }
 0x133   : > { %v1389_v4 = vadd.f32 %v1376_v2, %v3888_v36  ;;  %v1378_v9 = vpop.f32.mrb[5].mxu1  ;;  %v1092_v10 = vadd.f32 %v1080_v6, %v3888_v36  ;;  %v1082_v11 = vpop.f32.mrb[6].mxu0 }
 0x134   : > { %v1390_v8 = vadd.f32 %v1378_v9, %v3888_v36  ;;  %v1380_v12 = vpop.f32.mrb[6].mxu1  ;;  %v1095_v13 = vmax.f32 %v1091_v7, 0.0  ;;  %v1093_v15 = vadd.f32 %v1082_v11, %v3891_v37  ;;  %v1084_v17 = vpop.f32.mrb[7].mxu0 }
 0x135   : > { %v1393_v14 = vmax.f32 %v1389_v4, 0.0  ;;  %v1391_v16 = vadd.f32 %v1380_v12, %v3891_v37  ;;  %v1382_v18 = vpop.f32.mrb[7].mxu1  ;;  %v1096_v19 = vmax.f32 %v1092_v10, 0.0  ;;  %v1094_v21 = vadd.f32 %v1084_v17, %v3891_v37 }
 0x136   : > { %v1394_v20 = vmax.f32 %v1390_v8, 0.0  ;;  %v1392_v22 = vadd.f32 %v1382_v18, %v3891_v37  ;;  %v1097_v23 = vmax.f32 %v1093_v15, 0.0 }
 0x137   : > { %v1395_v24 = vmax.f32 %v1391_v16, 0.0  ;;  %v3163_v25 = vpack.c.bf16 %v1096_v19, %v1095_v13  ;;  %v1098_v27 = vmax.f32 %v1094_v21, 0.0 }
 0x138   : > { %v3165_v26 = vpack.c.bf16 %v1394_v20, %v1393_v14  ;;  %v1396_v28 = vmax.f32 %v1392_v22, 0.0 }
 0x139   : > { %2894 = vst [vmem:[%s3904_s23 + $0x20] sm:$0xff] %v3163_v25  ;;  %v3164_v29 = vpack.c.bf16 %v1098_v27, %v1097_v23 }
 0x13a   : > { %2946 = vst [vmem:[%s3904_s23 + $0x30] sm:$0xff] %v3165_v26  ;;  %v3166_v30 = vpack.c.bf16 %v1396_v28, %v1395_v24 }
 0x13b   : > { %2895 = vst [vmem:[%s3904_s23 + $0x28] sm:$0xff] %v3164_v29 }
 0x13c   : > { %2947 = vst [vmem:[%s3904_s23 + $0x38] sm:$0xff] %v3166_v30 }
 0x155   : > { %v1674_v31 = vpop.f32.mrb[8].mxu0 }
 0x156   : > { %v1972_v32 = vpop.f32.mrb[8].mxu1  ;;  %v1687_v33 = vadd.f32 %v1674_v31, %v3888_v36  ;;  %v1676_v35 = vpop.f32.mrb[9].mxu0 }
 0x157   : > { %v1985_v34 = vadd.f32 %v1972_v32, %v3888_v36  ;;  %v1974_v0 = vpop.f32.mrb[9].mxu1  ;;  %v1688_v38 = vadd.f32 %v1676_v35, %v3888_v36  ;;  %v1678_v40 = vpop.f32.mrb[10].mxu0 }
 0x158   : > { %v1986_v39 = vadd.f32 %v1974_v0, %v3888_v36  ;;  %v1976_v41 = vpop.f32.mrb[10].mxu1  ;;  %v1691_v42 = vmax.f32 %v1687_v33, 0.0  ;;  %v1689_v44 = vadd.f32 %v1678_v40, %v3891_v37  ;;  %v1680_v46 = vpop.f32.mrb[11].mxu0 }
 0x159   : > { %v1989_v43 = vmax.f32 %v1985_v34, 0.0  ;;  %v1987_v45 = vadd.f32 %v1976_v41, %v3891_v37  ;;  %v1978_v47 = vpop.f32.mrb[11].mxu1  ;;  %v1692_v48 = vmax.f32 %v1688_v38, 0.0  ;;  %v1690_v50 = vadd.f32 %v1680_v46, %v3891_v37 }
 0x15a   : > { %v1990_v49 = vmax.f32 %v1986_v39, 0.0  ;;  %v1988_v51 = vadd.f32 %v1978_v47, %v3891_v37  ;;  %v1693_v52 = vmax.f32 %v1689_v44, 0.0 }
 0x15b   : > { %v1991_v53 = vmax.f32 %v1987_v45, 0.0  ;;  %v3167_v54 = vpack.c.bf16 %v1692_v48, %v1691_v42  ;;  %v1694_v56 = vmax.f32 %v1690_v50, 0.0 }
 0x15c   : > { %v3169_v55 = vpack.c.bf16 %v1990_v49, %v1989_v43  ;;  %v1992_v57 = vmax.f32 %v1988_v51, 0.0 }
 0x15d   : > { %2998 = vst [vmem:[%s3904_s23 + $0x40] sm:$0xff] %v3167_v54  ;;  %v3168_v58 = vpack.c.bf16 %v1694_v56, %v1693_v52 }
 0x15e   : > { %3050 = vst [vmem:[%s3904_s23 + $0x50] sm:$0xff] %v3169_v55  ;;  %v3170_v59 = vpack.c.bf16 %v1992_v57, %v1991_v53 }
 0x15f   : > { %2999 = vst [vmem:[%s3904_s23 + $0x48] sm:$0xff] %v3168_v58 }
 0x160   : > { %3051 = vst [vmem:[%s3904_s23 + $0x58] sm:$0xff] %v3170_v59 }
 0x179   : > { %v2270_v60 = vpop.f32.mrb[12].mxu0 }
 0x17a   : > { %v2568_v61 = vpop.f32.mrb[12].mxu1  ;;  %v2283_v62 = vadd.f32 %v2270_v60, %v3888_v36  ;;  %v2272_v1 = vpop.f32.mrb[13].mxu0 }
 0x17b   : > { %v2581_v63 = vadd.f32 %v2568_v61, %v3888_v36  ;;  %v2570_v3 = vpop.f32.mrb[13].mxu1  ;;  %v2284_v5 = vadd.f32 %v2272_v1, %v3888_v36  ;;  %v2274_v7 = vpop.f32.mrb[14].mxu0 }
 0x17c   : > { %v2582_v2 = vadd.f32 %v2570_v3, %v3888_v36  ;;  %v2572_v4 = vpop.f32.mrb[14].mxu1  ;;  %v2287_v6 = vmax.f32 %v2283_v62, 0.0  ;;  %v2285_v10 = vadd.f32 %v2274_v7, %v3891_v37  ;;  %v2276_v11 = vpop.f32.mrb[15].mxu0 }
 0x17d   : > { %v2585_v9 = vmax.f32 %v2581_v63, 0.0  ;;  %v2583_v8 = vadd.f32 %v2572_v4, %v3891_v37  ;;  %v2574_v12 = vpop.f32.mrb[15].mxu1  ;;  %v2288_v13 = vmax.f32 %v2284_v5, 0.0  ;;  %v2286_v15 = vadd.f32 %v2276_v11, %v3891_v37 }
 0x17e   : > { %v2586_v14 = vmax.f32 %v2582_v2, 0.0  ;;  %v2584_v36 = vadd.f32 %v2574_v12, %v3891_v37  ;;  %v2289_v16 = vmax.f32 %v2285_v10, 0.0 }
 0x17f   : > { %v2587_v17 = vmax.f32 %v2583_v8, 0.0  ;;  %v3171_v18 = vpack.c.bf16 %v2288_v13, %v2287_v6  ;;  %v2290_v20 = vmax.f32 %v2286_v15, 0.0 }
 0x180   : > { %v3173_v19 = vpack.c.bf16 %v2586_v14, %v2585_v9  ;;  %v2588_v21 = vmax.f32 %v2584_v36, 0.0 }
 0x181   : > { %3102 = vst [vmem:[%s3904_s23 + $0x60] sm:$0xff] %v3171_v18  ;;  %v3172_v22 = vpack.c.bf16 %v2290_v20, %v2289_v16 }
 0x182   : > { %3154 = vst [vmem:[%s3904_s23 + $0x70] sm:$0xff] %v3173_v19  ;;  %v3174_v23 = vpack.c.bf16 %v2588_v21, %v2587_v17 }
 0x183   : > { %3103 = vst [vmem:[%s3904_s23 + $0x68] sm:$0xff] %v3172_v22 }
 0x184   : > { %3155 = vst [vmem:[%s3904_s23 + $0x78] sm:$0xff] %v3174_v23 }
 0x185 PF: > { %s13_s16 = sadd.s32 1, %s3452_s16   ;;  %s3965_s12 = smov %s3444_s14 }
 0x186   : > { %p10_p7 = scmp.ge.s32.totalorder %s13_s16, 6   ;;  %s3966_s13 = smov %s3448_s15 }
 0x187   : > { %s3967_s14 = smov %s3970_s17  ;;  %s3968_s15 = smov %s3974_s18 }
 0x188   :  { %12 = sbr.rel (!%p10_p7) target bundleno = 3 (0x3), region = 81 }

// kernel: double_3d_conv.3
= control target key start
LH: loop header
LB: loop body
LE: loop exit
PB: predicated region body
PF: predicated region fallthrough
CT: control target
= control target key end

     0   :  { %s5967_s12 = smov 0   ;;  %s5969_s13 = smov 0   ;;  %s7100_s0 = inlined_call_operand.vmem [shape: bf16[2,18,144,256], index: 0, kind: input, shape index: {}]   ;;  %s7101_s1 = inlined_call_operand.vmem [shape: bf16[3,16,144], index: 1, kind: input, shape index: {}]   ;;  %s7102_s2 = inlined_call_operand.vmem [shape: f32[16,1], index: 2, kind: input, shape index: {}]   ;;  %s7103_s3 = inlined_call_operand.vmem [shape: f32[2,16,16,256], index: 3, kind: output, shape index: {}]  }
   0x1   :  { %s5971_s14 = smov 0   ;;  %s5973_s15 = smov 0  }
   0x2   :  { %s5975_s16 = smov 0  }
   0x3 LB: > { %s22_s17 = sadd.s32 1, %s5936_s14  ;;  %s25_s18 = sadd.s32 1, %s5940_s15  ;;  %s5944_s16 = sphi %s5975_s16, %s13_s16   ;;  %s5940_s15 = sphi %s5973_s15, %s7107_s15   ;;  %s5936_s14 = sphi %s5971_s14, %s7106_s14   ;;  %s5932_s13 = sphi %s5969_s13, %s7105_s13   ;;  %s5928_s12 = sphi %s5967_s12, %s7104_s12  }
   0x4   : > { %p23_p0 = scmp.ge.s32.totalorder %s22_s17, 2  ;;  %p4479_p1 = scmp.ge.s32.totalorder %s5944_s16, 1 }
   0x5   : > { %p151_p2 = scmp.lt.s32.totalorder %s5944_s16, 5 }
   0x6   : > { %s7109_s17 = smov (%p23_p0, %s22_s17), 0  ;;  %s7111_s18 = smov (!%p23_p0, %s25_s18), %s5940_s15 }
   0x7   : > { %p152_p3 = pnand %p4479_p1, %p151_p2  ;;  %p27_p4 = scmp.ge.s32.totalorder %s7111_s18, 2 }
   0x8   : > { %p180_p5 = scmp.lt.s32.totalorder (!%p152_p3), %s5932_s13, 1  ;;  %v6002_v0 = vld [vmem:[%s7101_s1 + $0x14] ss:$8 sps:$4 sm:$0xff] (!%p152_p3)   ;;  %vm347_vm0 = vcmask (!%p152_p3), 130048   ;;  %s5486_s21 = smul.u32 (!%p152_p3), 1152, %s5928_s12  ;;  %v5946_v54 = vmov (!%p152_p3), 0  }
   0x9   : > { %s7113_s18 = smov (%p27_p4, %s7111_s18), 0  ;;  %155 = sbr.rel (%p152_p3) target bundleno = 674 (0x2a2), region = 32 }
   0xa   : > { %4530 = vmatprep.mubr.msk.bf16.mxu0 (!%p152_p3), %vm347_vm0, %v6002_v0  ;;  %4653 = vmatprep.mubr.msk.bf16.mxu1 (!%p152_p3), %vm347_vm0, %v6002_v0  ;;  %v6163_v38 = vld [vmem:[%s7101_s1 + $0x10] ss:$8 sps:$4 sm:$0xff] (!%p152_p3)   ;;  %v6173_v41 = vld [vmem:[%s7101_s1 + $0x4] ss:$8 sps:$4 sm:$0xff] (!%p152_p3)   ;;  %v6224_v61 = vld [vmem:[%s7101_s1] ss:$8 sps:$4 sm:$0xff] (!%p152_p3)  }
   0xb   : > { %5593 = vset.pattern.permute.xlu0 (!%p152_p3), %v5946_v54  ;;  %v198_v56 = vld [vmem:[%s7102_s2] sm:$0xff] (!%p152_p3)  ;;  %v199_v59 = vld [vmem:[%s7102_s2 + $0x8] sm:$0xff] (!%p152_p3)  ;;  %s4481_s5 = sshll.u32 (!%p152_p3), %s5928_s12, 3 }
   0xc   : > { %715 = vperm.xlu0 (!%p152_p3), %5593, %v198_v56   ;;  %v6578_v56 = vld [vmem:[%s7101_s1 + $0x14] ss:$8 sps:$4 sm:$0xff] (!%p152_p3)   ;;  %p188_p6 = scmp.lt.s32.totalorder (!%p152_p3), %s4481_s5, 15 }
  0x10   : > { %s7115_s13 = smov (!%p180_p5, %s5932_s13), 1  ;;  %720 = vperm.xlu0 %5593, %v199_v59   ;;  %s7117_s5 = smov (!%p188_p6, %s4481_s5), 15 }
  0x11   : > { %s5551_s22 = smul.u32 2592, %s7115_s13  ;;  %s4482_s12 = sshll.u32 %s7117_s5, 2 }
  0x12   : > { %s4483_s6 = sshll.u32 %s7115_s13, 6 }
  0x13   : > { %s184_s25 = scalar_lea.vmem %s7100_s0, %s5551_s22  ;;  %s192_s7 = sadd.s32 %s4483_s6, %s4482_s12 }
  0x14   : > { %s6015_s26 = scalar_lea.vmem %s184_s25, %s5486_s21  ;;  %s4484_s13 = sshll.u32 %s192_s7, 3 }
  0x15   : > { %v6018_v1 = vld [vmem:[%s6015_s26 + $0x94] ss:$8 sps:$4 sm:$0xff]   ;;  %v6021_v2 = vld [vmem:[%s6015_s26 + $0x124] ss:$8 sps:$4 sm:$0xff]   ;;  %v6025_v3 = vld [vmem:[%s6015_s26 + $0x90] ss:$8 sps:$4 sm:$0xff]   ;;  %s6840_s19 = scalar_lea.vmem %s7103_s3, %s4484_s13 }
  0x16   : > { %351 = vmatprep.subr.bf16.mxu0 %v6018_v1  ;;  %v6028_v4 = vld [vmem:[%s6015_s26 + $0x120] ss:$8 sps:$4 sm:$0xff]   ;;  %877 = vmatprep.subr.bf16.mxu1 %v6021_v2  ;;  %v6032_v5 = vld [vmem:[%s6015_s26 + $0xa4] ss:$8 sps:$4 sm:$0xff]   ;;  %v6037_v6 = vld [vmem:[%s6015_s26 + $0x134] ss:$8 sps:$4 sm:$0xff]  }
  0x17   : > { %352 = vmatpush1.bf16.msra.mxu0 %v6025_v3  ;;  %878 = vmatpush1.bf16.msra.mxu1 %v6028_v4  ;;  %v6040_v7 = vld [vmem:[%s6015_s26 + $0xa0] ss:$8 sps:$4 sm:$0xff]   ;;  %v6044_v8 = vld [vmem:[%s6015_s26 + $0x130] ss:$8 sps:$4 sm:$0xff]   ;;  %v6048_v9 = vld [vmem:[%s6015_s26 + $0xb4] ss:$8 sps:$4 sm:$0xff]  }
  0x18   : > { %353 = vmatprep.subr.bf16.mxu0 %v6032_v5  ;;  %879 = vmatprep.subr.bf16.mxu1 %v6037_v6  ;;  %v6051_v10 = vld [vmem:[%s6015_s26 + $0x144] ss:$8 sps:$4 sm:$0xff]   ;;  %v6054_v11 = vld [vmem:[%s6015_s26 + $0xb0] ss:$8 sps:$4 sm:$0xff]   ;;  %v6057_v12 = vld [vmem:[%s6015_s26 + $0x140] ss:$8 sps:$4 sm:$0xff]  }
  0x19   : > { %v6062_v13 = vld [vmem:[%s6015_s26 + $0xc4] ss:$8 sps:$4 sm:$0xff]   ;;  %v6067_v14 = vld [vmem:[%s6015_s26 + $0x154] ss:$8 sps:$4 sm:$0xff]   ;;  %v6070_v15 = vld [vmem:[%s6015_s26 + $0xc0] ss:$8 sps:$4 sm:$0xff]  }
  0x1a   : > { %v6075_v16 = vld [vmem:[%s6015_s26 + $0x150] ss:$8 sps:$4 sm:$0xff]   ;;  %v6078_v17 = vld [vmem:[%s6015_s26 + $0xd4] ss:$8 sps:$4 sm:$0xff]   ;;  %v6083_v18 = vld [vmem:[%s6015_s26 + $0x164] ss:$8 sps:$4 sm:$0xff]  }
  0x1b   : > { %354 = vmatpush1.bf16.msra.mxu0 %v6040_v7  ;;  %880 = vmatpush1.bf16.msra.mxu1 %v6044_v8  ;;  %v6086_v19 = vld [vmem:[%s6015_s26 + $0xd0] ss:$8 sps:$4 sm:$0xff]   ;;  %v6089_v20 = vld [vmem:[%s6015_s26 + $0x160] ss:$8 sps:$4 sm:$0xff]   ;;  %v6094_v21 = vld [vmem:[%s6015_s26 + $0xe4] ss:$8 sps:$4 sm:$0xff]  }
  0x1c   : > { %355 = vmatprep.subr.bf16.mxu0 %v6048_v9  ;;  %881 = vmatprep.subr.bf16.mxu1 %v6051_v10  ;;  %v6099_v22 = vld [vmem:[%s6015_s26 + $0x174] ss:$8 sps:$4 sm:$0xff]   ;;  %v6102_v23 = vld [vmem:[%s6015_s26 + $0xe0] ss:$8 sps:$4 sm:$0xff]   ;;  %v6107_v24 = vld [vmem:[%s6015_s26 + $0x170] ss:$8 sps:$4 sm:$0xff]  }
  0x1d   : > { %v6110_v25 = vld [vmem:[%s6015_s26 + $0xf4] ss:$8 sps:$4 sm:$0xff]   ;;  %v6115_v26 = vld [vmem:[%s6015_s26 + $0x184] ss:$8 sps:$4 sm:$0xff]   ;;  %v6118_v27 = vld [vmem:[%s6015_s26 + $0xf0] ss:$8 sps:$4 sm:$0xff]  }
  0x1e   : > { %v6121_v28 = vld [vmem:[%s6015_s26 + $0x180] ss:$8 sps:$4 sm:$0xff]   ;;  %v6126_v29 = vld [vmem:[%s6015_s26 + $0x104] ss:$8 sps:$4 sm:$0xff]   ;;  %v6131_v30 = vld [vmem:[%s6015_s26 + $0x194] ss:$8 sps:$4 sm:$0xff]  }
  0x1f   : > { %356 = vmatpush1.bf16.msra.mxu0 %v6054_v11  ;;  %882 = vmatpush1.bf16.msra.mxu1 %v6057_v12  ;;  %v6134_v31 = vld [vmem:[%s6015_s26 + $0x100] ss:$8 sps:$4 sm:$0xff]   ;;  %v6137_v32 = vld [vmem:[%s6015_s26 + $0x190] ss:$8 sps:$4 sm:$0xff]   ;;  %v6142_v33 = vld [vmem:[%s6015_s26 + $0x114] ss:$8 sps:$4 sm:$0xff]  }
  0x20   : > { %357 = vmatprep.subr.bf16.mxu0 %v6062_v13  ;;  %883 = vmatprep.subr.bf16.mxu1 %v6067_v14  ;;  %v6147_v34 = vld [vmem:[%s6015_s26 + $0x1a4] ss:$8 sps:$4 sm:$0xff]   ;;  %v6150_v35 = vld [vmem:[%s6015_s26 + $0x110] ss:$8 sps:$4 sm:$0xff]   ;;  %v6155_v36 = vld [vmem:[%s6015_s26 + $0x1a0] ss:$8 sps:$4 sm:$0xff]  }
  0x21   : > { %v5653_v37 = vld [vmem:[%s6015_s26 + $0x4] ss:$8 sps:$4 sm:$0xff]   ;;  %v5651_v39 = vld [vmem:[%s6015_s26] ss:$8 sps:$4 sm:$0xff]   ;;  %v5656_v40 = vld [vmem:[%s6015_s26 + $0x14] ss:$8 sps:$4 sm:$0xff]  }
  0x22   : > { %v5654_v42 = vld [vmem:[%s6015_s26 + $0x10] ss:$8 sps:$4 sm:$0xff]   ;;  %v5659_v43 = vld [vmem:[%s6015_s26 + $0x24] ss:$8 sps:$4 sm:$0xff]   ;;  %v5657_v44 = vld [vmem:[%s6015_s26 + $0x20] ss:$8 sps:$4 sm:$0xff]  }
  0x23   : > { %358 = vmatpush1.bf16.msra.mxu0 %v6070_v15  ;;  %884 = vmatpush1.bf16.msra.mxu1 %v6075_v16  ;;  %v5662_v45 = vld [vmem:[%s6015_s26 + $0x34] ss:$8 sps:$4 sm:$0xff]   ;;  %v5660_v46 = vld [vmem:[%s6015_s26 + $0x30] ss:$8 sps:$4 sm:$0xff]   ;;  %v5665_v47 = vld [vmem:[%s6015_s26 + $0x44] ss:$8 sps:$4 sm:$0xff]  }
  0x24   : > { %359 = vmatprep.subr.bf16.mxu0 %v6078_v17  ;;  %885 = vmatprep.subr.bf16.mxu1 %v6083_v18  ;;  %v5663_v48 = vld [vmem:[%s6015_s26 + $0x40] ss:$8 sps:$4 sm:$0xff]   ;;  %v5668_v49 = vld [vmem:[%s6015_s26 + $0x54] ss:$8 sps:$4 sm:$0xff]   ;;  %v5666_v50 = vld [vmem:[%s6015_s26 + $0x50] ss:$8 sps:$4 sm:$0xff]  }
  0x25   : > { %v5671_v51 = vld [vmem:[%s6015_s26 + $0x64] ss:$8 sps:$4 sm:$0xff]   ;;  %v5669_v52 = vld [vmem:[%s6015_s26 + $0x60] ss:$8 sps:$4 sm:$0xff]   ;;  %v5674_v53 = vld [vmem:[%s6015_s26 + $0x74] ss:$8 sps:$4 sm:$0xff]  }
  0x26   : > { %v5672_v55 = vld [vmem:[%s6015_s26 + $0x70] ss:$8 sps:$4 sm:$0xff]   ;;  %v5677_v57 = vld [vmem:[%s6015_s26 + $0x84] ss:$8 sps:$4 sm:$0xff]   ;;  %v5675_v58 = vld [vmem:[%s6015_s26 + $0x80] ss:$8 sps:$4 sm:$0xff]  }
  0x27   : > { %360 = vmatpush1.bf16.msra.mxu0 %v6086_v19  ;;  %886 = vmatpush1.bf16.msra.mxu1 %v6089_v20  ;;  %v6219_v60 = vld [vmem:[%s6015_s26 + $0x1b4] ss:$8 sps:$4 sm:$0xff]   ;;  %v6227_v62 = vld [vmem:[%s6015_s26 + $0x1b0] ss:$8 sps:$4 sm:$0xff]   ;;  %v6233_v63 = vld [vmem:[%s6015_s26 + $0x1c4] ss:$8 sps:$4 sm:$0xff]  }
  0x28   : > { %361 = vmatprep.subr.bf16.mxu0 %v6094_v21  ;;  %887 = vmatprep.subr.bf16.mxu1 %v6099_v22  ;;  %v6420_v54 = vld [vmem:[%s6015_s26 + $0x2c0] ss:$8 sps:$4 sm:$0xff]  }
  0x29   : > { %v6599_v59 = vld [vmem:[%s6015_s26 + $0x380] ss:$8 sps:$4 sm:$0xff]  }
  0x2b   : > { %362 = vmatpush1.bf16.msra.mxu0 %v6102_v23  ;;  %888 = vmatpush1.bf16.msra.mxu1 %v6107_v24 }
  0x2c   : > { %363 = vmatprep.subr.bf16.mxu0 %v6110_v25  ;;  %889 = vmatprep.subr.bf16.mxu1 %v6115_v26 }
  0x2f   : > { %364 = vmatpush1.bf16.msra.mxu0 %v6118_v27  ;;  %890 = vmatpush1.bf16.msra.mxu1 %v6121_v28 }
  0x30   : > { %365 = vmatprep.subr.bf16.mxu0 %v6126_v29  ;;  %891 = vmatprep.subr.bf16.mxu1 %v6131_v30 }
  0x33   : > { %366 = vmatpush1.bf16.msra.mxu0 %v6134_v31  ;;  %892 = vmatpush1.bf16.msra.mxu1 %v6137_v32 }
  0x34   : > { %367 = vmatprep.subr.bf16.mxu0 %v6142_v33  ;;  %893 = vmatprep.subr.bf16.mxu1 %v6147_v34 }
  0x37   : > { %368 = vmatpush1.bf16.msra.mxu0 %v6150_v35  ;;  %894 = vmatpush1.bf16.msra.mxu1 %v6155_v36 }
  0x38   : > { %496 = vmatprep.subr.bf16.mxu0 %v5653_v37  ;;  %1022 = vmatprep.subr.bf16.mxu1 %v6018_v1  ;;  %v6238_v1 = vld [vmem:[%s7101_s1 + $0x24] ss:$8 sps:$4 sm:$0xff]   ;;  %v6334_v37 = vld [vmem:[%s6015_s26 + $0x240] ss:$8 sps:$4 sm:$0xff]  }
  0x3a   : > { %384 = vmatmul.mubr.bf16.vlgmr.msra.gmra.mrb[0].mxu0 %v6163_v38  ;;  %910 = vmatmul.mubr.bf16.vlgmr.msra.gmra.mrb[0].mxu1 %v6163_v38 }
  0x3b   : > { %497 = vmatpush1.bf16.msra.mxu0 %v5651_v39  ;;  %1023 = vmatpush1.bf16.msra.mxu1 %v6025_v3  ;;  %v6241_v3 = vld [vmem:[%s6015_s26 + $0x1c0] ss:$8 sps:$4 sm:$0xff]   ;;  %v6339_v39 = vld [vmem:[%s6015_s26 + $0x254] ss:$8 sps:$4 sm:$0xff]  }
  0x3c   : > { %498 = vmatprep.subr.bf16.mxu0 %v5656_v40  ;;  %1024 = vmatprep.subr.bf16.mxu1 %v6032_v5  ;;  %v6250_v5 = vld [vmem:[%s6015_s26 + $0x1d4] ss:$8 sps:$4 sm:$0xff]   ;;  %v6346_v40 = vld [vmem:[%s6015_s26 + $0x250] ss:$8 sps:$4 sm:$0xff]  }
  0x3d   : > { %4551 = vmatprep.mubr.msk.bf16.mxu0 %vm347_vm0, %v6173_v41  ;;  %4674 = vmatprep.mubr.msk.bf16.mxu1 %vm347_vm0, %v6173_v41 }
  0x3f   : > { %499 = vmatpush1.bf16.msra.mxu0 %v5654_v42  ;;  %1025 = vmatpush1.bf16.msra.mxu1 %v6040_v7  ;;  %v6253_v7 = vld [vmem:[%s6015_s26 + $0x1d0] ss:$8 sps:$4 sm:$0xff]   ;;  %v6351_v42 = vld [vmem:[%s6015_s26 + $0x264] ss:$8 sps:$4 sm:$0xff]  }
  0x40   : > { %500 = vmatprep.subr.bf16.mxu0 %v5659_v43  ;;  %1026 = vmatprep.subr.bf16.mxu1 %v6048_v9  ;;  %v6264_v9 = vld [vmem:[%s6015_s26 + $0x1e4] ss:$8 sps:$4 sm:$0xff]   ;;  %v6360_v43 = vld [vmem:[%s6015_s26 + $0x260] ss:$8 sps:$4 sm:$0xff]  }
  0x43   : > { %501 = vmatpush1.bf16.msra.mxu0 %v5657_v44  ;;  %1027 = vmatpush1.bf16.msra.mxu1 %v6054_v11  ;;  %v6267_v11 = vld [vmem:[%s6015_s26 + $0x1e0] ss:$8 sps:$4 sm:$0xff]   ;;  %v6365_v44 = vld [vmem:[%s6015_s26 + $0x274] ss:$8 sps:$4 sm:$0xff]  }
  0x44   : > { %502 = vmatprep.subr.bf16.mxu0 %v5662_v45  ;;  %1028 = vmatprep.subr.bf16.mxu1 %v6062_v13  ;;  %v6274_v13 = vld [vmem:[%s6015_s26 + $0x1f4] ss:$8 sps:$4 sm:$0xff]   ;;  %v6375_v45 = vld [vmem:[%s6015_s26 + $0x284] ss:$8 sps:$4 sm:$0xff]  }
  0x47   : > { %503 = vmatpush1.bf16.msra.mxu0 %v5660_v46  ;;  %1029 = vmatpush1.bf16.msra.mxu1 %v6070_v15  ;;  %v6277_v15 = vld [vmem:[%s6015_s26 + $0x1f0] ss:$8 sps:$4 sm:$0xff]   ;;  %v6380_v46 = vld [vmem:[%s6015_s26 + $0x280] ss:$8 sps:$4 sm:$0xff]  }
  0x48   : > { %504 = vmatprep.subr.bf16.mxu0 %v5665_v47  ;;  %1030 = vmatprep.subr.bf16.mxu1 %v6078_v17  ;;  %v6284_v17 = vld [vmem:[%s6015_s26 + $0x204] ss:$8 sps:$4 sm:$0xff]   ;;  %v6385_v47 = vld [vmem:[%s6015_s26 + $0x294] ss:$8 sps:$4 sm:$0xff]  }
  0x4b   : > { %505 = vmatpush1.bf16.msra.mxu0 %v5663_v48  ;;  %1031 = vmatpush1.bf16.msra.mxu1 %v6086_v19  ;;  %v6287_v19 = vld [vmem:[%s6015_s26 + $0x200] ss:$8 sps:$4 sm:$0xff]   ;;  %v6390_v48 = vld [vmem:[%s6015_s26 + $0x290] ss:$8 sps:$4 sm:$0xff]  }
  0x4c   : > { %506 = vmatprep.subr.bf16.mxu0 %v5668_v49  ;;  %1032 = vmatprep.subr.bf16.mxu1 %v6094_v21  ;;  %v6294_v21 = vld [vmem:[%s6015_s26 + $0x214] ss:$8 sps:$4 sm:$0xff]   ;;  %v6395_v49 = vld [vmem:[%s6015_s26 + $0x2a4] ss:$8 sps:$4 sm:$0xff]  }
  0x4f   : > { %507 = vmatpush1.bf16.msra.mxu0 %v5666_v50  ;;  %1033 = vmatpush1.bf16.msra.mxu1 %v6102_v23  ;;  %v6297_v23 = vld [vmem:[%s6015_s26 + $0x210] ss:$8 sps:$4 sm:$0xff]   ;;  %v6400_v50 = vld [vmem:[%s6015_s26 + $0x2a0] ss:$8 sps:$4 sm:$0xff]  }
  0x50   : > { %508 = vmatprep.subr.bf16.mxu0 %v5671_v51  ;;  %1034 = vmatprep.subr.bf16.mxu1 %v6110_v25  ;;  %v6304_v25 = vld [vmem:[%s6015_s26 + $0x224] ss:$8 sps:$4 sm:$0xff]   ;;  %v6405_v51 = vld [vmem:[%s6015_s26 + $0x2b4] ss:$8 sps:$4 sm:$0xff]  }
  0x53   : > { %509 = vmatpush1.bf16.msra.mxu0 %v5669_v52  ;;  %1035 = vmatpush1.bf16.msra.mxu1 %v6118_v27  ;;  %v6307_v27 = vld [vmem:[%s6015_s26 + $0x220] ss:$8 sps:$4 sm:$0xff]   ;;  %v6410_v52 = vld [vmem:[%s6015_s26 + $0x2b0] ss:$8 sps:$4 sm:$0xff]  }
  0x54   : > { %510 = vmatprep.subr.bf16.mxu0 %v5674_v53  ;;  %1036 = vmatprep.subr.bf16.mxu1 %v6126_v29  ;;  %v6314_v29 = vld [vmem:[%s6015_s26 + $0x234] ss:$8 sps:$4 sm:$0xff]   ;;  %v6415_v53 = vld [vmem:[%s6015_s26 + $0x2c4] ss:$8 sps:$4 sm:$0xff]  }
  0x57   : > { %511 = vmatpush1.bf16.msra.mxu0 %v5672_v55  ;;  %1037 = vmatpush1.bf16.msra.mxu1 %v6134_v31  ;;  %v6319_v31 = vld [vmem:[%s6015_s26 + $0x230] ss:$8 sps:$4 sm:$0xff]   ;;  %v6573_v55 = vld [vmem:[%s6015_s26 + $0x374] ss:$8 sps:$4 sm:$0xff]  }
  0x58   : > { %512 = vmatprep.subr.bf16.mxu0 %v5677_v57  ;;  %1038 = vmatprep.subr.bf16.mxu1 %v6142_v33  ;;  %v6324_v33 = vld [vmem:[%s6015_s26 + $0x244] ss:$8 sps:$4 sm:$0xff]   ;;  %v6585_v57 = vld [vmem:[%s6015_s26 + $0x370] ss:$8 sps:$4 sm:$0xff]  }
  0x5b   : > { %513 = vmatpush1.bf16.msra.mxu0 %v5675_v58  ;;  %1039 = vmatpush1.bf16.msra.mxu1 %v6150_v35  ;;  %v6329_v35 = vld [vmem:[%s7101_s1 + $0x20] ss:$8 sps:$4 sm:$0xff]   ;;  %v6590_v58 = vld [vmem:[%s6015_s26 + $0x384] ss:$8 sps:$4 sm:$0xff]  }
  0x5c   : > { %666 = vmatprep.subr.bf16.mxu0 %v6021_v2  ;;  %1191 = vmatprep.subr.bf16.mxu1 %v6219_v60 }
  0x5e   : > { %529 = vmatmul.mubr.bf16.vlgmr.msra.gmra.mrb[0].mxu0 %v6224_v61  ;;  %1055 = vmatmul.mubr.bf16.vlgmr.msra.gmra.mrb[0].mxu1 %v6224_v61 }
  0x5f   : > { %667 = vmatpush1.bf16.msra.mxu0 %v6028_v4  ;;  %1192 = vmatpush1.bf16.msra.mxu1 %v6227_v62 }
  0x60   : > { %668 = vmatprep.subr.bf16.mxu0 %v6037_v6  ;;  %1193 = vmatprep.subr.bf16.mxu1 %v6233_v63 }
  0x61   : > { %4594 = vmatprep.mubr.msk.bf16.mxu0 %vm347_vm0, %v6238_v1  ;;  %4717 = vmatprep.mubr.msk.bf16.mxu1 %vm347_vm0, %v6238_v1 }
  0x63   : > { %669 = vmatpush1.bf16.msra.mxu0 %v6044_v8  ;;  %1194 = vmatpush1.bf16.msra.mxu1 %v6241_v3 }
  0x64   : > { %670 = vmatprep.subr.bf16.mxu0 %v6051_v10  ;;  %1195 = vmatprep.subr.bf16.mxu1 %v6250_v5 }
  0x67   : > { %671 = vmatpush1.bf16.msra.mxu0 %v6057_v12  ;;  %1196 = vmatpush1.bf16.msra.mxu1 %v6253_v7 }
  0x68   : > { %672 = vmatprep.subr.bf16.mxu0 %v6067_v14  ;;  %1197 = vmatprep.subr.bf16.mxu1 %v6264_v9 }
  0x6b   : > { %673 = vmatpush1.bf16.msra.mxu0 %v6075_v16  ;;  %1198 = vmatpush1.bf16.msra.mxu1 %v6267_v11 }
  0x6c   : > { %674 = vmatprep.subr.bf16.mxu0 %v6083_v18  ;;  %1199 = vmatprep.subr.bf16.mxu1 %v6274_v13 }
  0x6f   : > { %675 = vmatpush1.bf16.msra.mxu0 %v6089_v20  ;;  %1200 = vmatpush1.bf16.msra.mxu1 %v6277_v15 }
  0x70   : > { %676 = vmatprep.subr.bf16.mxu0 %v6099_v22  ;;  %1201 = vmatprep.subr.bf16.mxu1 %v6284_v17 }
  0x73   : > { %677 = vmatpush1.bf16.msra.mxu0 %v6107_v24  ;;  %1202 = vmatpush1.bf16.msra.mxu1 %v6287_v19 }
  0x74   : > { %678 = vmatprep.subr.bf16.mxu0 %v6115_v26  ;;  %1203 = vmatprep.subr.bf16.mxu1 %v6294_v21 }
  0x77   : > { %679 = vmatpush1.bf16.msra.mxu0 %v6121_v28  ;;  %1204 = vmatpush1.bf16.msra.mxu1 %v6297_v23 }
  0x78   : > { %680 = vmatprep.subr.bf16.mxu0 %v6131_v30  ;;  %1205 = vmatprep.subr.bf16.mxu1 %v6304_v25 }
  0x7b   : > { %681 = vmatpush1.bf16.msra.mxu0 %v6137_v32  ;;  %1206 = vmatpush1.bf16.msra.mxu1 %v6307_v27 }
  0x7c   : > { %682 = vmatprep.subr.bf16.mxu0 %v6147_v34  ;;  %1207 = vmatprep.subr.bf16.mxu1 %v6314_v29 }
  0x7f   : > { %683 = vmatpush1.bf16.msra.mxu0 %v6155_v36  ;;  %1208 = vmatpush1.bf16.msra.mxu1 %v6319_v31 }
  0x80   : > { %1393 = vmatprep.subr.bf16.mxu0 %v6219_v60  ;;  %1909 = vmatprep.subr.bf16.mxu1 %v6324_v33 }
  0x82   : > { %699 = vmatmul.mubr.bf16.vlgmr.msra.gmra.mrb[0].mxu0 %v6329_v35  ;;  %1224 = vmatmul.mubr.bf16.vlgmr.msra.gmra.mrb[0].mxu1 %v6329_v35 }
  0x83   : > { %1394 = vmatpush1.bf16.msra.mxu0 %v6227_v62  ;;  %1910 = vmatpush1.bf16.msra.mxu1 %v6334_v37 }
  0x84   : > { %1395 = vmatprep.subr.bf16.mxu0 %v6233_v63  ;;  %1911 = vmatprep.subr.bf16.mxu1 %v6339_v39 }
  0x85   : > { %4780 = vmatprep.mubr.msk.bf16.mxu0 %vm347_vm0, %v6002_v0  ;;  %4907 = vmatprep.mubr.msk.bf16.mxu1 %vm347_vm0, %v6002_v0  ;;  %v6370_v0 = vld [vmem:[%s6015_s26 + $0x270] ss:$8 sps:$4 sm:$0xff]  }
  0x87   : > { %1396 = vmatpush1.bf16.msra.mxu0 %v6241_v3  ;;  %1912 = vmatpush1.bf16.msra.mxu1 %v6346_v40 }
  0x88   : > { %1397 = vmatprep.subr.bf16.mxu0 %v6250_v5  ;;  %1913 = vmatprep.subr.bf16.mxu1 %v6351_v42 }
  0x8b   : > { %1398 = vmatpush1.bf16.msra.mxu0 %v6253_v7  ;;  %1914 = vmatpush1.bf16.msra.mxu1 %v6360_v43 }
  0x8c   : > { %1399 = vmatprep.subr.bf16.mxu0 %v6264_v9  ;;  %1915 = vmatprep.subr.bf16.mxu1 %v6365_v44 }
  0x8f   : > { %1400 = vmatpush1.bf16.msra.mxu0 %v6267_v11  ;;  %1916 = vmatpush1.bf16.msra.mxu1 %v6370_v0 }
  0x90   : > { %1401 = vmatprep.subr.bf16.mxu0 %v6274_v13  ;;  %1917 = vmatprep.subr.bf16.mxu1 %v6375_v45 }
  0x93   : > { %1402 = vmatpush1.bf16.msra.mxu0 %v6277_v15  ;;  %1918 = vmatpush1.bf16.msra.mxu1 %v6380_v46 }
  0x94   : > { %1403 = vmatprep.subr.bf16.mxu0 %v6284_v17  ;;  %1919 = vmatprep.subr.bf16.mxu1 %v6385_v47 }
  0x97   : > { %1404 = vmatpush1.bf16.msra.mxu0 %v6287_v19  ;;  %1920 = vmatpush1.bf16.msra.mxu1 %v6390_v48 }
  0x98   : > { %1405 = vmatprep.subr.bf16.mxu0 %v6294_v21  ;;  %1921 = vmatprep.subr.bf16.mxu1 %v6395_v49 }
  0x9b   : > { %1406 = vmatpush1.bf16.msra.mxu0 %v6297_v23  ;;  %1922 = vmatpush1.bf16.msra.mxu1 %v6400_v50 }
  0x9c   : > { %1407 = vmatprep.subr.bf16.mxu0 %v6304_v25  ;;  %1923 = vmatprep.subr.bf16.mxu1 %v6405_v51 }
  0x9f   : > { %1408 = vmatpush1.bf16.msra.mxu0 %v6307_v27  ;;  %1924 = vmatpush1.bf16.msra.mxu1 %v6410_v52 }
  0xa0   : > { %1409 = vmatprep.subr.bf16.mxu0 %v6314_v29  ;;  %1925 = vmatprep.subr.bf16.mxu1 %v6415_v53 }
  0xa3   : > { %1410 = vmatpush1.bf16.msra.mxu0 %v6319_v31  ;;  %1926 = vmatpush1.bf16.msra.mxu1 %v6420_v54 }
  0xa4   : > { %1538 = vmatprep.subr.bf16.mxu0 %v6021_v2  ;;  %2054 = vmatprep.subr.bf16.mxu1 %v6219_v60  ;;  %v6467_v2 = vld [vmem:[%s6015_s26 + $0x2d4] ss:$8 sps:$4 sm:$0xff]  }
  0xa5   : > { %v6604_v60 = vld [vmem:[%s6015_s26 + $0x394] ss:$8 sps:$4 sm:$0xff]  }
  0xa6   : > { %1426 = vmatmul.mubr.bf16.vlgmr.msra.gmra.mrb[4].mxu0 %v6163_v38  ;;  %1942 = vmatmul.mubr.bf16.vlgmr.msra.gmra.mrb[4].mxu1 %v6163_v38  ;;  %v6563_v38 = vld [vmem:[%s6015_s26 + $0x364] ss:$8 sps:$4 sm:$0xff]  }
  0xa7   : > { %1539 = vmatpush1.bf16.msra.mxu0 %v6028_v4  ;;  %2055 = vmatpush1.bf16.msra.mxu1 %v6227_v62  ;;  %v6472_v4 = vld [vmem:[%s6015_s26 + $0x2d0] ss:$8 sps:$4 sm:$0xff]   ;;  %v6614_v62 = vld [vmem:[%s6015_s26 + $0x3a4] ss:$8 sps:$4 sm:$0xff]  }
  0xa8   : > { %1540 = vmatprep.subr.bf16.mxu0 %v6037_v6  ;;  %2056 = vmatprep.subr.bf16.mxu1 %v6233_v63  ;;  %v6477_v6 = vld [vmem:[%s6015_s26 + $0x2e4] ss:$8 sps:$4 sm:$0xff]   ;;  %v6619_v63 = vld [vmem:[%s6015_s26 + $0x3a0] ss:$8 sps:$4 sm:$0xff]  }
  0xa9   : > { %4801 = vmatprep.mubr.msk.bf16.mxu0 %vm347_vm0, %v6173_v41  ;;  %4928 = vmatprep.mubr.msk.bf16.mxu1 %vm347_vm0, %v6173_v41  ;;  %v6568_v41 = vld [vmem:[%s6015_s26 + $0x360] ss:$8 sps:$4 sm:$0xff]  }
  0xab   : > { %1541 = vmatpush1.bf16.msra.mxu0 %v6044_v8  ;;  %2057 = vmatpush1.bf16.msra.mxu1 %v6241_v3  ;;  %v6484_v8 = vld [vmem:[%s6015_s26 + $0x2e0] ss:$8 sps:$4 sm:$0xff]   ;;  %v6629_v3 = vld [vmem:[%s6015_s26 + $0x3b0] ss:$8 sps:$4 sm:$0xff]  }
  0xac   : > { %1542 = vmatprep.subr.bf16.mxu0 %v6051_v10  ;;  %2058 = vmatprep.subr.bf16.mxu1 %v6250_v5  ;;  %v6489_v10 = vld [vmem:[%s6015_s26 + $0x2f4] ss:$8 sps:$4 sm:$0xff]   ;;  %v6634_v5 = vld [vmem:[%s6015_s26 + $0x3c4] ss:$8 sps:$4 sm:$0xff]  }
  0xaf   : > { %1543 = vmatpush1.bf16.msra.mxu0 %v6057_v12  ;;  %2059 = vmatpush1.bf16.msra.mxu1 %v6253_v7  ;;  %v6498_v12 = vld [vmem:[%s6015_s26 + $0x2f0] ss:$8 sps:$4 sm:$0xff]   ;;  %v6639_v7 = vld [vmem:[%s6015_s26 + $0x3c0] ss:$8 sps:$4 sm:$0xff]  }
  0xb0   : > { %1544 = vmatprep.subr.bf16.mxu0 %v6067_v14  ;;  %2060 = vmatprep.subr.bf16.mxu1 %v6264_v9  ;;  %v6503_v14 = vld [vmem:[%s6015_s26 + $0x304] ss:$8 sps:$4 sm:$0xff]   ;;  %v6644_v9 = vld [vmem:[%s6015_s26 + $0x3d4] ss:$8 sps:$4 sm:$0xff]  }
  0xb3   : > { %1545 = vmatpush1.bf16.msra.mxu0 %v6075_v16  ;;  %2061 = vmatpush1.bf16.msra.mxu1 %v6267_v11  ;;  %v6508_v16 = vld [vmem:[%s6015_s26 + $0x300] ss:$8 sps:$4 sm:$0xff]   ;;  %v6649_v11 = vld [vmem:[%s6015_s26 + $0x3d0] ss:$8 sps:$4 sm:$0xff]  }
  0xb4   : > { %1546 = vmatprep.subr.bf16.mxu0 %v6083_v18  ;;  %2062 = vmatprep.subr.bf16.mxu1 %v6274_v13  ;;  %v6513_v18 = vld [vmem:[%s6015_s26 + $0x314] ss:$8 sps:$4 sm:$0xff]   ;;  %v6654_v13 = vld [vmem:[%s6015_s26 + $0x3e4] ss:$8 sps:$4 sm:$0xff]  }
  0xb7   : > { %1547 = vmatpush1.bf16.msra.mxu0 %v6089_v20  ;;  %2063 = vmatpush1.bf16.msra.mxu1 %v6277_v15  ;;  %v6518_v20 = vld [vmem:[%s6015_s26 + $0x310] ss:$8 sps:$4 sm:$0xff]   ;;  %v6659_v15 = vld [vmem:[%s6015_s26 + $0x3e0] ss:$8 sps:$4 sm:$0xff]  }
  0xb8   : > { %1548 = vmatprep.subr.bf16.mxu0 %v6099_v22  ;;  %2064 = vmatprep.subr.bf16.mxu1 %v6284_v17  ;;  %v6523_v22 = vld [vmem:[%s6015_s26 + $0x324] ss:$8 sps:$4 sm:$0xff]   ;;  %v6666_v17 = vld [vmem:[%s7101_s1 + $0x10] ss:$8 sps:$4 sm:$0xff]  }
  0xbb   : > { %1549 = vmatpush1.bf16.msra.mxu0 %v6107_v24  ;;  %2065 = vmatpush1.bf16.msra.mxu1 %v6287_v19  ;;  %v6528_v24 = vld [vmem:[%s6015_s26 + $0x320] ss:$8 sps:$4 sm:$0xff]   ;;  %v6675_v19 = vld [vmem:[%s7101_s1 + $0x4] ss:$8 sps:$4 sm:$0xff]  }
  0xbc   : > { %1550 = vmatprep.subr.bf16.mxu0 %v6115_v26  ;;  %2066 = vmatprep.subr.bf16.mxu1 %v6294_v21  ;;  %v6533_v26 = vld [vmem:[%s6015_s26 + $0x334] ss:$8 sps:$4 sm:$0xff]  }
  0xbd   : > { %v6716_v21 = vld [vmem:[%s6015_s26 + $0x3f4] ss:$8 sps:$4 sm:$0xff]  }
  0xbf   : > { %1551 = vmatpush1.bf16.msra.mxu0 %v6121_v28  ;;  %2067 = vmatpush1.bf16.msra.mxu1 %v6297_v23  ;;  %v6538_v28 = vld [vmem:[%s6015_s26 + $0x330] ss:$8 sps:$4 sm:$0xff]   ;;  %v6721_v23 = vld [vmem:[%s7101_s1] ss:$8 sps:$4 sm:$0xff]  }
  0xc0   : > { %1552 = vmatprep.subr.bf16.mxu0 %v6131_v30  ;;  %2068 = vmatprep.subr.bf16.mxu1 %v6304_v25  ;;  %v6543_v30 = vld [vmem:[%s6015_s26 + $0x344] ss:$8 sps:$4 sm:$0xff]   ;;  %v6726_v25 = vld [vmem:[%s6015_s26 + $0x3f0] ss:$8 sps:$4 sm:$0xff]  }
  0xc3   : > { %1553 = vmatpush1.bf16.msra.mxu0 %v6137_v32  ;;  %2069 = vmatpush1.bf16.msra.mxu1 %v6307_v27  ;;  %v6548_v32 = vld [vmem:[%s6015_s26 + $0x340] ss:$8 sps:$4 sm:$0xff]   ;;  %v6731_v27 = vld [vmem:[%s6015_s26 + $0x404] ss:$8 sps:$4 sm:$0xff]  }
  0xc4   : > { %1554 = vmatprep.subr.bf16.mxu0 %v6147_v34  ;;  %2070 = vmatprep.subr.bf16.mxu1 %v6314_v29  ;;  %v6553_v34 = vld [vmem:[%s6015_s26 + $0x354] ss:$8 sps:$4 sm:$0xff]   ;;  %v6736_v29 = vld [vmem:[%s7101_s1 + $0x24] ss:$8 sps:$4 sm:$0xff]  }
  0xc7   : > { %1555 = vmatpush1.bf16.msra.mxu0 %v6155_v36  ;;  %2071 = vmatpush1.bf16.msra.mxu1 %v6319_v31  ;;  %v6558_v36 = vld [vmem:[%s6015_s26 + $0x350] ss:$8 sps:$4 sm:$0xff]   ;;  %v6743_v31 = vld [vmem:[%s6015_s26 + $0x400] ss:$8 sps:$4 sm:$0xff]  }
  0xc8   : > { %1707 = vmatprep.subr.bf16.mxu0 %v6324_v33  ;;  %2223 = vmatprep.subr.bf16.mxu1 %v6467_v2 }
  0xca   : > { %1571 = vmatmul.mubr.bf16.vlgmr.msra.gmra.mrb[4].mxu0 %v6224_v61  ;;  %2087 = vmatmul.mubr.bf16.vlgmr.msra.gmra.mrb[4].mxu1 %v6224_v61  ;;  %v6609_v61 = vld [vmem:[%s6015_s26 + $0x390] ss:$8 sps:$4 sm:$0xff]  }
  0xcb   : > { %1708 = vmatpush1.bf16.msra.mxu0 %v6334_v37  ;;  %2224 = vmatpush1.bf16.msra.mxu1 %v6472_v4 }
  0xcc   : > { %1709 = vmatprep.subr.bf16.mxu0 %v6339_v39  ;;  %2225 = vmatprep.subr.bf16.mxu1 %v6477_v6 }
  0xcd   : > { %4844 = vmatprep.mubr.msk.bf16.mxu0 %vm347_vm0, %v6238_v1  ;;  %4971 = vmatprep.mubr.msk.bf16.mxu1 %vm347_vm0, %v6238_v1  ;;  %v6624_v1 = vld [vmem:[%s6015_s26 + $0x3b4] ss:$8 sps:$4 sm:$0xff]  }
  0xcf   : > { %1710 = vmatpush1.bf16.msra.mxu0 %v6346_v40  ;;  %2226 = vmatpush1.bf16.msra.mxu1 %v6484_v8 }
  0xd0   : > { %1711 = vmatprep.subr.bf16.mxu0 %v6351_v42  ;;  %2227 = vmatprep.subr.bf16.mxu1 %v6489_v10 }
  0xd3   : > { %1712 = vmatpush1.bf16.msra.mxu0 %v6360_v43  ;;  %2228 = vmatpush1.bf16.msra.mxu1 %v6498_v12 }
  0xd4   : > { %1713 = vmatprep.subr.bf16.mxu0 %v6365_v44  ;;  %2229 = vmatprep.subr.bf16.mxu1 %v6503_v14 }
  0xd7   : > { %1714 = vmatpush1.bf16.msra.mxu0 %v6370_v0  ;;  %2230 = vmatpush1.bf16.msra.mxu1 %v6508_v16 }
  0xd8   : > { %1715 = vmatprep.subr.bf16.mxu0 %v6375_v45  ;;  %2231 = vmatprep.subr.bf16.mxu1 %v6513_v18 }
  0xdb   : > { %1716 = vmatpush1.bf16.msra.mxu0 %v6380_v46  ;;  %2232 = vmatpush1.bf16.msra.mxu1 %v6518_v20 }
  0xdc   : > { %1717 = vmatprep.subr.bf16.mxu0 %v6385_v47  ;;  %2233 = vmatprep.subr.bf16.mxu1 %v6523_v22 }
  0xdf   : > { %1718 = vmatpush1.bf16.msra.mxu0 %v6390_v48  ;;  %2234 = vmatpush1.bf16.msra.mxu1 %v6528_v24 }
  0xe0   : > { %1719 = vmatprep.subr.bf16.mxu0 %v6395_v49  ;;  %2235 = vmatprep.subr.bf16.mxu1 %v6533_v26 }
  0xe3   : > { %1720 = vmatpush1.bf16.msra.mxu0 %v6400_v50  ;;  %2236 = vmatpush1.bf16.msra.mxu1 %v6538_v28 }
  0xe4   : > { %1721 = vmatprep.subr.bf16.mxu0 %v6405_v51  ;;  %2237 = vmatprep.subr.bf16.mxu1 %v6543_v30 }
  0xe7   : > { %1722 = vmatpush1.bf16.msra.mxu0 %v6410_v52  ;;  %2238 = vmatpush1.bf16.msra.mxu1 %v6548_v32 }
  0xe8   : > { %1723 = vmatprep.subr.bf16.mxu0 %v6415_v53  ;;  %2239 = vmatprep.subr.bf16.mxu1 %v6553_v34 }
  0xeb   : > { %1724 = vmatpush1.bf16.msra.mxu0 %v6420_v54  ;;  %2240 = vmatpush1.bf16.msra.mxu1 %v6558_v36 }
  0xec   : > { %2425 = vmatprep.subr.bf16.mxu0 %v6467_v2  ;;  %2941 = vmatprep.subr.bf16.mxu1 %v6563_v38 }
  0xee   : > { %1740 = vmatmul.mubr.bf16.vlgmr.msra.gmra.mrb[4].mxu0 %v6329_v35  ;;  %2256 = vmatmul.mubr.bf16.vlgmr.msra.gmra.mrb[4].mxu1 %v6329_v35  ;;  %v6757_v35 = vld [vmem:[%s6015_s26 + $0x410] ss:$8 sps:$4 sm:$0xff]  }
  0xef   : > { %2426 = vmatpush1.bf16.msra.mxu0 %v6472_v4  ;;  %2942 = vmatpush1.bf16.msra.mxu1 %v6568_v41 }
  0xf0   : > { %2427 = vmatprep.subr.bf16.mxu0 %v6477_v6  ;;  %2943 = vmatprep.subr.bf16.mxu1 %v6573_v55 }
  0xf1   : > { %5034 = vmatprep.mubr.msk.bf16.mxu0 %vm347_vm0, %v6578_v56  ;;  %5161 = vmatprep.mubr.msk.bf16.mxu1 %vm347_vm0, %v6578_v56 }
  0xf3   : > { %2428 = vmatpush1.bf16.msra.mxu0 %v6484_v8  ;;  %2944 = vmatpush1.bf16.msra.mxu1 %v6585_v57 }
  0xf4   : > { %2429 = vmatprep.subr.bf16.mxu0 %v6489_v10  ;;  %2945 = vmatprep.subr.bf16.mxu1 %v6590_v58 }
  0xf7   : > { %2430 = vmatpush1.bf16.msra.mxu0 %v6498_v12  ;;  %2946 = vmatpush1.bf16.msra.mxu1 %v6599_v59 }
  0xf8   : > { %2431 = vmatprep.subr.bf16.mxu0 %v6503_v14  ;;  %2947 = vmatprep.subr.bf16.mxu1 %v6604_v60 }
  0xfb   : > { %2432 = vmatpush1.bf16.msra.mxu0 %v6508_v16  ;;  %2948 = vmatpush1.bf16.msra.mxu1 %v6609_v61 }
  0xfc   : > { %2433 = vmatprep.subr.bf16.mxu0 %v6513_v18  ;;  %2949 = vmatprep.subr.bf16.mxu1 %v6614_v62 }
  0xff   : > { %2434 = vmatpush1.bf16.msra.mxu0 %v6518_v20  ;;  %2950 = vmatpush1.bf16.msra.mxu1 %v6619_v63 }
 0x100   : > { %2435 = vmatprep.subr.bf16.mxu0 %v6523_v22  ;;  %2951 = vmatprep.subr.bf16.mxu1 %v6624_v1 }
 0x103   : > { %2436 = vmatpush1.bf16.msra.mxu0 %v6528_v24  ;;  %2952 = vmatpush1.bf16.msra.mxu1 %v6629_v3 }
 0x104   : > { %2437 = vmatprep.subr.bf16.mxu0 %v6533_v26  ;;  %2953 = vmatprep.subr.bf16.mxu1 %v6634_v5 }
 0x107   : > { %2438 = vmatpush1.bf16.msra.mxu0 %v6538_v28  ;;  %2954 = vmatpush1.bf16.msra.mxu1 %v6639_v7 }
 0x108   : > { %2439 = vmatprep.subr.bf16.mxu0 %v6543_v30  ;;  %2955 = vmatprep.subr.bf16.mxu1 %v6644_v9 }
 0x10b   : > { %2440 = vmatpush1.bf16.msra.mxu0 %v6548_v32  ;;  %2956 = vmatpush1.bf16.msra.mxu1 %v6649_v11 }
 0x10c   : > { %2441 = vmatprep.subr.bf16.mxu0 %v6553_v34  ;;  %2957 = vmatprep.subr.bf16.mxu1 %v6654_v13 }
 0x10f   : > { %2442 = vmatpush1.bf16.msra.mxu0 %v6558_v36  ;;  %2958 = vmatpush1.bf16.msra.mxu1 %v6659_v15 }
 0x110   : > { %2570 = vmatprep.subr.bf16.mxu0 %v6324_v33  ;;  %3086 = vmatprep.subr.bf16.mxu1 %v6467_v2  ;;  %v6748_v33 = vld [vmem:[%s6015_s26 + $0x414] ss:$8 sps:$4 sm:$0xff]  }
 0x112   : > { %2458 = vmatmul.mubr.bf16.vlgmr.msra.gmra.mrb[8].mxu0 %v6666_v17  ;;  %2974 = vmatmul.mubr.bf16.vlgmr.msra.gmra.mrb[8].mxu1 %v6666_v17 }
 0x113   : > { %2571 = vmatpush1.bf16.msra.mxu0 %v6334_v37  ;;  %3087 = vmatpush1.bf16.msra.mxu1 %v6472_v4  ;;  %v6762_v37 = vld [vmem:[%s6015_s26 + $0x424] ss:$8 sps:$4 sm:$0xff]  }
 0x114   : > { %2572 = vmatprep.subr.bf16.mxu0 %v6339_v39  ;;  %3088 = vmatprep.subr.bf16.mxu1 %v6477_v6  ;;  %v6767_v39 = vld [vmem:[%s6015_s26 + $0x420] ss:$8 sps:$4 sm:$0xff]  }
 0x115   : > { %5055 = vmatprep.mubr.msk.bf16.mxu0 %vm347_vm0, %v6675_v19  ;;  %5182 = vmatprep.mubr.msk.bf16.mxu1 %vm347_vm0, %v6675_v19 }
 0x117   : > { %2573 = vmatpush1.bf16.msra.mxu0 %v6346_v40  ;;  %3089 = vmatpush1.bf16.msra.mxu1 %v6484_v8  ;;  %v6772_v40 = vld [vmem:[%s6015_s26 + $0x434] ss:$8 sps:$4 sm:$0xff]  }
 0x118   : > { %2574 = vmatprep.subr.bf16.mxu0 %v6351_v42  ;;  %3090 = vmatprep.subr.bf16.mxu1 %v6489_v10  ;;  %v6777_v42 = vld [vmem:[%s6015_s26 + $0x430] ss:$8 sps:$4 sm:$0xff]   ;;  %v6835_v10 = vld [vmem:[%s7101_s1 + $0x20] ss:$8 sps:$4 sm:$0xff]  }
 0x11b   : > { %2575 = vmatpush1.bf16.msra.mxu0 %v6360_v43  ;;  %3091 = vmatpush1.bf16.msra.mxu1 %v6498_v12  ;;  %v6783_v43 = vld [vmem:[%s6015_s26 + $0x444] ss:$8 sps:$4 sm:$0xff]  }
 0x11c   : > { %2576 = vmatprep.subr.bf16.mxu0 %v6365_v44  ;;  %3092 = vmatprep.subr.bf16.mxu1 %v6503_v14  ;;  %v6788_v44 = vld [vmem:[%s6015_s26 + $0x440] ss:$8 sps:$4 sm:$0xff]  }
 0x11f   : > { %2577 = vmatpush1.bf16.msra.mxu0 %v6370_v0  ;;  %3093 = vmatpush1.bf16.msra.mxu1 %v6508_v16  ;;  %v6793_v0 = vld [vmem:[%s6015_s26 + $0x454] ss:$8 sps:$4 sm:$0xff]  }
 0x120   : > { %2578 = vmatprep.subr.bf16.mxu0 %v6375_v45  ;;  %3094 = vmatprep.subr.bf16.mxu1 %v6513_v18  ;;  %v6798_v45 = vld [vmem:[%s6015_s26 + $0x450] ss:$8 sps:$4 sm:$0xff]  }
 0x123   : > { %2579 = vmatpush1.bf16.msra.mxu0 %v6380_v46  ;;  %3095 = vmatpush1.bf16.msra.mxu1 %v6518_v20  ;;  %v6803_v46 = vld [vmem:[%s6015_s26 + $0x464] ss:$8 sps:$4 sm:$0xff]   ;;  %v6847_v20 = vld [vmem:[%s6015_s26 + $0x480] ss:$8 sps:$4 sm:$0xff]  }
 0x124   : > { %2580 = vmatprep.subr.bf16.mxu0 %v6385_v47  ;;  %3096 = vmatprep.subr.bf16.mxu1 %v6523_v22  ;;  %v6805_v47 = vpop.permute.xlu0 %715 }
 0x127   : > { %2581 = vmatpush1.bf16.msra.mxu0 %v6390_v48  ;;  %3097 = vmatpush1.bf16.msra.mxu1 %v6528_v24  ;;  %v6811_v48 = vld [vmem:[%s6015_s26 + $0x460] ss:$8 sps:$4 sm:$0xff]  }
 0x128   : > { %2582 = vmatprep.subr.bf16.mxu0 %v6395_v49  ;;  %3098 = vmatprep.subr.bf16.mxu1 %v6533_v26  ;;  %v6816_v49 = vld [vmem:[%s6015_s26 + $0x474] ss:$8 sps:$4 sm:$0xff]  }
 0x12b   : > { %2583 = vmatpush1.bf16.msra.mxu0 %v6400_v50  ;;  %3099 = vmatpush1.bf16.msra.mxu1 %v6538_v28  ;;  %v6821_v50 = vld [vmem:[%s6015_s26 + $0x470] ss:$8 sps:$4 sm:$0xff]  }
 0x12c   : > { %2584 = vmatprep.subr.bf16.mxu0 %v6405_v51  ;;  %3100 = vmatprep.subr.bf16.mxu1 %v6543_v30  ;;  %v6825_v51 = vpop.permute.xlu0 %720 }
 0x12f   : > { %2585 = vmatpush1.bf16.msra.mxu0 %v6410_v52  ;;  %3101 = vmatpush1.bf16.msra.mxu1 %v6548_v32  ;;  %v6828_v52 = vld [vmem:[%s6015_s26 + $0x484] ss:$8 sps:$4 sm:$0xff]  }
 0x130   : > { %2586 = vmatprep.subr.bf16.mxu0 %v6415_v53  ;;  %3102 = vmatprep.subr.bf16.mxu1 %v6553_v34  ;;  %v6854_v34 = vld [vmem:[%s6015_s26 + $0x494] ss:$8 sps:$4 sm:$0xff]  }
 0x133   : > { %2587 = vmatpush1.bf16.msra.mxu0 %v6420_v54  ;;  %3103 = vmatpush1.bf16.msra.mxu1 %v6558_v36 }
 0x134   : > { %2739 = vmatprep.subr.bf16.mxu0 %v6563_v38  ;;  %3255 = vmatprep.subr.bf16.mxu1 %v6716_v21 }
 0x136   : > { %2603 = vmatmul.mubr.bf16.vlgmr.msra.gmra.mrb[8].mxu0 %v6721_v23  ;;  %3119 = vmatmul.mubr.bf16.vlgmr.msra.gmra.mrb[8].mxu1 %v6721_v23 }
 0x137   : > { %2740 = vmatpush1.bf16.msra.mxu0 %v6568_v41  ;;  %3256 = vmatpush1.bf16.msra.mxu1 %v6726_v25 }
 0x138   : > { %2741 = vmatprep.subr.bf16.mxu0 %v6573_v55  ;;  %3257 = vmatprep.subr.bf16.mxu1 %v6731_v27 }
 0x139   : > { %5098 = vmatprep.mubr.msk.bf16.mxu0 %vm347_vm0, %v6736_v29  ;;  %5225 = vmatprep.mubr.msk.bf16.mxu1 %vm347_vm0, %v6736_v29 }
 0x13b   : > { %2742 = vmatpush1.bf16.msra.mxu0 %v6585_v57  ;;  %3258 = vmatpush1.bf16.msra.mxu1 %v6743_v31 }
 0x13c   : > { %2743 = vmatprep.subr.bf16.mxu0 %v6590_v58  ;;  %3259 = vmatprep.subr.bf16.mxu1 %v6748_v33 }
 0x13f   : > { %2744 = vmatpush1.bf16.msra.mxu0 %v6599_v59  ;;  %3260 = vmatpush1.bf16.msra.mxu1 %v6757_v35 }
 0x140   : > { %2745 = vmatprep.subr.bf16.mxu0 %v6604_v60  ;;  %3261 = vmatprep.subr.bf16.mxu1 %v6762_v37 }
 0x143   : > { %2746 = vmatpush1.bf16.msra.mxu0 %v6609_v61  ;;  %3262 = vmatpush1.bf16.msra.mxu1 %v6767_v39 }
 0x144   : > { %2747 = vmatprep.subr.bf16.mxu0 %v6614_v62  ;;  %3263 = vmatprep.subr.bf16.mxu1 %v6772_v40 }
 0x147   : > { %2748 = vmatpush1.bf16.msra.mxu0 %v6619_v63  ;;  %3264 = vmatpush1.bf16.msra.mxu1 %v6777_v42  ;;  %v6867_v63 = vld [vmem:[%s6015_s26 + $0x490] ss:$8 sps:$4 sm:$0xff]  }
 0x148   : > { %2749 = vmatprep.subr.bf16.mxu0 %v6624_v1  ;;  %3265 = vmatprep.subr.bf16.mxu1 %v6783_v43  ;;  %v6874_v1 = vld [vmem:[%s6015_s26 + $0x4a4] ss:$8 sps:$4 sm:$0xff]  }
 0x14b   : > { %2750 = vmatpush1.bf16.msra.mxu0 %v6629_v3  ;;  %3266 = vmatpush1.bf16.msra.mxu1 %v6788_v44  ;;  %v6885_v3 = vld [vmem:[%s6015_s26 + $0x4a0] ss:$8 sps:$4 sm:$0xff]  }
 0x14c   : > { %2751 = vmatprep.subr.bf16.mxu0 %v6634_v5  ;;  %3267 = vmatprep.subr.bf16.mxu1 %v6793_v0  ;;  %v6890_v5 = vld [vmem:[%s6015_s26 + $0x4b4] ss:$8 sps:$4 sm:$0xff]  }
 0x14f   : > { %2752 = vmatpush1.bf16.msra.mxu0 %v6639_v7  ;;  %3268 = vmatpush1.bf16.msra.mxu1 %v6798_v45  ;;  %v6900_v7 = vld [vmem:[%s6015_s26 + $0x4c4] ss:$8 sps:$4 sm:$0xff]  }
 0x150   : > { %2753 = vmatprep.subr.bf16.mxu0 %v6644_v9  ;;  %3269 = vmatprep.subr.bf16.mxu1 %v6803_v46  ;;  %v6905_v9 = vld [vmem:[%s6015_s26 + $0x4c0] ss:$8 sps:$4 sm:$0xff]  }
 0x153   : > { %2754 = vmatpush1.bf16.msra.mxu0 %v6649_v11  ;;  %3270 = vmatpush1.bf16.msra.mxu1 %v6811_v48  ;;  %v6910_v11 = vld [vmem:[%s6015_s26 + $0x4d4] ss:$8 sps:$4 sm:$0xff]  }
 0x154   : > { %2755 = vmatprep.subr.bf16.mxu0 %v6654_v13  ;;  %3271 = vmatprep.subr.bf16.mxu1 %v6816_v49  ;;  %v6915_v13 = vld [vmem:[%s6015_s26 + $0x4d0] ss:$8 sps:$4 sm:$0xff]  }
 0x155   : > { %v700_v53 = vpop.f32.mrb[0].mxu0  ;;  %v1225_v54 = vpop.f32.mrb[0].mxu1 }
 0x156   : > { %v723_v2 = vadd.f32 %v6805_v47, %v700_v53  ;;  %v1238_v4 = vadd.f32 %v1225_v54, %v6805_v47  ;;  %v702_v6 = vpop.f32.mrb[1].mxu0  ;;  %v1227_v8 = vpop.f32.mrb[1].mxu1  ;;  %v6925_v53 = vld [vmem:[%s6015_s26 + $0x4e0] ss:$8 sps:$4 sm:$0xff]   ;;  %v6930_v54 = vld [vmem:[%s6015_s26 + $0x4f4] ss:$8 sps:$4 sm:$0xff]  }
 0x157   : > { %v724_v12 = vadd.f32 %v6805_v47, %v702_v6  ;;  %v1239_v14 = vadd.f32 %v1227_v8, %v6805_v47  ;;  %v704_v16 = vpop.f32.mrb[2].mxu0  ;;  %v1229_v18 = vpop.f32.mrb[2].mxu1  ;;  %2756 = vmatpush1.bf16.msra.mxu0 %v6659_v15  ;;  %3272 = vmatpush1.bf16.msra.mxu1 %v6821_v50  ;;  %v6920_v15 = vld [vmem:[%s6015_s26 + $0x4e4] ss:$8 sps:$4 sm:$0xff]   ;;  %v6945_v6 = vld [vmem:[%s6015_s26 + $0x500] ss:$8 sps:$4 sm:$0xff]  }
 0x158   : > { %v727_v22 = vmax.f32 %v723_v2, 0.0  ;;  %v1242_v24 = vmax.f32 %v1238_v4, 0.0  ;;  %v725_v26 = vadd.f32 %v6825_v51, %v704_v16  ;;  %v1240_v28 = vadd.f32 %v1229_v18, %v6825_v51  ;;  %v706_v30 = vpop.f32.mrb[3].mxu0  ;;  %v1231_v32 = vpop.f32.mrb[3].mxu1  ;;  %3457 = vmatprep.subr.bf16.mxu0 %v6716_v21  ;;  %3973 = vmatprep.subr.bf16.mxu1 %v6828_v52  ;;  %v6935_v2 = vld [vmem:[%s6015_s26 + $0x4f0] ss:$8 sps:$4 sm:$0xff]  }
 0x159   : > { %v728_v36 = vmax.f32 %v724_v12, 0.0  ;;  %v1243_v55 = vmax.f32 %v1239_v14, 0.0  ;;  %v726_v57 = vadd.f32 %v6825_v51, %v706_v30  ;;  %v1241_v58 = vadd.f32 %v1231_v32, %v6825_v51  ;;  %v6940_v4 = vld [vmem:[%s6015_s26 + $0x504] ss:$8 sps:$4 sm:$0xff]   ;;  %v5857_v8 = vld [vmem:[%s6015_s26 + $0x374] ss:$8 sps:$4 sm:$0xff]  }
 0x15a   : > { %731 = vst [vmem:[%s6840_s19] sm:$0xff] %v727_v22  ;;  %4718 = vst [vmem:[%s6840_s19 + $0x20] sm:$0xff] %v1242_v24  ;;  %v729_v59 = vmax.f32 %v725_v26, 0.0  ;;  %v1244_v60 = vmax.f32 %v1240_v28, 0.0  ;;  %2772 = vmatmul.mubr.bf16.vlgmr.msra.gmra.mrb[8].mxu0 %v6835_v10  ;;  %3288 = vmatmul.mubr.bf16.vlgmr.msra.gmra.mrb[8].mxu1 %v6835_v10  ;;  %v5855_v12 = vld [vmem:[%s6015_s26 + $0x370] ss:$8 sps:$4 sm:$0xff]  }
 0x15b   : > { %732 = vst [vmem:[%s6840_s19 + $0x8] sm:$0xff] %v728_v36  ;;  %4719 = vst [vmem:[%s6840_s19 + $0x28] sm:$0xff] %v1243_v55  ;;  %v730_v61 = vmax.f32 %v726_v57, 0.0  ;;  %v1245_v62 = vmax.f32 %v1241_v58, 0.0  ;;  %3458 = vmatpush1.bf16.msra.mxu0 %v6726_v25  ;;  %3974 = vmatpush1.bf16.msra.mxu1 %v6847_v20  ;;  %v5860_v14 = vld [vmem:[%s6015_s26 + $0x384] ss:$8 sps:$4 sm:$0xff]  }
 0x15c   : > { %733 = vst [vmem:[%s6840_s19 + $0x10] sm:$0xff] %v729_v59  ;;  %4720 = vst [vmem:[%s6840_s19 + $0x30] sm:$0xff] %v1244_v60  ;;  %3459 = vmatprep.subr.bf16.mxu0 %v6731_v27  ;;  %3975 = vmatprep.subr.bf16.mxu1 %v6854_v34  ;;  %v5899_v16 = vld [vmem:[%s6015_s26 + $0x574] ss:$8 sps:$4 sm:$0xff]   ;;  %v5897_v18 = vld [vmem:[%s6015_s26 + $0x570] ss:$8 sps:$4 sm:$0xff]  }
 0x15d   : > { %734 = vst [vmem:[%s6840_s19 + $0x18] sm:$0xff] %v730_v61  ;;  %4721 = vst [vmem:[%s6840_s19 + $0x38] sm:$0xff] %v1245_v62  ;;  %5288 = vmatprep.mubr.msk.bf16.mxu0 %vm347_vm0, %v6578_v56  ;;  %5415 = vmatprep.mubr.msk.bf16.mxu1 %vm347_vm0, %v6578_v56  ;;  %v6895_v56 = vld [vmem:[%s6015_s26 + $0x4b0] ss:$8 sps:$4 sm:$0xff]   ;;  %v5900_v22 = vld [vmem:[%s6015_s26 + $0x580] ss:$8 sps:$4 sm:$0xff]  }
 0x15e   : > { %v5905_v24 = vld [vmem:[%s6015_s26 + $0x594] ss:$8 sps:$4 sm:$0xff]   ;;  %v5903_v26 = vld [vmem:[%s6015_s26 + $0x590] ss:$8 sps:$4 sm:$0xff]  }
 0x15f   : > { %3460 = vmatpush1.bf16.msra.mxu0 %v6743_v31  ;;  %3976 = vmatpush1.bf16.msra.mxu1 %v6867_v63 }
 0x160   : > { %3461 = vmatprep.subr.bf16.mxu0 %v6748_v33  ;;  %3977 = vmatprep.subr.bf16.mxu1 %v6874_v1 }
 0x163   : > { %3462 = vmatpush1.bf16.msra.mxu0 %v6757_v35  ;;  %3978 = vmatpush1.bf16.msra.mxu1 %v6885_v3 }
 0x164   : > { %3463 = vmatprep.subr.bf16.mxu0 %v6762_v37  ;;  %3979 = vmatprep.subr.bf16.mxu1 %v6890_v5 }
 0x167   : > { %3464 = vmatpush1.bf16.msra.mxu0 %v6767_v39  ;;  %3980 = vmatpush1.bf16.msra.mxu1 %v6895_v56 }
 0x168   : > { %3465 = vmatprep.subr.bf16.mxu0 %v6772_v40  ;;  %3981 = vmatprep.subr.bf16.mxu1 %v6900_v7 }
 0x16b   : > { %3466 = vmatpush1.bf16.msra.mxu0 %v6777_v42  ;;  %3982 = vmatpush1.bf16.msra.mxu1 %v6905_v9 }
 0x16c   : > { %3467 = vmatprep.subr.bf16.mxu0 %v6783_v43  ;;  %3983 = vmatprep.subr.bf16.mxu1 %v6910_v11 }
 0x16f   : > { %3468 = vmatpush1.bf16.msra.mxu0 %v6788_v44  ;;  %3984 = vmatpush1.bf16.msra.mxu1 %v6915_v13 }
 0x170   : > { %3469 = vmatprep.subr.bf16.mxu0 %v6793_v0  ;;  %3985 = vmatprep.subr.bf16.mxu1 %v6920_v15 }
 0x173   : > { %3470 = vmatpush1.bf16.msra.mxu0 %v6798_v45  ;;  %3986 = vmatpush1.bf16.msra.mxu1 %v6925_v53 }
 0x174   : > { %3471 = vmatprep.subr.bf16.mxu0 %v6803_v46  ;;  %3987 = vmatprep.subr.bf16.mxu1 %v6930_v54 }
 0x177   : > { %3472 = vmatpush1.bf16.msra.mxu0 %v6811_v48  ;;  %3988 = vmatpush1.bf16.msra.mxu1 %v6935_v2 }
 0x178   : > { %3473 = vmatprep.subr.bf16.mxu0 %v6816_v49  ;;  %3989 = vmatprep.subr.bf16.mxu1 %v6940_v4 }
 0x17b   : > { %3474 = vmatpush1.bf16.msra.mxu0 %v6821_v50  ;;  %3990 = vmatpush1.bf16.msra.mxu1 %v6945_v6 }
 0x17c   : > { %3602 = vmatprep.subr.bf16.mxu0 %v6563_v38  ;;  %4118 = vmatprep.subr.bf16.mxu1 %v6716_v21  ;;  %v5858_v38 = vld [vmem:[%s6015_s26 + $0x380] ss:$8 sps:$4 sm:$0xff]  }
 0x17d   : > { %v5864_v21 = vld [vmem:[%s6015_s26 + $0x3a0] ss:$8 sps:$4 sm:$0xff]  }
 0x17e   : > { %3490 = vmatmul.mubr.bf16.vlgmr.msra.gmra.mrb[12].mxu0 %v6666_v17  ;;  %4006 = vmatmul.mubr.bf16.vlgmr.msra.gmra.mrb[12].mxu1 %v6666_v17  ;;  %v5861_v17 = vld [vmem:[%s6015_s26 + $0x390] ss:$8 sps:$4 sm:$0xff]  }
 0x17f   : > { %3603 = vmatpush1.bf16.msra.mxu0 %v6568_v41  ;;  %4119 = vmatpush1.bf16.msra.mxu1 %v6726_v25  ;;  %v5863_v41 = vld [vmem:[%s6015_s26 + $0x394] ss:$8 sps:$4 sm:$0xff]  }
 0x180   : > { %3604 = vmatprep.subr.bf16.mxu0 %v5857_v8  ;;  %4120 = vmatprep.subr.bf16.mxu1 %v6731_v27  ;;  %v5869_v25 = vld [vmem:[%s6015_s26 + $0x3b4] ss:$8 sps:$4 sm:$0xff]   ;;  %v5867_v27 = vld [vmem:[%s6015_s26 + $0x3b0] ss:$8 sps:$4 sm:$0xff]  }
 0x181   : > { %5309 = vmatprep.mubr.msk.bf16.mxu0 %vm347_vm0, %v6675_v19  ;;  %5436 = vmatprep.mubr.msk.bf16.mxu1 %vm347_vm0, %v6675_v19  ;;  %v5866_v19 = vld [vmem:[%s6015_s26 + $0x3a4] ss:$8 sps:$4 sm:$0xff]  }
 0x183   : > { %3605 = vmatpush1.bf16.msra.mxu0 %v5855_v12  ;;  %4121 = vmatpush1.bf16.msra.mxu1 %v6743_v31  ;;  %v5872_v31 = vld [vmem:[%s6015_s26 + $0x3c4] ss:$8 sps:$4 sm:$0xff]  }
 0x184   : > { %3606 = vmatprep.subr.bf16.mxu0 %v5860_v14  ;;  %4122 = vmatprep.subr.bf16.mxu1 %v6748_v33  ;;  %v5870_v33 = vld [vmem:[%s6015_s26 + $0x3c0] ss:$8 sps:$4 sm:$0xff]  }
 0x187   : > { %3607 = vmatpush1.bf16.msra.mxu0 %v5858_v38  ;;  %4123 = vmatpush1.bf16.msra.mxu1 %v6757_v35  ;;  %v5875_v35 = vld [vmem:[%s6015_s26 + $0x3d4] ss:$8 sps:$4 sm:$0xff]  }
 0x188   : > { %3608 = vmatprep.subr.bf16.mxu0 %v5863_v41  ;;  %4124 = vmatprep.subr.bf16.mxu1 %v6762_v37  ;;  %v5873_v37 = vld [vmem:[%s6015_s26 + $0x3d0] ss:$8 sps:$4 sm:$0xff]  }
 0x18b   : > { %3609 = vmatpush1.bf16.msra.mxu0 %v5861_v17  ;;  %4125 = vmatpush1.bf16.msra.mxu1 %v6767_v39  ;;  %v5878_v39 = vld [vmem:[%s6015_s26 + $0x3e4] ss:$8 sps:$4 sm:$0xff]  }
 0x18c   : > { %3610 = vmatprep.subr.bf16.mxu0 %v5866_v19  ;;  %4126 = vmatprep.subr.bf16.mxu1 %v6772_v40  ;;  %v5876_v40 = vld [vmem:[%s6015_s26 + $0x3e0] ss:$8 sps:$4 sm:$0xff]  }
 0x18f   : > { %3611 = vmatpush1.bf16.msra.mxu0 %v5864_v21  ;;  %4127 = vmatpush1.bf16.msra.mxu1 %v6777_v42  ;;  %v5881_v42 = vld [vmem:[%s6015_s26 + $0x514] ss:$8 sps:$4 sm:$0xff]  }
 0x190   : > { %3612 = vmatprep.subr.bf16.mxu0 %v5869_v25  ;;  %4128 = vmatprep.subr.bf16.mxu1 %v6783_v43  ;;  %v5879_v43 = vld [vmem:[%s6015_s26 + $0x510] ss:$8 sps:$4 sm:$0xff]  }
 0x193   : > { %3613 = vmatpush1.bf16.msra.mxu0 %v5867_v27  ;;  %4129 = vmatpush1.bf16.msra.mxu1 %v6788_v44  ;;  %v5884_v44 = vld [vmem:[%s6015_s26 + $0x524] ss:$8 sps:$4 sm:$0xff]  }
 0x194   : > { %3614 = vmatprep.subr.bf16.mxu0 %v5872_v31  ;;  %4130 = vmatprep.subr.bf16.mxu1 %v6793_v0  ;;  %v5882_v0 = vld [vmem:[%s6015_s26 + $0x520] ss:$8 sps:$4 sm:$0xff]  }
 0x197   : > { %3615 = vmatpush1.bf16.msra.mxu0 %v5870_v33  ;;  %4131 = vmatpush1.bf16.msra.mxu1 %v6798_v45  ;;  %v5887_v45 = vld [vmem:[%s6015_s26 + $0x534] ss:$8 sps:$4 sm:$0xff]  }
 0x198   : > { %3616 = vmatprep.subr.bf16.mxu0 %v5875_v35  ;;  %4132 = vmatprep.subr.bf16.mxu1 %v6803_v46  ;;  %v5890_v46 = vld [vmem:[%s6015_s26 + $0x544] ss:$8 sps:$4 sm:$0xff]  }
 0x19b   : > { %3617 = vmatpush1.bf16.msra.mxu0 %v5873_v37  ;;  %4133 = vmatpush1.bf16.msra.mxu1 %v6811_v48  ;;  %v5888_v48 = vld [vmem:[%s6015_s26 + $0x540] ss:$8 sps:$4 sm:$0xff]  }
 0x19c   : > { %3618 = vmatprep.subr.bf16.mxu0 %v5878_v39  ;;  %4134 = vmatprep.subr.bf16.mxu1 %v6816_v49  ;;  %v5891_v49 = vld [vmem:[%s6015_s26 + $0x550] ss:$8 sps:$4 sm:$0xff]  }
 0x19f   : > { %3619 = vmatpush1.bf16.msra.mxu0 %v5876_v40  ;;  %4135 = vmatpush1.bf16.msra.mxu1 %v6821_v50  ;;  %v5896_v50 = vld [vmem:[%s6015_s26 + $0x564] ss:$8 sps:$4 sm:$0xff]  }
 0x1a0   : > { %3771 = vmatprep.subr.bf16.mxu0 %v6828_v52  ;;  %4287 = vmatprep.subr.bf16.mxu1 %v5881_v42  ;;  %v5894_v52 = vld [vmem:[%s6015_s26 + $0x560] ss:$8 sps:$4 sm:$0xff]  }
 0x1a2   : > { %3635 = vmatmul.mubr.bf16.vlgmr.msra.gmra.mrb[12].mxu0 %v6721_v23  ;;  %4151 = vmatmul.mubr.bf16.vlgmr.msra.gmra.mrb[12].mxu1 %v6721_v23  ;;  %v5885_v23 = vld [vmem:[%s6015_s26 + $0x530] ss:$8 sps:$4 sm:$0xff]  }
 0x1a3   : > { %3772 = vmatpush1.bf16.msra.mxu0 %v6847_v20  ;;  %4288 = vmatpush1.bf16.msra.mxu1 %v5879_v43  ;;  %v5902_v20 = vld [vmem:[%s6015_s26 + $0x584] ss:$8 sps:$4 sm:$0xff]  }
 0x1a4   : > { %3773 = vmatprep.subr.bf16.mxu0 %v6854_v34  ;;  %4289 = vmatprep.subr.bf16.mxu1 %v5884_v44 }
 0x1a5   : > { %5352 = vmatprep.mubr.msk.bf16.mxu0 %vm347_vm0, %v6736_v29  ;;  %5479 = vmatprep.mubr.msk.bf16.mxu1 %vm347_vm0, %v6736_v29  ;;  %v5893_v29 = vld [vmem:[%s6015_s26 + $0x554] ss:$8 sps:$4 sm:$0xff]  }
 0x1a7   : > { %3774 = vmatpush1.bf16.msra.mxu0 %v6867_v63  ;;  %4290 = vmatpush1.bf16.msra.mxu1 %v5882_v0 }
 0x1a8   : > { %3775 = vmatprep.subr.bf16.mxu0 %v6874_v1  ;;  %4291 = vmatprep.subr.bf16.mxu1 %v5887_v45 }
 0x1ab   : > { %3776 = vmatpush1.bf16.msra.mxu0 %v6885_v3  ;;  %4292 = vmatpush1.bf16.msra.mxu1 %v5885_v23 }
 0x1ac   : > { %3777 = vmatprep.subr.bf16.mxu0 %v6890_v5  ;;  %4293 = vmatprep.subr.bf16.mxu1 %v5890_v46 }
 0x1af   : > { %3778 = vmatpush1.bf16.msra.mxu0 %v6895_v56  ;;  %4294 = vmatpush1.bf16.msra.mxu1 %v5888_v48 }
 0x1b0   : > { %3779 = vmatprep.subr.bf16.mxu0 %v6900_v7  ;;  %4295 = vmatprep.subr.bf16.mxu1 %v5893_v29 }
 0x1b3   : > { %3780 = vmatpush1.bf16.msra.mxu0 %v6905_v9  ;;  %4296 = vmatpush1.bf16.msra.mxu1 %v5891_v49 }
 0x1b4   : > { %3781 = vmatprep.subr.bf16.mxu0 %v6910_v11  ;;  %4297 = vmatprep.subr.bf16.mxu1 %v5896_v50 }
 0x1b7   : > { %3782 = vmatpush1.bf16.msra.mxu0 %v6915_v13  ;;  %4298 = vmatpush1.bf16.msra.mxu1 %v5894_v52 }
 0x1b8   : > { %3783 = vmatprep.subr.bf16.mxu0 %v6920_v15  ;;  %4299 = vmatprep.subr.bf16.mxu1 %v5899_v16 }
 0x1bb   : > { %3784 = vmatpush1.bf16.msra.mxu0 %v6925_v53  ;;  %4300 = vmatpush1.bf16.msra.mxu1 %v5897_v18 }
 0x1bc   : > { %3785 = vmatprep.subr.bf16.mxu0 %v6930_v54  ;;  %4301 = vmatprep.subr.bf16.mxu1 %v5902_v20 }
 0x1bf   : > { %3786 = vmatpush1.bf16.msra.mxu0 %v6935_v2  ;;  %4302 = vmatpush1.bf16.msra.mxu1 %v5900_v22 }
 0x1c0   : > { %3787 = vmatprep.subr.bf16.mxu0 %v6940_v4  ;;  %4303 = vmatprep.subr.bf16.mxu1 %v5905_v24 }
 0x1c1   : > { %v1741_v28 = vpop.f32.mrb[4].mxu0  ;;  %v2257_v30 = vpop.f32.mrb[4].mxu1 }
 0x1c2   : > { %v1754_v32 = vadd.f32 %v1741_v28, %v6805_v47  ;;  %v2270_v34 = vadd.f32 %v2257_v30, %v6805_v47  ;;  %v1743_v36 = vpop.f32.mrb[5].mxu0  ;;  %v2259_v55 = vpop.f32.mrb[5].mxu1 }
 0x1c3   : > { %v1755_v57 = vadd.f32 %v1743_v36, %v6805_v47  ;;  %v2271_v58 = vadd.f32 %v2259_v55, %v6805_v47  ;;  %v1745_v59 = vpop.f32.mrb[6].mxu0  ;;  %v2261_v60 = vpop.f32.mrb[6].mxu1  ;;  %3788 = vmatpush1.bf16.msra.mxu0 %v6945_v6  ;;  %4304 = vmatpush1.bf16.msra.mxu1 %v5903_v26 }
 0x1c4   : > { %v1758_v61 = vmax.f32 %v1754_v32, 0.0  ;;  %v2274_v62 = vmax.f32 %v2270_v34, 0.0  ;;  %v1756_v63 = vadd.f32 %v1745_v59, %v6825_v51  ;;  %v2272_v1 = vadd.f32 %v2261_v60, %v6825_v51  ;;  %v1747_v3 = vpop.f32.mrb[7].mxu0  ;;  %v2263_v5 = vpop.f32.mrb[7].mxu1 }
 0x1c5   : > { %v1759_v56 = vmax.f32 %v1755_v57, 0.0  ;;  %v2275_v7 = vmax.f32 %v2271_v58, 0.0  ;;  %v1757_v9 = vadd.f32 %v1747_v3, %v6825_v51  ;;  %v2273_v11 = vadd.f32 %v2263_v5, %v6825_v51 }
 0x1c6   : > { %4845 = vst [vmem:[%s6840_s19 + $0x40] sm:$0xff] %v1758_v61  ;;  %4972 = vst [vmem:[%s6840_s19 + $0x60] sm:$0xff] %v2274_v62  ;;  %v1760_v13 = vmax.f32 %v1756_v63, 0.0  ;;  %v2276_v15 = vmax.f32 %v2272_v1, 0.0  ;;  %3804 = vmatmul.mubr.bf16.vlgmr.msra.gmra.mrb[12].mxu0 %v6835_v10  ;;  %4320 = vmatmul.mubr.bf16.vlgmr.msra.gmra.mrb[12].mxu1 %v6835_v10 }
 0x1c7   : > { %4846 = vst [vmem:[%s6840_s19 + $0x48] sm:$0xff] %v1759_v56  ;;  %4973 = vst [vmem:[%s6840_s19 + $0x68] sm:$0xff] %v2275_v7  ;;  %v1761_v53 = vmax.f32 %v1757_v9, 0.0  ;;  %v2277_v54 = vmax.f32 %v2273_v11, 0.0 }
 0x1c8   : > { %4847 = vst [vmem:[%s6840_s19 + $0x50] sm:$0xff] %v1760_v13  ;;  %4974 = vst [vmem:[%s6840_s19 + $0x70] sm:$0xff] %v2276_v15 }
 0x1c9   : > { %4848 = vst [vmem:[%s6840_s19 + $0x58] sm:$0xff] %v1761_v53  ;;  %4975 = vst [vmem:[%s6840_s19 + $0x78] sm:$0xff] %v2277_v54 }
 0x22d   : > { %v2773_v2 = vpop.f32.mrb[8].mxu0  ;;  %v3289_v4 = vpop.f32.mrb[8].mxu1 }
 0x22e   : > { %v2786_v6 = vadd.f32 %v2773_v2, %v6805_v47  ;;  %v3302_v8 = vadd.f32 %v3289_v4, %v6805_v47  ;;  %v2775_v12 = vpop.f32.mrb[9].mxu0  ;;  %v3291_v14 = vpop.f32.mrb[9].mxu1 }
 0x22f   : > { %v2787_v10 = vadd.f32 %v2775_v12, %v6805_v47  ;;  %v3303_v38 = vadd.f32 %v3291_v14, %v6805_v47  ;;  %v2777_v41 = vpop.f32.mrb[10].mxu0  ;;  %v3293_v17 = vpop.f32.mrb[10].mxu1 }
 0x230   : > { %v2790_v19 = vmax.f32 %v2786_v6, 0.0  ;;  %v3306_v21 = vmax.f32 %v3302_v8, 0.0  ;;  %v2788_v25 = vadd.f32 %v2777_v41, %v6825_v51  ;;  %v3304_v27 = vadd.f32 %v3293_v17, %v6825_v51  ;;  %v2779_v31 = vpop.f32.mrb[11].mxu0  ;;  %v3295_v33 = vpop.f32.mrb[11].mxu1 }
 0x231   : > { %v2791_v35 = vmax.f32 %v2787_v10, 0.0  ;;  %v3307_v37 = vmax.f32 %v3303_v38, 0.0  ;;  %v2789_v39 = vadd.f32 %v2779_v31, %v6825_v51  ;;  %v3305_v40 = vadd.f32 %v3295_v33, %v6825_v51 }
 0x232   : > { %5099 = vst [vmem:[%s6840_s19 + $0x80] sm:$0xff] %v2790_v19  ;;  %5226 = vst [vmem:[%s6840_s19 + $0xa0] sm:$0xff] %v3306_v21  ;;  %v2792_v42 = vmax.f32 %v2788_v25, 0.0  ;;  %v3308_v43 = vmax.f32 %v3304_v27, 0.0 }
 0x233   : > { %5100 = vst [vmem:[%s6840_s19 + $0x88] sm:$0xff] %v2791_v35  ;;  %5227 = vst [vmem:[%s6840_s19 + $0xa8] sm:$0xff] %v3307_v37  ;;  %v2793_v44 = vmax.f32 %v2789_v39, 0.0  ;;  %v3309_v0 = vmax.f32 %v3305_v40, 0.0 }
 0x234   : > { %5101 = vst [vmem:[%s6840_s19 + $0x90] sm:$0xff] %v2792_v42  ;;  %5228 = vst [vmem:[%s6840_s19 + $0xb0] sm:$0xff] %v3308_v43 }
 0x235   : > { %5102 = vst [vmem:[%s6840_s19 + $0x98] sm:$0xff] %v2793_v44  ;;  %5229 = vst [vmem:[%s6840_s19 + $0xb8] sm:$0xff] %v3309_v0 }
 0x299   : > { %v3805_v45 = vpop.f32.mrb[12].mxu0  ;;  %v4321_v23 = vpop.f32.mrb[12].mxu1 }
 0x29a   : > { %v3818_v46 = vadd.f32 %v3805_v45, %v6805_v47  ;;  %v4334_v48 = vadd.f32 %v4321_v23, %v6805_v47  ;;  %v3807_v29 = vpop.f32.mrb[13].mxu0  ;;  %v4323_v49 = vpop.f32.mrb[13].mxu1 }
 0x29b   : > { %v3819_v50 = vadd.f32 %v3807_v29, %v6805_v47  ;;  %v4335_v52 = vadd.f32 %v4323_v49, %v6805_v47  ;;  %v3809_v16 = vpop.f32.mrb[14].mxu0  ;;  %v4325_v18 = vpop.f32.mrb[14].mxu1 }
 0x29c   : > { %v3822_v20 = vmax.f32 %v3818_v46, 0.0  ;;  %v4338_v22 = vmax.f32 %v4334_v48, 0.0  ;;  %v3820_v24 = vadd.f32 %v3809_v16, %v6825_v51  ;;  %v4336_v26 = vadd.f32 %v4325_v18, %v6825_v51  ;;  %v3811_v28 = vpop.f32.mrb[15].mxu0  ;;  %v4327_v30 = vpop.f32.mrb[15].mxu1 }
 0x29d   : > { %v3823_v32 = vmax.f32 %v3819_v50, 0.0  ;;  %v4339_v34 = vmax.f32 %v4335_v52, 0.0  ;;  %v3821_v47 = vadd.f32 %v3811_v28, %v6825_v51  ;;  %v4337_v36 = vadd.f32 %v4327_v30, %v6825_v51 }
 0x29e   : > { %5353 = vst [vmem:[%s6840_s19 + $0xc0] sm:$0xff] %v3822_v20  ;;  %5480 = vst [vmem:[%s6840_s19 + $0xe0] sm:$0xff] %v4338_v22  ;;  %v3824_v55 = vmax.f32 %v3820_v24, 0.0  ;;  %v4340_v57 = vmax.f32 %v4336_v26, 0.0 }
 0x29f   : > { %5354 = vst [vmem:[%s6840_s19 + $0xc8] sm:$0xff] %v3823_v32  ;;  %5481 = vst [vmem:[%s6840_s19 + $0xe8] sm:$0xff] %v4339_v34  ;;  %v3825_v58 = vmax.f32 %v3821_v47, 0.0  ;;  %v4341_v59 = vmax.f32 %v4337_v36, 0.0 }
 0x2a0   : > { %5355 = vst [vmem:[%s6840_s19 + $0xd0] sm:$0xff] %v3824_v55  ;;  %5482 = vst [vmem:[%s6840_s19 + $0xf0] sm:$0xff] %v4340_v57 }
 0x2a1   : > { %5356 = vst [vmem:[%s6840_s19 + $0xd8] sm:$0xff] %v3825_v58  ;;  %5483 = vst [vmem:[%s6840_s19 + $0xf8] sm:$0xff] %v4341_v59 }
 0x2a2 PF: > { %s13_s16 = sadd.s32 1, %s5944_s16   ;;  %s7104_s12 = smov %s5936_s14 }
 0x2a3   : > { %p10_p7 = scmp.ge.s32.totalorder %s13_s16, 6   ;;  %s7105_s13 = smov %s5940_s15 }
 0x2a4   : > { %s7106_s14 = smov %s7109_s17  ;;  %s7107_s15 = smov %s7113_s18 }
 0x2a5   :  { %12 = sbr.rel (!%p10_p7) target bundleno = 3 (0x3), region = 81 }

</bundles_post_ra>
